<compile_context>
chip_gen: v6e
topology: v6e:2x2x1
jax: 0.10.0
libtpu: 0.0.40
codegen_flags: <defaults>
</compile_context>

<pallas_src>
import functools
import itertools

import jax
import jax.numpy as jnp
from jax import lax
from jax.experimental import pallas as pl
from jax.experimental.pallas import tpu as pltpu


def hardswish(x):
    # x * relu6(x + 3) / 6   (kept in f32 inside the kernel)
    return x * jnp.clip(x + 3.0, 0.0, 6.0) * (1.0 / 6.0)


# ----------------------------- Pallas kernel ------------------------------ #

def attention_kernel(x_ref, wq_ref, wk_ref, wv_ref, bq_ref, bk_ref, bv_ref,
                     ab_ref, wp_ref, bp_ref, out_ref, *, B, N, num_heads, scale):
    """Single-step kernel over the whole (tiny) batch.

    x_ref  : (B, C, N)   NCHW input with spatial flattened (f32)
    wq/wk  : (nh, C, kd) bf16 folded per-head weights
    wv     : (nh, C, d)  bf16
    bq/bk  : (nh, 1, kd) f32 folded biases
    bv     : (nh, 1, d)  f32
    ab_ref : (nh, N, N)  bf16 gathered attention biases
    wp_ref : (nh, d, C)  bf16 folded proj weight (head-major rows of the concat)
    bp_ref : (1, C)      f32 folded proj bias
    out_ref: (B, C, N)   f32 NCHW output
    """
    C = x_ref.shape[1]

    # Channel-last merged slab (B*N, C): per-batch (C, N) -> (N, C) transposes
    # ride on the XLU; batch merge gives 128-row matmuls.
    x2 = jnp.concatenate([jnp.transpose(x_ref[b]) for b in range(B)], axis=0)
    x2 = x2.astype(jnp.bfloat16)                      # (B*N, C) bf16 for the MXU

    # f32 projection accumulator, seeded with the folded proj bias.
    acc = jnp.broadcast_to(bp_ref[...], (B * N, C)).astype(jnp.float32)

    for hd in range(num_heads):
        # Per-head qkv via leading-axis weight indexing (no lane slicing).
        q = hardswish(jnp.dot(x2, wq_ref[hd],
                              preferred_element_type=jnp.float32) + bq_ref[hd])
        k = hardswish(jnp.dot(x2, wk_ref[hd],
                              preferred_element_type=jnp.float32) + bk_ref[hd])
        v = hardswish(jnp.dot(x2, wv_ref[hd],
                              preferred_element_type=jnp.float32) + bv_ref[hd])
        # Fold the softmax scale into q (f32) before the bf16 cast: removes the
        # (N, N) per-score multiply; exact when key_dim is a power of two.
        qb = (q * scale).astype(jnp.bfloat16)
        kb = k.astype(jnp.bfloat16)
        vb = v.astype(jnp.bfloat16)
        bias = ab_ref[hd].astype(jnp.float32)         # (N, N)

        o_rows = []
        for b in range(B):                            # per-batch attention core
            sl = slice(b * N, (b + 1) * N)            # static sublane slice
            s = lax.dot_general(qb[sl], kb[sl], (((1,), (1,)), ((), ())),
                                preferred_element_type=jnp.float32)
            s = s + bias
            s = s - jnp.max(s, axis=-1, keepdims=True)
            p = jnp.exp(s)
            p = p * pl.reciprocal(jnp.sum(p, axis=-1, keepdims=True), approx=True)
            o_rows.append(jnp.dot(p.astype(jnp.bfloat16), vb[sl],
                                  preferred_element_type=jnp.float32))

        o = jnp.concatenate(o_rows, axis=0)           # (B*N, d) f32, row concat
        # hardswish(concat_h o_h) @ Wp  ==  sum_h hardswish(o_h) @ Wp_h
        acc = acc + jnp.dot(hardswish(o).astype(jnp.bfloat16), wp_ref[hd],
                            preferred_element_type=jnp.float32)

    y = hardswish(acc)                                # (B*N, C) f32

    # Store back in NCHW layout: per-batch (N, C) -> (C, N).
    for b in range(B):
        out_ref[b] = jnp.transpose(y[b * N:(b + 1) * N]).astype(out_ref.dtype)


def attention_pallas(x_nchw, wqkv, bqkv, ab, wproj, bproj, *,
                     num_heads, key_dim, attn_ratio):
    B, C, H, W = x_nchw.shape
    N = H * W
    d = attn_ratio * key_dim
    hs = 2 * key_dim + d
    scale = float(key_dim) ** -0.5

    # NCHW -> (B, C, N) is a free reshape; no wrapper transpose/HBM pass.
    x_cn = x_nchw.reshape(B, C, N)

    # Split the BN-folded qkv weight (C, h) / bias (1, h) into stacked per-head
    # q/k/v pieces (head indexed on the leading axis in-kernel). Weights -> bf16.
    wqkv_h = wqkv.reshape(C, num_heads, hs)
    wq = jnp.transpose(wqkv_h[:, :, :key_dim], (1, 0, 2)).astype(jnp.bfloat16)
    wk = jnp.transpose(wqkv_h[:, :, key_dim:2 * key_dim], (1, 0, 2)).astype(jnp.bfloat16)
    wv = jnp.transpose(wqkv_h[:, :, 2 * key_dim:], (1, 0, 2)).astype(jnp.bfloat16)
    bqkv_h = bqkv.reshape(num_heads, hs)
    bq = bqkv_h[:, None, :key_dim]                     # (nh, 1, kd) f32
    bk = bqkv_h[:, None, key_dim:2 * key_dim]
    bv = bqkv_h[:, None, 2 * key_dim:]

    wp = wproj.reshape(num_heads, d, C).astype(jnp.bfloat16)   # (nh, d, C)
    ab_bf = ab.astype(jnp.bfloat16)                            # (nh, N, N)

    kernel = functools.partial(attention_kernel, B=B, N=N,
                               num_heads=num_heads, scale=scale)

    out_cn = pl.pallas_call(
        kernel,
        out_shape=jax.ShapeDtypeStruct((B, C, N), jnp.float32),
        grid_spec=pltpu.PrefetchScalarGridSpec(
            num_scalar_prefetch=0,
            grid=(1,),
            in_specs=[
                pl.BlockSpec((B, C, N), lambda i: (0, 0, 0)),
                pl.BlockSpec((num_heads, C, key_dim), lambda i: (0, 0, 0)),
                pl.BlockSpec((num_heads, C, key_dim), lambda i: (0, 0, 0)),
                pl.BlockSpec((num_heads, C, d), lambda i: (0, 0, 0)),
                pl.BlockSpec((num_heads, 1, key_dim), lambda i: (0, 0, 0)),
                pl.BlockSpec((num_heads, 1, key_dim), lambda i: (0, 0, 0)),
                pl.BlockSpec((num_heads, 1, d), lambda i: (0, 0, 0)),
                pl.BlockSpec((num_heads, N, N), lambda i: (0, 0, 0)),
                pl.BlockSpec((num_heads, d, C), lambda i: (0, 0, 0)),
                pl.BlockSpec((1, C), lambda i: (0, 0)),
            ],
            out_specs=pl.BlockSpec((B, C, N), lambda i: (0, 0, 0)),
        ),
        compiler_params=pltpu.CompilerParams(
            dimension_semantics=("arbitrary",)),
    )(x_cn, wq, wk, wv, bq, bk, bv, ab_bf, wp, bproj)

    return out_cn.reshape(B, C, H, W)


# ------------------------- parameter construction ------------------------- #

def make_bias_index(resolution):
    """Reproduces the attention_bias_idxs construction from __init__."""
    points = list(itertools.product(range(resolution), range(resolution)))
    attention_offsets = {}
    idxs = []
    for p1 in points:
        for p2 in points:
            offset = (abs(p1[0] - p2[0]), abs(p1[1] - p2[1]))
            if offset not in attention_offsets:
                attention_offsets[offset] = len(attention_offsets)
            idxs.append(attention_offsets[offset])
    N = len(points)
    return (jnp.array(idxs, dtype=jnp.int32).reshape(N, N),
            len(attention_offsets))


def fold_conv_bn(w_conv, gamma, beta, mean, var, eps=1e-5):
    """Fold eval-mode BatchNorm into a bias-free 1x1 conv.

    w_conv: (out, in).  Returns (in, out) weight and (1, out) bias so that
    y = x @ W + b  (x channel-last).
    """
    s = gamma / jnp.sqrt(var + eps)
    w = w_conv * s[:, None]
    b = beta - mean * s
    return jnp.transpose(w), b[None, :]


# -------------------------- pure-JAX reference ---------------------------- #

def attention_ref(x_nchw, wqkv, bqkv, ab, wproj, bproj, *,
                  num_heads, key_dim, attn_ratio):
    B, C, H, W = x_nchw.shape
    N = H * W
    d = attn_ratio * key_dim
    x = jnp.transpose(x_nchw, (0, 2, 3, 1)).reshape(B, N, C)
    qkv = hardswish(x @ wqkv + bqkv)                           # (B, N, h)
    qkv = qkv.reshape(B, N, num_heads, 2 * key_dim + d).transpose(0, 2, 1, 3)
    q = qkv[..., :key_dim]
    k = qkv[..., key_dim:2 * key_dim]
    v = qkv[..., 2 * key_dim:]
    attn = jnp.einsum('bhnk,bhmk->bhnm', q, k) * float(key_dim) ** -0.5
    attn = jax.nn.softmax(attn + ab[None], axis=-1)
    o = jnp.einsum('bhnm,bhmd->bhnd', attn, v)
    o = o.transpose(0, 2, 1, 3).reshape(B, N, num_heads * d)
    y = hardswish(hardswish(o) @ wproj + bproj)
    return jnp.transpose(y.reshape(B, H, W, C), (0, 3, 1, 2))


# --------------------------------- main ------------------------------------ #

if __name__ == "__main__":
    # Small configuration consistent with the module's forward.
    B = 2
    dim = 32           # C (input & output channels)
    key_dim = 16
    num_heads = 2
    attn_ratio = 2
    resolution = 8     # H = W = resolution, N = 64

    d = attn_ratio * key_dim              # 32
    dh = d * num_heads                    # 64
    nh_kd = key_dim * num_heads           # 32
    h = dh + 2 * nh_kd                    # 128
    H = W = resolution
    N = H * W

    key = jax.random.PRNGKey(0)
    ks = jax.random.split(key, 12)

    # Input (NCHW, like PyTorch).
    x = jax.random.normal(ks[0], (B, dim, H, W), dtype=jnp.float32)

    # qkv Conv_BN_HW parameters (eval-mode BN, folded).
    w_qkv_conv = 0.1 * jax.random.normal(ks[1], (h, dim), dtype=jnp.float32)
    g_qkv = 1.0 + 0.1 * jax.random.normal(ks[2], (h,), dtype=jnp.float32)
    b_qkv = 0.05 * jax.random.normal(ks[3], (h,), dtype=jnp.float32)
    m_qkv = 0.01 * jax.random.normal(ks[4], (h,), dtype=jnp.float32)
    v_qkv = 0.5 + jax.random.uniform(ks[5], (h,), dtype=jnp.float32)
    wqkv, bqkv = fold_conv_bn(w_qkv_conv, g_qkv, b_qkv, m_qkv, v_qkv)

    # proj Conv_BN_HW parameters (eval-mode BN, folded).
    w_proj_conv = 0.1 * jax.random.normal(ks[6], (dim, dh), dtype=jnp.float32)
    g_proj = 1.0 + 0.1 * jax.random.normal(ks[7], (dim,), dtype=jnp.float32)
    b_proj = 0.05 * jax.random.normal(ks[8], (dim,), dtype=jnp.float32)
    m_proj = 0.01 * jax.random.normal(ks[9], (dim,), dtype=jnp.float32)
    v_proj = 0.5 + jax.random.uniform(ks[10], (dim,), dtype=jnp.float32)
    wproj, bproj = fold_conv_bn(w_proj_conv, g_proj, b_proj, m_proj, v_proj)

    # Attention biases: parameter (num_heads, num_offsets), gathered by idxs
    # (this is the precomputed `self.ab` used in eval mode).
    idxs, n_offsets = make_bias_index(resolution)
    attention_biases = 0.02 * jax.random.normal(
        ks[11], (num_heads, n_offsets), dtype=jnp.float32)
    ab = attention_biases[:, idxs]        # (num_heads, N, N)

    out = attention_pallas(x, wqkv, bqkv, ab, wproj, bproj,
                           num_heads=num_heads, key_dim=key_dim,
                           attn_ratio=attn_ratio)
    out = jax.block_until_ready(out)

    ref = attention_ref(x, wqkv, bqkv, ab, wproj, bproj,
                        num_heads=num_heads, key_dim=key_dim,
                        attn_ratio=attn_ratio)
    ref = jax.block_until_ready(ref)

    assert out.shape == (B, dim, H, W)
    # Tolerance covers bf16 matmul operands + approx reciprocal vs. f32 reference.
    assert jnp.allclose(out, ref, atol=5e-2, rtol=5e-2), "mismatch vs reference"

    print("KERNEL_OK")
</pallas_src>

<mosaic_0001>
module attributes {stable_mosaic.version = 11 : i64} {
  func.func @attention_kernel(%arg0: i32, %arg1: memref<2x32x64xf32, #tpu.memory_space<vmem>>, %arg2: memref<2x32x16xbf16, #tpu.memory_space<vmem>>, %arg3: memref<2x32x16xbf16, #tpu.memory_space<vmem>>, %arg4: memref<2x32x32xbf16, #tpu.memory_space<vmem>>, %arg5: memref<2x1x16xf32, #tpu.memory_space<vmem>>, %arg6: memref<2x1x16xf32, #tpu.memory_space<vmem>>, %arg7: memref<2x1x32xf32, #tpu.memory_space<vmem>>, %arg8: memref<2x64x64xbf16, #tpu.memory_space<vmem>>, %arg9: memref<2x32x32xbf16, #tpu.memory_space<vmem>>, %arg10: memref<1x32xf32, #tpu.memory_space<vmem>>, %arg11: memref<2x32x64xf32, #tpu.memory_space<vmem>>) attributes {dimension_semantics = [#tpu.dimension_semantics<arbitrary>], iteration_bounds = array<i64: 1>, scalar_prefetch = 0 : i64, scratch_operands = 0 : i64, tpu.core_type = #tpu.core_type<tc>, window_params = [{pipeline_mode = #tpu.pipeline_mode<synchronous>, transform_indices = @transform_0, window_bounds = array<i64: 2, 32, 64>}, {pipeline_mode = #tpu.pipeline_mode<synchronous>, transform_indices = @transform_1, window_bounds = array<i64: 2, 32, 16>}, {pipeline_mode = #tpu.pipeline_mode<synchronous>, transform_indices = @transform_2, window_bounds = array<i64: 2, 32, 16>}, {pipeline_mode = #tpu.pipeline_mode<synchronous>, transform_indices = @transform_3, window_bounds = array<i64: 2, 32, 32>}, {pipeline_mode = #tpu.pipeline_mode<synchronous>, transform_indices = @transform_4, window_bounds = array<i64: 2, 1, 16>}, {pipeline_mode = #tpu.pipeline_mode<synchronous>, transform_indices = @transform_5, window_bounds = array<i64: 2, 1, 16>}, {pipeline_mode = #tpu.pipeline_mode<synchronous>, transform_indices = @transform_6, window_bounds = array<i64: 2, 1, 32>}, {pipeline_mode = #tpu.pipeline_mode<synchronous>, transform_indices = @transform_7, window_bounds = array<i64: 2, 64, 64>}, {pipeline_mode = #tpu.pipeline_mode<synchronous>, transform_indices = @transform_8, window_bounds = array<i64: 2, 32, 32>}, {pipeline_mode = #tpu.pipeline_mode<synchronous>, transform_indices = @transform_9, window_bounds = array<i64: 1, 32>}, {pipeline_mode = #tpu.pipeline_mode<synchronous>, transform_indices = @transform_10, window_bounds = array<i64: 2, 32, 64>}]} {
    %c0 = arith.constant 0 : index
    %c0_0 = arith.constant 0 : index
    %c0_1 = arith.constant 0 : index
    %0 = vector.load %arg1[%c0, %c0_0, %c0_1] : memref<2x32x64xf32, #tpu.memory_space<vmem>>, vector<1x32x64xf32>
    %1 = vector.shape_cast %0 : vector<1x32x64xf32> to vector<32x64xf32>
    %2 = tpu.transpose %1, [1, 0] : vector<32x64xf32> -> vector<64x32xf32>
    %c1 = arith.constant 1 : index
    %c0_2 = arith.constant 0 : index
    %c0_3 = arith.constant 0 : index
    %3 = vector.load %arg1[%c1, %c0_2, %c0_3] : memref<2x32x64xf32, #tpu.memory_space<vmem>>, vector<1x32x64xf32>
    %4 = vector.shape_cast %3 : vector<1x32x64xf32> to vector<32x64xf32>
    %5 = tpu.transpose %4, [1, 0] : vector<32x64xf32> -> vector<64x32xf32>
    %6 = tpu.concatenate %2, %5 in 0 : vector<64x32xf32>, vector<64x32xf32> -> vector<128x32xf32>
    %7 = arith.truncf %6 : vector<128x32xf32> to vector<128x32xbf16>
    %c0_4 = arith.constant 0 : index
    %c0_5 = arith.constant 0 : index
    %8 = vector.load %arg10[%c0_4, %c0_5] : memref<1x32xf32, #tpu.memory_space<vmem>>, vector<1x32xf32>
    %9 = vector.shape_cast %8 : vector<1x32xf32> to vector<1x32xf32>
    %10 = vector.broadcast %9 : vector<1x32xf32> to vector<128x32xf32>
    %c0_6 = arith.constant 0 : index
    %c0_7 = arith.constant 0 : index
    %c0_8 = arith.constant 0 : index
    %11 = vector.load %arg2[%c0_6, %c0_7, %c0_8] : memref<2x32x16xbf16, #tpu.memory_space<vmem>>, vector<1x32x16xbf16>
    %12 = vector.shape_cast %11 : vector<1x32x16xbf16> to vector<32x16xbf16>
    %cst = arith.constant dense<0.000000e+00> : vector<128x16xf32>
    %13 = tpu.matmul %7, %12, %cst {dimension_numbers = #tpu.dot_dimension_numbers<[1], [0], [0], [1], [0, 0, 1, 1], [], []>} : vector<128x32xbf16>, vector<32x16xbf16>, vector<128x16xf32> -> vector<128x16xf32>
    %c0_9 = arith.constant 0 : index
    %c0_10 = arith.constant 0 : index
    %c0_11 = arith.constant 0 : index
    %14 = vector.load %arg5[%c0_9, %c0_10, %c0_11] : memref<2x1x16xf32, #tpu.memory_space<vmem>>, vector<1x1x16xf32>
    %15 = vector.shape_cast %14 : vector<1x1x16xf32> to vector<1x16xf32>
    %16 = vector.broadcast %15 : vector<1x16xf32> to vector<128x16xf32>
    %17 = arith.addf %13, %16 : vector<128x16xf32>
    %cst_12 = arith.constant 3.000000e+00 : f32
    %18 = vector.broadcast %cst_12 : f32 to vector<128x16xf32>
    %19 = arith.addf %17, %18 : vector<128x16xf32>
    %cst_13 = arith.constant 0.000000e+00 : f32
    %cst_14 = arith.constant 6.000000e+00 : f32
    %20 = vector.broadcast %cst_13 : f32 to vector<128x16xf32>
    %21 = arith.maximumf %20, %19 : vector<128x16xf32>
    %22 = vector.broadcast %cst_14 : f32 to vector<128x16xf32>
    %23 = arith.minimumf %22, %21 : vector<128x16xf32>
    %24 = arith.mulf %17, %23 : vector<128x16xf32>
    %cst_15 = arith.constant 0.166666672 : f32
    %25 = vector.broadcast %cst_15 : f32 to vector<128x16xf32>
    %26 = arith.mulf %24, %25 : vector<128x16xf32>
    %c0_16 = arith.constant 0 : index
    %c0_17 = arith.constant 0 : index
    %c0_18 = arith.constant 0 : index
    %27 = vector.load %arg3[%c0_16, %c0_17, %c0_18] : memref<2x32x16xbf16, #tpu.memory_space<vmem>>, vector<1x32x16xbf16>
    %28 = vector.shape_cast %27 : vector<1x32x16xbf16> to vector<32x16xbf16>
    %cst_19 = arith.constant dense<0.000000e+00> : vector<128x16xf32>
    %29 = tpu.matmul %7, %28, %cst_19 {dimension_numbers = #tpu.dot_dimension_numbers<[1], [0], [0], [1], [0, 0, 1, 1], [], []>} : vector<128x32xbf16>, vector<32x16xbf16>, vector<128x16xf32> -> vector<128x16xf32>
    %c0_20 = arith.constant 0 : index
    %c0_21 = arith.constant 0 : index
    %c0_22 = arith.constant 0 : index
    %30 = vector.load %arg6[%c0_20, %c0_21, %c0_22] : memref<2x1x16xf32, #tpu.memory_space<vmem>>, vector<1x1x16xf32>
    %31 = vector.shape_cast %30 : vector<1x1x16xf32> to vector<1x16xf32>
    %32 = vector.broadcast %31 : vector<1x16xf32> to vector<128x16xf32>
    %33 = arith.addf %29, %32 : vector<128x16xf32>
    %cst_23 = arith.constant 3.000000e+00 : f32
    %34 = vector.broadcast %cst_23 : f32 to vector<128x16xf32>
    %35 = arith.addf %33, %34 : vector<128x16xf32>
    %cst_24 = arith.constant 0.000000e+00 : f32
    %cst_25 = arith.constant 6.000000e+00 : f32
    %36 = vector.broadcast %cst_24 : f32 to vector<128x16xf32>
    %37 = arith.maximumf %36, %35 : vector<128x16xf32>
    %38 = vector.broadcast %cst_25 : f32 to vector<128x16xf32>
    %39 = arith.minimumf %38, %37 : vector<128x16xf32>
    %40 = arith.mulf %33, %39 : vector<128x16xf32>
    %cst_26 = arith.constant 0.166666672 : f32
    %41 = vector.broadcast %cst_26 : f32 to vector<128x16xf32>
    %42 = arith.mulf %40, %41 : vector<128x16xf32>
    %c0_27 = arith.constant 0 : index
    %c0_28 = arith.constant 0 : index
    %c0_29 = arith.constant 0 : index
    %43 = vector.load %arg4[%c0_27, %c0_28, %c0_29] : memref<2x32x32xbf16, #tpu.memory_space<vmem>>, vector<1x32x32xbf16>
    %44 = vector.shape_cast %43 : vector<1x32x32xbf16> to vector<32x32xbf16>
    %cst_30 = arith.constant dense<0.000000e+00> : vector<128x32xf32>
    %45 = tpu.matmul %7, %44, %cst_30 {dimension_numbers = #tpu.dot_dimension_numbers<[1], [0], [0], [1], [0, 0, 1, 1], [], []>} : vector<128x32xbf16>, vector<32x32xbf16>, vector<128x32xf32> -> vector<128x32xf32>
    %c0_31 = arith.constant 0 : index
    %c0_32 = arith.constant 0 : index
    %c0_33 = arith.constant 0 : index
    %46 = vector.load %arg7[%c0_31, %c0_32, %c0_33] : memref<2x1x32xf32, #tpu.memory_space<vmem>>, vector<1x1x32xf32>
    %47 = vector.shape_cast %46 : vector<1x1x32xf32> to vector<1x32xf32>
    %48 = vector.broadcast %47 : vector<1x32xf32> to vector<128x32xf32>
    %49 = arith.addf %45, %48 : vector<128x32xf32>
    %cst_34 = arith.constant 3.000000e+00 : f32
    %50 = vector.broadcast %cst_34 : f32 to vector<128x32xf32>
    %51 = arith.addf %49, %50 : vector<128x32xf32>
    %cst_35 = arith.constant 0.000000e+00 : f32
    %cst_36 = arith.constant 6.000000e+00 : f32
    %52 = vector.broadcast %cst_35 : f32 to vector<128x32xf32>
    %53 = arith.maximumf %52, %51 : vector<128x32xf32>
    %54 = vector.broadcast %cst_36 : f32 to vector<128x32xf32>
    %55 = arith.minimumf %54, %53 : vector<128x32xf32>
    %56 = arith.mulf %49, %55 : vector<128x32xf32>
    %cst_37 = arith.constant 0.166666672 : f32
    %57 = vector.broadcast %cst_37 : f32 to vector<128x32xf32>
    %58 = arith.mulf %56, %57 : vector<128x32xf32>
    %cst_38 = arith.constant 2.500000e-01 : f32
    %59 = vector.broadcast %cst_38 : f32 to vector<128x16xf32>
    %60 = arith.mulf %26, %59 : vector<128x16xf32>
    %61 = arith.truncf %60 : vector<128x16xf32> to vector<128x16xbf16>
    %62 = arith.truncf %42 : vector<128x16xf32> to vector<128x16xbf16>
    %63 = arith.truncf %58 : vector<128x32xf32> to vector<128x32xbf16>
    %c0_39 = arith.constant 0 : index
    %c0_40 = arith.constant 0 : index
    %c0_41 = arith.constant 0 : index
    %64 = vector.load %arg8[%c0_39, %c0_40, %c0_41] : memref<2x64x64xbf16, #tpu.memory_space<vmem>>, vector<1x64x64xbf16>
    %65 = vector.shape_cast %64 : vector<1x64x64xbf16> to vector<64x64xbf16>
    %66 = arith.extf %65 : vector<64x64xbf16> to vector<64x64xf32>
    %67 = vector.extract_strided_slice %61 {offsets = [0, 0], sizes = [64, 16], strides = [1, 1]} : vector<128x16xbf16> to vector<64x16xbf16>
    %68 = vector.extract_strided_slice %62 {offsets = [0, 0], sizes = [64, 16], strides = [1, 1]} : vector<128x16xbf16> to vector<64x16xbf16>
    %cst_42 = arith.constant dense<0.000000e+00> : vector<64x64xf32>
    %69 = tpu.matmul %67, %68, %cst_42 {dimension_numbers = #tpu.dot_dimension_numbers<[1], [1], [0], [0], [0, 0, 1, 0], [], []>} : vector<64x16xbf16>, vector<64x16xbf16>, vector<64x64xf32> -> vector<64x64xf32>
    %70 = arith.addf %69, %66 : vector<64x64xf32>
    %cst_43 = arith.constant dense<0xFF800000> : vector<64xf32>
    %71 = vector.multi_reduction <maximumf>, %70, %cst_43 [1] : vector<64x64xf32> to vector<64xf32>
    %72 = vector.shape_cast %71 : vector<64xf32> to vector<64x1xf32>
    %73 = vector.broadcast %72 : vector<64x1xf32> to vector<64x64xf32>
    %74 = arith.subf %70, %73 : vector<64x64xf32>
    %75 = math.exp %74 : vector<64x64xf32>
    %cst_44 = arith.constant dense<0.000000e+00> : vector<64xf32>
    %76 = vector.multi_reduction <add>, %75, %cst_44 [1] : vector<64x64xf32> to vector<64xf32>
    %77 = vector.shape_cast %76 : vector<64xf32> to vector<64x1xf32>
    %78 = tpu.reciprocal %77 {approx = true} : vector<64x1xf32> -> vector<64x1xf32>
    %79 = vector.broadcast %78 : vector<64x1xf32> to vector<64x64xf32>
    %80 = arith.mulf %75, %79 : vector<64x64xf32>
    %81 = arith.truncf %80 : vector<64x64xf32> to vector<64x64xbf16>
    %82 = vector.extract_strided_slice %63 {offsets = [0, 0], sizes = [64, 32], strides = [1, 1]} : vector<128x32xbf16> to vector<64x32xbf16>
    %cst_45 = arith.constant dense<0.000000e+00> : vector<64x32xf32>
    %83 = tpu.matmul %81, %82, %cst_45 {dimension_numbers = #tpu.dot_dimension_numbers<[1], [0], [0], [1], [0, 0, 1, 1], [], []>} : vector<64x64xbf16>, vector<64x32xbf16>, vector<64x32xf32> -> vector<64x32xf32>
    %84 = vector.extract_strided_slice %61 {offsets = [64, 0], sizes = [64, 16], strides = [1, 1]} : vector<128x16xbf16> to vector<64x16xbf16>
    %85 = vector.extract_strided_slice %62 {offsets = [64, 0], sizes = [64, 16], strides = [1, 1]} : vector<128x16xbf16> to vector<64x16xbf16>
    %cst_46 = arith.constant dense<0.000000e+00> : vector<64x64xf32>
    %86 = tpu.matmul %84, %85, %cst_46 {dimension_numbers = #tpu.dot_dimension_numbers<[1], [1], [0], [0], [0, 0, 1, 0], [], []>} : vector<64x16xbf16>, vector<64x16xbf16>, vector<64x64xf32> -> vector<64x64xf32>
    %87 = arith.addf %86, %66 : vector<64x64xf32>
    %cst_47 = arith.constant dense<0xFF800000> : vector<64xf32>
    %88 = vector.multi_reduction <maximumf>, %87, %cst_47 [1] : vector<64x64xf32> to vector<64xf32>
    %89 = vector.shape_cast %88 : vector<64xf32> to vector<64x1xf32>
    %90 = vector.broadcast %89 : vector<64x1xf32> to vector<64x64xf32>
    %91 = arith.subf %87, %90 : vector<64x64xf32>
    %92 = math.exp %91 : vector<64x64xf32>
    %cst_48 = arith.constant dense<0.000000e+00> : vector<64xf32>
    %93 = vector.multi_reduction <add>, %92, %cst_48 [1] : vector<64x64xf32> to vector<64xf32>
    %94 = vector.shape_cast %93 : vector<64xf32> to vector<64x1xf32>
    %95 = tpu.reciprocal %94 {approx = true} : vector<64x1xf32> -> vector<64x1xf32>
    %96 = vector.broadcast %95 : vector<64x1xf32> to vector<64x64xf32>
    %97 = arith.mulf %92, %96 : vector<64x64xf32>
    %98 = arith.truncf %97 : vector<64x64xf32> to vector<64x64xbf16>
    %99 = vector.extract_strided_slice %63 {offsets = [64, 0], sizes = [64, 32], strides = [1, 1]} : vector<128x32xbf16> to vector<64x32xbf16>
    %cst_49 = arith.constant dense<0.000000e+00> : vector<64x32xf32>
    %100 = tpu.matmul %98, %99, %cst_49 {dimension_numbers = #tpu.dot_dimension_numbers<[1], [0], [0], [1], [0, 0, 1, 1], [], []>} : vector<64x64xbf16>, vector<64x32xbf16>, vector<64x32xf32> -> vector<64x32xf32>
    %101 = tpu.concatenate %83, %100 in 0 : vector<64x32xf32>, vector<64x32xf32> -> vector<128x32xf32>
    %cst_50 = arith.constant 3.000000e+00 : f32
    %102 = vector.broadcast %cst_50 : f32 to vector<128x32xf32>
    %103 = arith.addf %101, %102 : vector<128x32xf32>
    %cst_51 = arith.constant 0.000000e+00 : f32
    %cst_52 = arith.constant 6.000000e+00 : f32
    %104 = vector.broadcast %cst_51 : f32 to vector<128x32xf32>
    %105 = arith.maximumf %104, %103 : vector<128x32xf32>
    %106 = vector.broadcast %cst_52 : f32 to vector<128x32xf32>
    %107 = arith.minimumf %106, %105 : vector<128x32xf32>
    %108 = arith.mulf %101, %107 : vector<128x32xf32>
    %cst_53 = arith.constant 0.166666672 : f32
    %109 = vector.broadcast %cst_53 : f32 to vector<128x32xf32>
    %110 = arith.mulf %108, %109 : vector<128x32xf32>
    %111 = arith.truncf %110 : vector<128x32xf32> to vector<128x32xbf16>
    %c0_54 = arith.constant 0 : index
    %c0_55 = arith.constant 0 : index
    %c0_56 = arith.constant 0 : index
    %112 = vector.load %arg9[%c0_54, %c0_55, %c0_56] : memref<2x32x32xbf16, #tpu.memory_space<vmem>>, vector<1x32x32xbf16>
    %113 = vector.shape_cast %112 : vector<1x32x32xbf16> to vector<32x32xbf16>
    %cst_57 = arith.constant dense<0.000000e+00> : vector<128x32xf32>
    %114 = tpu.matmul %111, %113, %cst_57 {dimension_numbers = #tpu.dot_dimension_numbers<[1], [0], [0], [1], [0, 0, 1, 1], [], []>} : vector<128x32xbf16>, vector<32x32xbf16>, vector<128x32xf32> -> vector<128x32xf32>
    %115 = arith.addf %10, %114 : vector<128x32xf32>
    %c1_58 = arith.constant 1 : index
    %c0_59 = arith.constant 0 : index
    %c0_60 = arith.constant 0 : index
    %116 = vector.load %arg2[%c1_58, %c0_59, %c0_60] : memref<2x32x16xbf16, #tpu.memory_space<vmem>>, vector<1x32x16xbf16>
    %117 = vector.shape_cast %116 : vector<1x32x16xbf16> to vector<32x16xbf16>
    %cst_61 = arith.constant dense<0.000000e+00> : vector<128x16xf32>
    %118 = tpu.matmul %7, %117, %cst_61 {dimension_numbers = #tpu.dot_dimension_numbers<[1], [0], [0], [1], [0, 0, 1, 1], [], []>} : vector<128x32xbf16>, vector<32x16xbf16>, vector<128x16xf32> -> vector<128x16xf32>
    %c1_62 = arith.constant 1 : index
    %c0_63 = arith.constant 0 : index
    %c0_64 = arith.constant 0 : index
    %119 = vector.load %arg5[%c1_62, %c0_63, %c0_64] : memref<2x1x16xf32, #tpu.memory_space<vmem>>, vector<1x1x16xf32>
    %120 = vector.shape_cast %119 : vector<1x1x16xf32> to vector<1x16xf32>
    %121 = vector.broadcast %120 : vector<1x16xf32> to vector<128x16xf32>
    %122 = arith.addf %118, %121 : vector<128x16xf32>
    %cst_65 = arith.constant 3.000000e+00 : f32
    %123 = vector.broadcast %cst_65 : f32 to vector<128x16xf32>
    %124 = arith.addf %122, %123 : vector<128x16xf32>
    %cst_66 = arith.constant 0.000000e+00 : f32
    %cst_67 = arith.constant 6.000000e+00 : f32
    %125 = vector.broadcast %cst_66 : f32 to vector<128x16xf32>
    %126 = arith.maximumf %125, %124 : vector<128x16xf32>
    %127 = vector.broadcast %cst_67 : f32 to vector<128x16xf32>
    %128 = arith.minimumf %127, %126 : vector<128x16xf32>
    %129 = arith.mulf %122, %128 : vector<128x16xf32>
    %cst_68 = arith.constant 0.166666672 : f32
    %130 = vector.broadcast %cst_68 : f32 to vector<128x16xf32>
    %131 = arith.mulf %129, %130 : vector<128x16xf32>
    %c1_69 = arith.constant 1 : index
    %c0_70 = arith.constant 0 : index
    %c0_71 = arith.constant 0 : index
    %132 = vector.load %arg3[%c1_69, %c0_70, %c0_71] : memref<2x32x16xbf16, #tpu.memory_space<vmem>>, vector<1x32x16xbf16>
    %133 = vector.shape_cast %132 : vector<1x32x16xbf16> to vector<32x16xbf16>
    %cst_72 = arith.constant dense<0.000000e+00> : vector<128x16xf32>
    %134 = tpu.matmul %7, %133, %cst_72 {dimension_numbers = #tpu.dot_dimension_numbers<[1], [0], [0], [1], [0, 0, 1, 1], [], []>} : vector<128x32xbf16>, vector<32x16xbf16>, vector<128x16xf32> -> vector<128x16xf32>
    %c1_73 = arith.constant 1 : index
    %c0_74 = arith.constant 0 : index
    %c0_75 = arith.constant 0 : index
    %135 = vector.load %arg6[%c1_73, %c0_74, %c0_75] : memref<2x1x16xf32, #tpu.memory_space<vmem>>, vector<1x1x16xf32>
    %136 = vector.shape_cast %135 : vector<1x1x16xf32> to vector<1x16xf32>
    %137 = vector.broadcast %136 : vector<1x16xf32> to vector<128x16xf32>
    %138 = arith.addf %134, %137 : vector<128x16xf32>
    %cst_76 = arith.constant 3.000000e+00 : f32
    %139 = vector.broadcast %cst_76 : f32 to vector<128x16xf32>
    %140 = arith.addf %138, %139 : vector<128x16xf32>
    %cst_77 = arith.constant 0.000000e+00 : f32
    %cst_78 = arith.constant 6.000000e+00 : f32
    %141 = vector.broadcast %cst_77 : f32 to vector<128x16xf32>
    %142 = arith.maximumf %141, %140 : vector<128x16xf32>
    %143 = vector.broadcast %cst_78 : f32 to vector<128x16xf32>
    %144 = arith.minimumf %143, %142 : vector<128x16xf32>
    %145 = arith.mulf %138, %144 : vector<128x16xf32>
    %cst_79 = arith.constant 0.166666672 : f32
    %146 = vector.broadcast %cst_79 : f32 to vector<128x16xf32>
    %147 = arith.mulf %145, %146 : vector<128x16xf32>
    %c1_80 = arith.constant 1 : index
    %c0_81 = arith.constant 0 : index
    %c0_82 = arith.constant 0 : index
    %148 = vector.load %arg4[%c1_80, %c0_81, %c0_82] : memref<2x32x32xbf16, #tpu.memory_space<vmem>>, vector<1x32x32xbf16>
    %149 = vector.shape_cast %148 : vector<1x32x32xbf16> to vector<32x32xbf16>
    %cst_83 = arith.constant dense<0.000000e+00> : vector<128x32xf32>
    %150 = tpu.matmul %7, %149, %cst_83 {dimension_numbers = #tpu.dot_dimension_numbers<[1], [0], [0], [1], [0, 0, 1, 1], [], []>} : vector<128x32xbf16>, vector<32x32xbf16>, vector<128x32xf32> -> vector<128x32xf32>
    %c1_84 = arith.constant 1 : index
    %c0_85 = arith.constant 0 : index
    %c0_86 = arith.constant 0 : index
    %151 = vector.load %arg7[%c1_84, %c0_85, %c0_86] : memref<2x1x32xf32, #tpu.memory_space<vmem>>, vector<1x1x32xf32>
    %152 = vector.shape_cast %151 : vector<1x1x32xf32> to vector<1x32xf32>
    %153 = vector.broadcast %152 : vector<1x32xf32> to vector<128x32xf32>
    %154 = arith.addf %150, %153 : vector<128x32xf32>
    %cst_87 = arith.constant 3.000000e+00 : f32
    %155 = vector.broadcast %cst_87 : f32 to vector<128x32xf32>
    %156 = arith.addf %154, %155 : vector<128x32xf32>
    %cst_88 = arith.constant 0.000000e+00 : f32
    %cst_89 = arith.constant 6.000000e+00 : f32
    %157 = vector.broadcast %cst_88 : f32 to vector<128x32xf32>
    %158 = arith.maximumf %157, %156 : vector<128x32xf32>
    %159 = vector.broadcast %cst_89 : f32 to vector<128x32xf32>
    %160 = arith.minimumf %159, %158 : vector<128x32xf32>
    %161 = arith.mulf %154, %160 : vector<128x32xf32>
    %cst_90 = arith.constant 0.166666672 : f32
    %162 = vector.broadcast %cst_90 : f32 to vector<128x32xf32>
    %163 = arith.mulf %161, %162 : vector<128x32xf32>
    %cst_91 = arith.constant 2.500000e-01 : f32
    %164 = vector.broadcast %cst_91 : f32 to vector<128x16xf32>
    %165 = arith.mulf %131, %164 : vector<128x16xf32>
    %166 = arith.truncf %165 : vector<128x16xf32> to vector<128x16xbf16>
    %167 = arith.truncf %147 : vector<128x16xf32> to vector<128x16xbf16>
    %168 = arith.truncf %163 : vector<128x32xf32> to vector<128x32xbf16>
    %c1_92 = arith.constant 1 : index
    %c0_93 = arith.constant 0 : index
    %c0_94 = arith.constant 0 : index
    %169 = vector.load %arg8[%c1_92, %c0_93, %c0_94] : memref<2x64x64xbf16, #tpu.memory_space<vmem>>, vector<1x64x64xbf16>
    %170 = vector.shape_cast %169 : vector<1x64x64xbf16> to vector<64x64xbf16>
    %171 = arith.extf %170 : vector<64x64xbf16> to vector<64x64xf32>
    %172 = vector.extract_strided_slice %166 {offsets = [0, 0], sizes = [64, 16], strides = [1, 1]} : vector<128x16xbf16> to vector<64x16xbf16>
    %173 = vector.extract_strided_slice %167 {offsets = [0, 0], sizes = [64, 16], strides = [1, 1]} : vector<128x16xbf16> to vector<64x16xbf16>
    %cst_95 = arith.constant dense<0.000000e+00> : vector<64x64xf32>
    %174 = tpu.matmul %172, %173, %cst_95 {dimension_numbers = #tpu.dot_dimension_numbers<[1], [1], [0], [0], [0, 0, 1, 0], [], []>} : vector<64x16xbf16>, vector<64x16xbf16>, vector<64x64xf32> -> vector<64x64xf32>
    %175 = arith.addf %174, %171 : vector<64x64xf32>
    %cst_96 = arith.constant dense<0xFF800000> : vector<64xf32>
    %176 = vector.multi_reduction <maximumf>, %175, %cst_96 [1] : vector<64x64xf32> to vector<64xf32>
    %177 = vector.shape_cast %176 : vector<64xf32> to vector<64x1xf32>
    %178 = vector.broadcast %177 : vector<64x1xf32> to vector<64x64xf32>
    %179 = arith.subf %175, %178 : vector<64x64xf32>
    %180 = math.exp %179 : vector<64x64xf32>
    %cst_97 = arith.constant dense<0.000000e+00> : vector<64xf32>
    %181 = vector.multi_reduction <add>, %180, %cst_97 [1] : vector<64x64xf32> to vector<64xf32>
    %182 = vector.shape_cast %181 : vector<64xf32> to vector<64x1xf32>
    %183 = tpu.reciprocal %182 {approx = true} : vector<64x1xf32> -> vector<64x1xf32>
    %184 = vector.broadcast %183 : vector<64x1xf32> to vector<64x64xf32>
    %185 = arith.mulf %180, %184 : vector<64x64xf32>
    %186 = arith.truncf %185 : vector<64x64xf32> to vector<64x64xbf16>
    %187 = vector.extract_strided_slice %168 {offsets = [0, 0], sizes = [64, 32], strides = [1, 1]} : vector<128x32xbf16> to vector<64x32xbf16>
    %cst_98 = arith.constant dense<0.000000e+00> : vector<64x32xf32>
    %188 = tpu.matmul %186, %187, %cst_98 {dimension_numbers = #tpu.dot_dimension_numbers<[1], [0], [0], [1], [0, 0, 1, 1], [], []>} : vector<64x64xbf16>, vector<64x32xbf16>, vector<64x32xf32> -> vector<64x32xf32>
    %189 = vector.extract_strided_slice %166 {offsets = [64, 0], sizes = [64, 16], strides = [1, 1]} : vector<128x16xbf16> to vector<64x16xbf16>
    %190 = vector.extract_strided_slice %167 {offsets = [64, 0], sizes = [64, 16], strides = [1, 1]} : vector<128x16xbf16> to vector<64x16xbf16>
    %cst_99 = arith.constant dense<0.000000e+00> : vector<64x64xf32>
    %191 = tpu.matmul %189, %190, %cst_99 {dimension_numbers = #tpu.dot_dimension_numbers<[1], [1], [0], [0], [0, 0, 1, 0], [], []>} : vector<64x16xbf16>, vector<64x16xbf16>, vector<64x64xf32> -> vector<64x64xf32>
    %192 = arith.addf %191, %171 : vector<64x64xf32>
    %cst_100 = arith.constant dense<0xFF800000> : vector<64xf32>
    %193 = vector.multi_reduction <maximumf>, %192, %cst_100 [1] : vector<64x64xf32> to vector<64xf32>
    %194 = vector.shape_cast %193 : vector<64xf32> to vector<64x1xf32>
    %195 = vector.broadcast %194 : vector<64x1xf32> to vector<64x64xf32>
    %196 = arith.subf %192, %195 : vector<64x64xf32>
    %197 = math.exp %196 : vector<64x64xf32>
    %cst_101 = arith.constant dense<0.000000e+00> : vector<64xf32>
    %198 = vector.multi_reduction <add>, %197, %cst_101 [1] : vector<64x64xf32> to vector<64xf32>
    %199 = vector.shape_cast %198 : vector<64xf32> to vector<64x1xf32>
    %200 = tpu.reciprocal %199 {approx = true} : vector<64x1xf32> -> vector<64x1xf32>
    %201 = vector.broadcast %200 : vector<64x1xf32> to vector<64x64xf32>
    %202 = arith.mulf %197, %201 : vector<64x64xf32>
    %203 = arith.truncf %202 : vector<64x64xf32> to vector<64x64xbf16>
    %204 = vector.extract_strided_slice %168 {offsets = [64, 0], sizes = [64, 32], strides = [1, 1]} : vector<128x32xbf16> to vector<64x32xbf16>
    %cst_102 = arith.constant dense<0.000000e+00> : vector<64x32xf32>
    %205 = tpu.matmul %203, %204, %cst_102 {dimension_numbers = #tpu.dot_dimension_numbers<[1], [0], [0], [1], [0, 0, 1, 1], [], []>} : vector<64x64xbf16>, vector<64x32xbf16>, vector<64x32xf32> -> vector<64x32xf32>
    %206 = tpu.concatenate %188, %205 in 0 : vector<64x32xf32>, vector<64x32xf32> -> vector<128x32xf32>
    %cst_103 = arith.constant 3.000000e+00 : f32
    %207 = vector.broadcast %cst_103 : f32 to vector<128x32xf32>
    %208 = arith.addf %206, %207 : vector<128x32xf32>
    %cst_104 = arith.constant 0.000000e+00 : f32
    %cst_105 = arith.constant 6.000000e+00 : f32
    %209 = vector.broadcast %cst_104 : f32 to vector<128x32xf32>
    %210 = arith.maximumf %209, %208 : vector<128x32xf32>
    %211 = vector.broadcast %cst_105 : f32 to vector<128x32xf32>
    %212 = arith.minimumf %211, %210 : vector<128x32xf32>
    %213 = arith.mulf %206, %212 : vector<128x32xf32>
    %cst_106 = arith.constant 0.166666672 : f32
    %214 = vector.broadcast %cst_106 : f32 to vector<128x32xf32>
    %215 = arith.mulf %213, %214 : vector<128x32xf32>
    %216 = arith.truncf %215 : vector<128x32xf32> to vector<128x32xbf16>
    %c1_107 = arith.constant 1 : index
    %c0_108 = arith.constant 0 : index
    %c0_109 = arith.constant 0 : index
    %217 = vector.load %arg9[%c1_107, %c0_108, %c0_109] : memref<2x32x32xbf16, #tpu.memory_space<vmem>>, vector<1x32x32xbf16>
    %218 = vector.shape_cast %217 : vector<1x32x32xbf16> to vector<32x32xbf16>
    %cst_110 = arith.constant dense<0.000000e+00> : vector<128x32xf32>
    %219 = tpu.matmul %216, %218, %cst_110 {dimension_numbers = #tpu.dot_dimension_numbers<[1], [0], [0], [1], [0, 0, 1, 1], [], []>} : vector<128x32xbf16>, vector<32x32xbf16>, vector<128x32xf32> -> vector<128x32xf32>
    %220 = arith.addf %115, %219 : vector<128x32xf32>
    %cst_111 = arith.constant 3.000000e+00 : f32
    %221 = vector.broadcast %cst_111 : f32 to vector<128x32xf32>
    %222 = arith.addf %220, %221 : vector<128x32xf32>
    %cst_112 = arith.constant 0.000000e+00 : f32
    %cst_113 = arith.constant 6.000000e+00 : f32
    %223 = vector.broadcast %cst_112 : f32 to vector<128x32xf32>
    %224 = arith.maximumf %223, %222 : vector<128x32xf32>
    %225 = vector.broadcast %cst_113 : f32 to vector<128x32xf32>
    %226 = arith.minimumf %225, %224 : vector<128x32xf32>
    %227 = arith.mulf %220, %226 : vector<128x32xf32>
    %cst_114 = arith.constant 0.166666672 : f32
    %228 = vector.broadcast %cst_114 : f32 to vector<128x32xf32>
    %229 = arith.mulf %227, %228 : vector<128x32xf32>
    %230 = vector.extract_strided_slice %229 {offsets = [0, 0], sizes = [64, 32], strides = [1, 1]} : vector<128x32xf32> to vector<64x32xf32>
    %231 = tpu.transpose %230, [1, 0] : vector<64x32xf32> -> vector<32x64xf32>
    %c0_115 = arith.constant 0 : index
    %c0_116 = arith.constant 0 : index
    %c0_117 = arith.constant 0 : index
    %232 = vector.load %arg11[%c0_115, %c0_116, %c0_117] : memref<2x32x64xf32, #tpu.memory_space<vmem>>, vector<1x32x64xf32>
    %233 = vector.shape_cast %232 : vector<1x32x64xf32> to vector<32x64xf32>
    %234 = vector.shape_cast %231 : vector<32x64xf32> to vector<1x32x64xf32>
    tpu.vector_store %arg11[%c0_115, %c0_116, %c0_117], %234 {strides = array<i32>} : memref<2x32x64xf32, #tpu.memory_space<vmem>>, vector<1x32x64xf32>,
    %235 = vector.extract_strided_slice %229 {offsets = [64, 0], sizes = [64, 32], strides = [1, 1]} : vector<128x32xf32> to vector<64x32xf32>
    %236 = tpu.transpose %235, [1, 0] : vector<64x32xf32> -> vector<32x64xf32>
    %c1_118 = arith.constant 1 : index
    %c0_119 = arith.constant 0 : index
    %c0_120 = arith.constant 0 : index
    %237 = vector.load %arg11[%c1_118, %c0_119, %c0_120] : memref<2x32x64xf32, #tpu.memory_space<vmem>>, vector<1x32x64xf32>
    %238 = vector.shape_cast %237 : vector<1x32x64xf32> to vector<32x64xf32>
    %239 = vector.shape_cast %236 : vector<32x64xf32> to vector<1x32x64xf32>
    tpu.vector_store %arg11[%c1_118, %c0_119, %c0_120], %239 {strides = array<i32>} : memref<2x32x64xf32, #tpu.memory_space<vmem>>, vector<1x32x64xf32>,
    return
  }
  func.func @transform_0(%arg0: i32) -> (i32, i32, i32) {
    %c0_i32 = arith.constant 0 : i32
    %c0_i32_0 = arith.constant 0 : i32
    %c0_i32_1 = arith.constant 0 : i32
    %c0_i32_2 = arith.constant 0 : i32
    return %c0_i32, %c0_i32_0, %c0_i32_1 : i32, i32, i32
  }
  func.func @transform_1(%arg0: i32) -> (i32, i32, i32) {
    %c0_i32 = arith.constant 0 : i32
    %c0_i32_0 = arith.constant 0 : i32
    %c0_i32_1 = arith.constant 0 : i32
    %c0_i32_2 = arith.constant 0 : i32
    return %c0_i32, %c0_i32_0, %c0_i32_1 : i32, i32, i32
  }
  func.func @transform_2(%arg0: i32) -> (i32, i32, i32) {
    %c0_i32 = arith.constant 0 : i32
    %c0_i32_0 = arith.constant 0 : i32
    %c0_i32_1 = arith.constant 0 : i32
    %c0_i32_2 = arith.constant 0 : i32
    return %c0_i32, %c0_i32_0, %c0_i32_1 : i32, i32, i32
  }
  func.func @transform_3(%arg0: i32) -> (i32, i32, i32) {
    %c0_i32 = arith.constant 0 : i32
    %c0_i32_0 = arith.constant 0 : i32
    %c0_i32_1 = arith.constant 0 : i32
    %c0_i32_2 = arith.constant 0 : i32
    return %c0_i32, %c0_i32_0, %c0_i32_1 : i32, i32, i32
  }
  func.func @transform_4(%arg0: i32) -> (i32, i32, i32) {
    %c0_i32 = arith.constant 0 : i32
    %c0_i32_0 = arith.constant 0 : i32
    %c0_i32_1 = arith.constant 0 : i32
    %c0_i32_2 = arith.constant 0 : i32
    return %c0_i32, %c0_i32_0, %c0_i32_1 : i32, i32, i32
  }
  func.func @transform_5(%arg0: i32) -> (i32, i32, i32) {
    %c0_i32 = arith.constant 0 : i32
    %c0_i32_0 = arith.constant 0 : i32
    %c0_i32_1 = arith.constant 0 : i32
    %c0_i32_2 = arith.constant 0 : i32
    return %c0_i32, %c0_i32_0, %c0_i32_1 : i32, i32, i32
  }
  func.func @transform_6(%arg0: i32) -> (i32, i32, i32) {
    %c0_i32 = arith.constant 0 : i32
    %c0_i32_0 = arith.constant 0 : i32
    %c0_i32_1 = arith.constant 0 : i32
    %c0_i32_2 = arith.constant 0 : i32
    return %c0_i32, %c0_i32_0, %c0_i32_1 : i32, i32, i32
  }
  func.func @transform_7(%arg0: i32) -> (i32, i32, i32) {
    %c0_i32 = arith.constant 0 : i32
    %c0_i32_0 = arith.constant 0 : i32
    %c0_i32_1 = arith.constant 0 : i32
    %c0_i32_2 = arith.constant 0 : i32
    return %c0_i32, %c0_i32_0, %c0_i32_1 : i32, i32, i32
  }
  func.func @transform_8(%arg0: i32) -> (i32, i32, i32) {
    %c0_i32 = arith.constant 0 : i32
    %c0_i32_0 = arith.constant 0 : i32
    %c0_i32_1 = arith.constant 0 : i32
    %c0_i32_2 = arith.constant 0 : i32
    return %c0_i32, %c0_i32_0, %c0_i32_1 : i32, i32, i32
  }
  func.func @transform_9(%arg0: i32) -> (i32, i32) {
    %c0_i32 = arith.constant 0 : i32
    %c0_i32_0 = arith.constant 0 : i32
    %c0_i32_1 = arith.constant 0 : i32
    return %c0_i32, %c0_i32_0 : i32, i32
  }
  func.func @transform_10(%arg0: i32) -> (i32, i32, i32) {
    %c0_i32 = arith.constant 0 : i32
    %c0_i32_0 = arith.constant 0 : i32
    %c0_i32_1 = arith.constant 0 : i32
    %c0_i32_2 = arith.constant 0 : i32
    return %c0_i32, %c0_i32_0, %c0_i32_1 : i32, i32, i32
  }
}

</mosaic_0001>

<bundles_post_ra>
// kernel: tpu_custom_call.1
= control target key start
LH: loop header
LB: loop body
LE: loop exit
PB: predicated region body
PF: predicated region fallthrough
CT: control target
= control target key end

     0   :  { %15 = vsyncpa [#allocation3], 0  ;;  %s5245_s0 = inlined_call_operand.vmem [shape: f32[2,32,64], index: 0, kind: input, shape index: {}]   ;;  %s5246_s1 = inlined_call_operand.vmem [shape: bf16[2,32,16], index: 1, kind: input, shape index: {}]   ;;  %s5247_s2 = inlined_call_operand.vmem [shape: bf16[2,32,16], index: 2, kind: input, shape index: {}]   ;;  %s5248_s3 = inlined_call_operand.vmem [shape: bf16[2,32,32], index: 3, kind: input, shape index: {}]   ;;  %s5249_s4 = inlined_call_operand.vmem [shape: f32[2,1,16], index: 4, kind: input, shape index: {}]   ;;  %s5250_s5 = inlined_call_operand.vmem [shape: f32[2,1,16], index: 5, kind: input, shape index: {}]   ;;  %s5251_s6 = inlined_call_operand.vmem [shape: f32[2,1,32], index: 6, kind: input, shape index: {}]   ;;  %s5252_s7 = inlined_call_operand.hbm [shape: bf16[2,64,64], index: 7, kind: input, shape index: {}]   ;;  %s5253_s8 = inlined_call_operand.hbm [shape: bf16[2,32,32], index: 8, kind: input, shape index: {}]   ;;  %s5254_s9 = inlined_call_operand.vmem [shape: f32[1,32], index: 9, kind: input, shape index: {}]   ;;  %s5255_s10 = inlined_call_operand.hbm [shape: f32[2,32,64], index: 10, kind: output, shape index: {}]  }
   0x1   :  { %16 = vsyncpa [#allocation6], 0 }
   0x2   :  { %17 = vsyncpa [#allocation4], 0  ;;  %s4035_s13 = smov [#allocation2]  }
   0x3   :  { %s37_s14 = sshll.u32 %s4035_s13, 4  ;;  %s38_s14 = int_to_ptr.vmem [resolvable:$true] %s37_s14 }
   0x4   :  { %s3977_s15 = scalar_lea.vmem %s38_s14, 1024  ;;  %p3982_p1 = scmp.lt.s32.totalorder %s38_s14, %s38_s14 }
   0x5   :  { %p3978_p0 = scmp.ne.s32.totalorder %s38_s14, %s3977_s15  ;;  %p3983_p2 = scmp.lt.s32.totalorder %s3977_s15, %s3977_s15 }
   0x7   :  { %p3984_p3 = por %p3983_p2, %p3982_p1 }
   0x9   :  { %p3985_p4 = pnand %p3984_p3, %p3978_p0 }
   0xb   :  { %3988 = shalt.err (!%p3985_p4)
}
   0xc   :  { %s4036_s16 = smov 64   ;;  %s4037_s17 = smov 4  }
   0xd   :  { %43 = dma.hbm_to_vmem [thread:$0]  %s5252_s7, 1024, %s38_s14, [#allocation3], %s4036_s16, %s4036_s16, %s4037_s17  }
   0xe   :  { %s4038_s20 = smov [#allocation5]  }
   0xf   :  { %s49_s21 = sshll.u32 %s4038_s20, 4  ;;  %s50_s21 = int_to_ptr.vmem [resolvable:$true] %s49_s21 }
  0x10   :  { %s3997_s22 = scalar_lea.vmem %s50_s21, 512  ;;  %p4002_p6 = scmp.lt.s32.totalorder %s50_s21, %s50_s21 }
  0x11   :  { %p3998_p5 = scmp.ne.s32.totalorder %s50_s21, %s3997_s22  ;;  %p4003_p7 = scmp.lt.s32.totalorder %s3997_s22, %s3997_s22 }
  0x13   :  { %p4004_p8 = por %p4003_p7, %p4002_p6 }
  0x15   :  { %p4005_p9 = pnand %p4004_p8, %p3998_p5 }
  0x17   :  { %4008 = shalt.err (!%p4005_p9)
}
  0x18   :  { %55 = dma.hbm_to_vmem [thread:$0]  %s5253_s8, 512, %s50_s21, [#allocation6], %s4036_s16, %s4036_s16, %s4037_s17  }
  0x19   :  { %4029 = dma.done.wait [#allocation3], 1024  }
  0x1a   :  { %4030 = vsyncadd [#allocation3], 4294966272 }
  0x1b   :  { %4031 = dma.done.wait [#allocation6], 512  }
  0x1c   :  { %4032 = vsyncadd [#allocation6], 4294966784  ;;  %v65_v0 = vld [vmem:[%s5245_s0] sm:$0xff]  ;;  %v66_v2 = vld [vmem:[%s5245_s0 + $0x8] sm:$0xff]  ;;  %vm176_vm0 = vcmask 261120   ;;  %vm834_vm1 = vcmask 130048  }
  0x1d   :  { %69 = vxpose.xlu0.b32.start [1/4] (short) (narrow) %v65_v0, 64  ;;  %v3185_v1 = vld [vmem:[%s5245_s0 + $0x20] sm:$0xff]  ;;  %v3186_v3 = vld [vmem:[%s5245_s0 + $0x28] sm:$0xff]  ;;  %v67_v5 = vld [vmem:[%s5245_s0 + $0x10] sm:$0xff]  ;;  %vm924_vm2 = vcmask 523264  }
  0x1e   :  { %106 = vxpose.xlu1.b32.start [1/4] (short) (narrow) %v3185_v1, 64  ;;  %v3825_v4 = vld [vmem:[%s5246_s1 + $0x8] sm:$0xff]   ;;  %v3187_v7 = vld [vmem:[%s5245_s0 + $0x30] sm:$0xff]  ;;  %v3827_v8 = vld [vmem:[%s5246_s1] sm:$0xff]  }
  0x1f   :  { %v3826_v6 = vld [vmem:[%s5247_s2 + $0x8] sm:$0xff]   ;;  %3505 = vmatprep.subr.bf16.mxu0 %v3825_v4  ;;  %v3828_v9 = vld [vmem:[%s5247_s2] sm:$0xff]   ;;  %v68_v10 = vld [vmem:[%s5245_s0 + $0x18] sm:$0xff] }
  0x20   :  { %3525 = vmatprep.subr.bf16.mxu1 %v3826_v6  ;;  %3506 = vmatpush3.bf16.msra.mxu0 %v3825_v4  ;;  %v3188_v11 = vld [vmem:[%s5245_s0 + $0x38] sm:$0xff]  ;;  %v3829_v12 = vld [vmem:[%s5248_s3 + $0x8] sm:$0xff]   ;;  %v3830_v22 = vld [vmem:[%s5248_s3] sm:$0xff]  }
  0x21   :  { %70 = vxpose.xlu0.b32.cont [2/4] (short) (narrow) %v66_v2, 64  ;;  %3526 = vmatpush3.bf16.msra.mxu1 %v3826_v6  ;;  %v4212_v38 = vld [vmem:[%s5249_s4] ss:$0 sm:$0xff] }
  0x22   :  { %107 = vxpose.xlu1.b32.cont [2/4] (short) (narrow) %v3186_v3, 64  ;;  %3507 = vmatprep.subr.bf16.mxu0 %v3827_v8  ;;  %v4221_v61 = vld [vmem:[%s5250_s5] ss:$0 sm:$0xff] }
  0x23   :  { %3527 = vmatprep.subr.bf16.mxu1 %v3828_v9 }
  0x24   :  { %3508 = vmatpush3.bf16.msra.mxu0 %v3827_v8 }
  0x25   :  { %71 = vxpose.xlu0.b32.cont [3/4] (short) (narrow) %v67_v5, 64  ;;  %3528 = vmatpush3.bf16.msra.mxu1 %v3828_v9 }
  0x26   :  { %108 = vxpose.xlu1.b32.cont [3/4] (short) (narrow) %v3187_v7, 64  ;;  %3545 = vmatprep.subr.bf16.mxu0 %v3829_v12 }
  0x29   :  { %72 = vxpose.xlu0.b32.end [4/4] (short) (narrow) %v68_v10, 64 }
  0x2a   :  { %109 = vxpose.xlu1.b32.end [4/4] (short) (narrow) %v3188_v11, 64 }
  0x99   :  { %v85_v13 = vpop.trf.xlu0 }
  0x9a   :  { %v122_v14 = vpop.trf.xlu1 }
  0x9d   :  { %v86_v15 = vpop.trf.xlu0 }
  0x9e   :  { %v4142_v16 = vpack.c.bf16 %v86_v15, %v85_v13  ;;  %v123_v17 = vpop.trf.xlu1 }
  0x9f   :  { %v4165_v31 = vpack.c.bf16 %v123_v17, %v122_v14 }
  0xa0   :  { %3509 = vmatprep.mubr.msk.bf16.mxu0 %vm176_vm0, %v4142_v16  ;;  %3529 = vmatprep.mubr.msk.bf16.mxu1 %vm176_vm0, %v4142_v16 }
  0xa1   :  { %v87_v18 = vpop.trf.xlu0 }
  0xa2   :  { %v124_v20 = vpop.trf.xlu1 }
  0xa5   :  { %v88_v19 = vpop.trf.xlu0 }
  0xa6   :  { %v4148_v21 = vpack.c.bf16 %v88_v19, %v87_v18  ;;  %v125_v24 = vpop.trf.xlu1 }
  0xa7   :  { %v4175_v34 = vpack.c.bf16 %v125_v24, %v124_v20 }
  0xa8   :  { %3510 = vmatmul.mubr.msk.bf16.vlgmr.msra.gmra.mxu0 %vm176_vm0, %v4148_v21  ;;  %3530 = vmatmul.mubr.msk.bf16.vlgmr.msra.gmra.mxu1 %vm176_vm0, %v4148_v21 }
  0xa9   :  { %v89_v23 = vpop.trf.xlu0  ;;  %3546 = vmatpush3.bf16.msra.mxu0 %v3829_v12  ;;  %5262 = vst [vmem:[#allocation11_spill] sm:$0xff] %v4175_v34 }
  0xaa   :  { %3547 = vmatprep.subr.bf16.mxu0 %v3830_v22  ;;  %v126_v28 = vpop.trf.xlu1 }
  0xad   :  { %v90_v25 = vpop.trf.xlu0  ;;  %3548 = vmatpush3.bf16.msra.mxu0 %v3830_v22 }
  0xae   :  { %v4157_v26 = vpack.c.bf16 %v90_v25, %v89_v23  ;;  %v127_v32 = vpop.trf.xlu1 }
  0xaf   :  { %v4177_v35 = vpack.c.bf16 %v127_v32, %v126_v28 }
  0xb0   :  { %3513 = vmatprep.mubr.msk.bf16.mxu0 %vm176_vm0, %v4157_v26  ;;  %3533 = vmatprep.mubr.msk.bf16.mxu1 %vm176_vm0, %v4157_v26 }
  0xb1   :  { %v91_v27 = vpop.trf.xlu0  ;;  %5263 = vst [vmem:[#allocation12_spill] sm:$0xff] %v4177_v35 }
  0xb2   :  { %v128_v33 = vpop.trf.xlu1 }
  0xb5   :  { %v92_v29 = vpop.trf.xlu0 }
  0xb6   :  { %v4163_v30 = vpack.c.bf16 %v92_v29, %v91_v27  ;;  %v129_v36 = vpop.trf.xlu1 }
  0xb7   :  { %v4187_v37 = vpack.c.bf16 %v129_v36, %v128_v33 }
  0xb8   :  { %3514 = vmatmul.mubr.msk.bf16.gmra.mxu0 %vm176_vm0, %v4163_v30  ;;  %3534 = vmatmul.mubr.msk.bf16.gmra.mxu1 %vm176_vm0, %v4163_v30 }
  0xb9   :  { %3517 = vmatprep.mubr.msk.bf16.mxu0 %vm176_vm0, %v4165_v31  ;;  %3537 = vmatprep.mubr.msk.bf16.mxu1 %vm176_vm0, %v4165_v31  ;;  %5264 = vst [vmem:[#allocation13_spill] sm:$0xff] %v4187_v37 }
  0xc0   :  { %3518 = vmatmul.mubr.msk.bf16.gmra.mxu0 %vm176_vm0, %v4175_v34  ;;  %3538 = vmatmul.mubr.msk.bf16.gmra.mxu1 %vm176_vm0, %v4175_v34 }
  0xc1   :  { %3521 = vmatprep.mubr.msk.bf16.mxu0 %vm176_vm0, %v4177_v35  ;;  %3541 = vmatprep.mubr.msk.bf16.mxu1 %vm176_vm0, %v4177_v35 }
  0xc8   :  { %3522 = vmatmul.mubr.msk.bf16.gmra.mxu0 %vm176_vm0, %v4187_v37  ;;  %3542 = vmatmul.mubr.msk.bf16.gmra.mxu1 %vm176_vm0, %v4187_v37 }
  0xc9   :  { %3549 = vmatprep.mubr.msk.bf16.mxu0 %vm176_vm0, %v4142_v16 }
  0xd0   :  { %3550 = vmatmul.mubr.msk.bf16.vlgmr.msra.gmra.mxu0 %vm176_vm0, %v4148_v21 }
  0xd1   :  { %3553 = vmatprep.mubr.msk.bf16.mxu0 %vm176_vm0, %v4157_v26 }
  0xd8   :  { %3554 = vmatmul.mubr.msk.bf16.gmra.mxu0 %vm176_vm0, %v4163_v30 }
  0xd9   :  { %3557 = vmatprep.mubr.msk.bf16.mxu0 %vm176_vm0, %v4165_v31 }
  0xe0   :  { %3558 = vmatmul.mubr.msk.bf16.gmra.mxu0 %vm176_vm0, %v4175_v34 }
  0xe1   :  { %3561 = vmatprep.mubr.msk.bf16.mxu0 %vm176_vm0, %v4177_v35 }
  0xe8   :  { %3562 = vmatmul.mubr.msk.bf16.gmra.mxu0 %vm176_vm0, %v4187_v37 }
 0x168   :  { %v3511_v39 = vpop.f32.mrf.mxu0  ;;  %v3531_v40 = vpop.f32.mrf.mxu1 }
 0x169   :  { %v244_v41 = vadd.f32 %v3511_v39, %v4212_v38  ;;  %v444_v6 = vadd.f32 %v3531_v40, %v4221_v61 }
 0x16a   :  { %v235_v42 = vpop.f32.mrf.mxu0  ;;  %v435_v45 = vpop.f32.mrf.mxu1 }
 0x16b   :  { %v300_v43 = vadd.f32 3.0, %v244_v41  ;;  %v236_v44 = vadd.f32 %v4212_v38, %v235_v42  ;;  %v436_v7 = vadd.f32 %v4221_v61, %v435_v45  ;;  %v500_v23 = vadd.f32 3.0, %v444_v6 }
 0x16c   :  { %v3512_v46 = vpop.f32.mrf.mxu0  ;;  %v3532_v53 = vpop.f32.mrf.mxu1 }
 0x16d   :  { %v316_v47 = vmax.f32 %v300_v43, 0.0  ;;  %v298_v48 = vadd.f32 3.0, %v236_v44  ;;  %v247_v49 = vadd.f32 %v3512_v46, %v4212_v38  ;;  %v447_v1 = vadd.f32 %v3532_v53, %v4221_v61 }
 0x16e   :  { %v238_v50 = vpop.f32.mrf.mxu0  ;;  %v438_v60 = vpop.f32.mrf.mxu1  ;;  %v498_v24 = vadd.f32 3.0, %v436_v7  ;;  %v516_v45 = vmax.f32 %v500_v23, 0.0 }
 0x16f   :  { %v332_v51 = vmin.f32 %v316_v47, 6.0  ;;  %v314_v52 = vmax.f32 %v298_v48, 0.0  ;;  %v301_v54 = vadd.f32 3.0, %v247_v49  ;;  %v239_v55 = vadd.f32 %v4212_v38, %v238_v50 }
 0x170   :  { %v439_v5 = vadd.f32 %v4221_v61, %v438_v60  ;;  %v501_v13 = vadd.f32 3.0, %v447_v1  ;;  %v514_v46 = vmax.f32 %v498_v24, 0.0 }
 0x171   :  { %v330_v56 = vmin.f32 %v314_v52, 6.0  ;;  %v348_v57 = vmul.f32 %v332_v51, %v244_v41  ;;  %v317_v58 = vmax.f32 %v301_v54, 0.0  ;;  %v299_v59 = vadd.f32 3.0, %v239_v55 }
 0x172   :  { %v499_v19 = vadd.f32 3.0, %v439_v5  ;;  %v517_v36 = vmax.f32 %v501_v13, 0.0 }
 0x173   :  { %v346_v62 = vmul.f32 %v330_v56, %v236_v44  ;;  %v333_v63 = vmin.f32 %v317_v58, 6.0  ;;  %v315_v0 = vmax.f32 %v299_v59, 0.0  ;;  %v364_v2 = vmul.f32 0.16666667, %v348_v57 }
 0x174   :  { %v515_v41 = vmax.f32 %v499_v19, 0.0  ;;  %v533_v51 = vmin.f32 %v517_v36, 6.0  ;;  %v532_v57 = vmin.f32 %v516_v45, 6.0  ;;  %v530_v58 = vmin.f32 %v514_v46, 6.0 }
 0x175   :  { %v349_v3 = vmul.f32 %v333_v63, %v247_v49  ;;  %v331_v4 = vmin.f32 %v315_v0, 6.0  ;;  %v362_v8 = vmul.f32 0.16666667, %v346_v62  ;;  %v4228_v15 = vmul.f32 0.25, %v364_v2 }
 0x176   :  { %v531_v52 = vmin.f32 %v515_v41, 6.0  ;;  %v549_v0 = vmul.f32 %v533_v51, %v447_v1 }
 0x177   :  { %v365_v9 = vmul.f32 0.16666667, %v349_v3  ;;  %v347_v10 = vmul.f32 %v331_v4, %v239_v55  ;;  %v778_v27 = vmul.f32 0.25, %v362_v8 }
 0x178   :  { %v3515_v11 = vpop.f32.mrf.mxu0  ;;  %v3535_v12 = vpop.f32.mrf.mxu1  ;;  %v547_v3 = vmul.f32 %v531_v52, %v439_v5 }
 0x179   :  { %v460_v14 = vadd.f32 %v3535_v12, %v4221_v61  ;;  %v4230_v17 = vmul.f32 0.25, %v365_v9  ;;  %v363_v18 = vmul.f32 0.16666667, %v347_v10  ;;  %v260_v53 = vadd.f32 %v3515_v11, %v4212_v38 }
 0x17a   :  { %v251_v20 = vpop.f32.mrf.mxu0  ;;  %v451_v22 = vpop.f32.mrf.mxu1  ;;  %v548_v11 = vmul.f32 %v532_v57, %v444_v6  ;;  %v546_v12 = vmul.f32 %v530_v58, %v436_v7 }
 0x17b   :  { %v504_v25 = vadd.f32 3.0, %v460_v14  ;;  %v779_v29 = vmul.f32 0.25, %v363_v18  ;;  %v4247_v2 = vadd.f32 %v4221_v61, %v451_v22  ;;  %v304_v4 = vadd.f32 3.0, %v260_v53 }
 0x17c   :  { %v3516_v32 = vpop.f32.mrf.mxu0  ;;  %v3536_v33 = vpop.f32.mrf.mxu1  ;;  %v4253_v18 = vadd.f32 %v4212_v38, %v251_v20  ;;  %v565_v22 = vmul.f32 0.16666667, %v549_v0  ;;  %v564_v20 = vmul.f32 0.16666667, %v548_v11 }
 0x17d   :  { %v520_v39 = vmax.f32 %v504_v25, 0.0  ;;  %v794_v40 = vpack.c.bf16 %v779_v29, %v778_v27  ;;  %v463_v42 = vadd.f32 %v3536_v33, %v4221_v61  ;;  %v502_v5 = vadd.f32 3.0, %v4247_v2 }
 0x17e   :  { %v254_v43 = vpop.f32.mrf.mxu0  ;;  %v454_v44 = vpop.f32.mrf.mxu1  ;;  %v4259_v24 = vadd.f32 %v3516_v32, %v4212_v38  ;;  %v563_v27 = vmul.f32 0.16666667, %v547_v3  ;;  %v320_v6 = vmax.f32 %v304_v4, 0.0  ;;  %v302_v41 = vadd.f32 3.0, %v4253_v18 }
 0x17f   :  { %v536_v47 = vmin.f32 %v520_v39, 6.0  ;;  %v505_v48 = vadd.f32 3.0, %v463_v42  ;;  %3573 = vmatprep.mubr.msk.bf16.mxu1 %vm834_vm1, %v794_v40  ;;  %v455_v62 = vadd.f32 %v4221_v61, %v454_v44  ;;  %v4268_v36 = vadd.f32 %v4212_v38, %v254_v43 }
 0x180   :  { %v4236_v49 = vpop.f32.mrf.mxu0  ;;  %v4238_v50 = vpop.f32.mrf.mxu1  ;;  %v562_v40 = vmul.f32 0.16666667, %v546_v12  ;;  %v4275_v44 = vpack.c.bf16 %v565_v22, %v564_v20  ;;  %v518_v45 = vmax.f32 %v502_v5, 0.0  ;;  %v305_v46 = vadd.f32 3.0, %v4259_v24 }
 0x181   :  { %v521_v54 = vmax.f32 %v505_v48, 0.0  ;;  %v552_v59 = vmul.f32 %v536_v47, %v460_v14  ;;  %v503_v23 = vadd.f32 3.0, %v455_v62  ;;  %v336_v48 = vmin.f32 %v320_v6, 6.0 }
 0x182   :  { %v267_v55 = vpop.f32.mrf.mxu0  ;;  %v4241_v56 = vpop.f32.mrf.mxu1  ;;  %v4278_v47 = vpack.c.bf16 %v563_v27, %v562_v40  ;;  %v318_v57 = vmax.f32 %v302_v41, 0.0  ;;  %v534_v0 = vmin.f32 %v518_v45, 6.0  ;;  %v321_v3 = vmax.f32 %v305_v46, 0.0 }
 0x183   :  { %v537_v60 = vmin.f32 %v521_v54, 6.0  ;;  %v268_v13 = vadd.f32 %v4212_v38, %v267_v55  ;;  %v568_v14 = vmul.f32 0.16666667, %v552_v59  ;;  %v303_v55 = vadd.f32 3.0, %v4268_v36 }
 0x184   :  { %v4244_v63 = vpop.f32.mrf.mxu0  ;;  %v4249_v9 = vpop.f32.mrf.mxu1  ;;  %v4288_v4 = vsel %vm834_vm1, %v4275_v44, 0  ;;  %v4298_v22 = vadd.f32 %v4236_v49, %v4212_v38  ;;  %v4302_v5 = vadd.f32 %v4238_v50, %v4221_v61  ;;  %v4309_v27 = vadd.f32 %v4221_v61, %v4241_v56 }
 0x185   :  { %v553_v8 = vmul.f32 %v537_v60, %v463_v42  ;;  %v306_v25 = vadd.f32 3.0, %v268_v13  ;;  %v519_v42 = vmax.f32 %v503_v23, 0.0  ;;  %v319_v23 = vmax.f32 %v303_v55, 0.0 }
 0x186   :  { %v270_v10 = vpop.f32.mrf.mxu0  ;;  %v4263_v29 = vpop.f32.mrf.mxu1  ;;  %v337_v49 = vmin.f32 %v321_v3, 6.0  ;;  %v4316_v40 = vadd.f32 %v4244_v63, %v4212_v38  ;;  %v506_v55 = vadd.f32 3.0, %v4309_v27 }
 0x187   :  { %v569_v19 = vmul.f32 0.16666667, %v553_v8  ;;  %v322_v39 = vmax.f32 %v306_v25, 0.0  ;;  %v271_v51 = vadd.f32 %v4212_v38, %v270_v10  ;;  %v535_v58 = vmin.f32 %v519_v42, 6.0 }
 0x188   :  { %v4255_v1 = vpop.f32.mrf.mxu0  ;;  %v3543_v52 = vpop.f32.mrf.mxu1  ;;  %v352_v8 = vmul.f32 %v336_v48, %v260_v53  ;;  %v335_v46 = vmin.f32 %v319_v23, 6.0  ;;  %v308_v48 = vadd.f32 3.0, %v4298_v22  ;;  %v309_v3 = vadd.f32 3.0, %v4316_v40 }
 0x189   :  { %v4261_v7 = vpack.c.bf16 %v569_v19, %v568_v14  ;;  %v338_v43 = vmin.f32 %v322_v39, 6.0  ;;  %v307_v59 = vadd.f32 3.0, %v271_v51  ;;  %v4294_v19 = vsel %vm834_vm1, %v4278_v47, 0 }
 0x18a   :  { %v4265_v33 = vpop.f32.mrf.mxu0  ;;  %v483_v10 = vpop.f32.mrf.mxu1  ;;  %v4305_v53 = vadd.f32 %v3543_v52, %v4221_v61  ;;  %v551_v25 = vmul.f32 %v535_v58, %v455_v62  ;;  %v550_v39 = vmul.f32 %v534_v0, %v4247_v2  ;;  %v368_v41 = vmul.f32 0.16666667, %v352_v8 }
 0x18b   :  { %3801 = vmatprep.subr.msk.bf16.mxu1 %vm834_vm1, %v4261_v7  ;;  %v354_v11 = vmul.f32 %v338_v43, %v268_v13  ;;  %v323_v12 = vmax.f32 %v307_v59, 0.0  ;;  %v334_v13 = vmin.f32 %v318_v57, 6.0  ;;  %v4319_v50 = vadd.f32 %v4221_v61, %v483_v10 }
 0x18c   :  { %v4273_v32 = vpop.f32.mrf.mxu0  ;;  %v512_v45 = vadd.f32 3.0, %v4305_v53  ;;  %v508_v2 = vadd.f32 3.0, %v4302_v5  ;;  %v4328_v43 = vadd.f32 %v4249_v9, %v4221_v61  ;;  %v567_v52 = vmul.f32 0.16666667, %v551_v25 }
 0x18d   :  { %v339_v6 = vmin.f32 %v323_v12, 6.0  ;;  %v370_v42 = vmul.f32 0.16666667, %v354_v11  ;;  %v350_v63 = vmul.f32 %v334_v13, %v4253_v18  ;;  %v566_v59 = vmul.f32 0.16666667, %v550_v39 }
 0x18e   :  { %v4281_v54 = vpop.f32.mrf.mxu0  ;;  %v353_v0 = vmul.f32 %v337_v49, %v4259_v24  ;;  %v510_v8 = vadd.f32 3.0, %v4319_v50  ;;  %v4339_v9 = vadd.f32 %v4221_v61, %v4263_v29  ;;  %v528_v18 = vmax.f32 %v512_v45, 0.0 }
 0x18f   :  { %v355_v62 = vmul.f32 %v339_v6, %v271_v51  ;;  %v3544_v51 = vpop.f32.mrf.mxu1  ;;  %v786_v11 = vmul.f32 0.25, %v370_v42  ;;  %v351_v23 = vmul.f32 %v335_v46, %v4268_v36  ;;  %v324_v13 = vmax.f32 %v308_v48, 0.0 }
 0x190   :  { %v4284_v60 = vpop.f32.mrf.mxu0  ;;  %v524_v25 = vmax.f32 %v508_v2, 0.0  ;;  %v509_v6 = vadd.f32 3.0, %v4328_v43  ;;  %v804_v24 = vpack.c.bf16 %v567_v52, %v566_v59  ;;  %v522_v39 = vmax.f32 %v506_v55, 0.0 }
 0x191   :  { %v371_v57 = vmul.f32 0.16666667, %v355_v62  ;;  %v495_v62 = vadd.f32 %v3544_v51, %v4221_v61  ;;  %v486_v42 = vpop.f32.mrf.mxu1  ;;  %v366_v28 = vmul.f32 0.16666667, %v350_v63  ;;  %v369_v29 = vmul.f32 0.16666667, %v353_v0 }
 0x192   :  { %v4290_v14 = vpop.f32.mrf.mxu0  ;;  %v325_v37 = vmax.f32 %v309_v3, 0.0  ;;  %v526_v45 = vmax.f32 %v510_v8, 0.0  ;;  %v507_v35 = vadd.f32 3.0, %v4339_v9  ;;  %v544_v34 = vmin.f32 %v528_v18, 6.0 }
 0x193   :  { %v787_v12 = vmul.f32 0.25, %v371_v57  ;;  %v513_v36 = vadd.f32 3.0, %v495_v62  ;;  %v857_v46 = vsel %vm834_vm1, %v4261_v7, 0  ;;  %v4354_v2 = vmul.f32 0.25, %v368_v41 }
 0x194   :  { %v4311_v20 = vpop.f32.mrf.mxu0  ;;  %v367_v52 = vmul.f32 0.16666667, %v351_v23  ;;  %v525_v55 = vmax.f32 %v509_v6, 0.0  ;;  %3566 = vmatpush3.bf16.xpose.msra.mxu1 %v857_v46  ;;  %v487_v63 = vadd.f32 %v4221_v61, %v486_v42  ;;  %v340_v51 = vmin.f32 %v324_v13, 6.0 }
 0x195   :  { %v798_v49 = vpack.c.bf16 %v787_v12, %v786_v11  ;;  %v540_v59 = vmin.f32 %v524_v25, 6.0  ;;  %v538_v0 = vmin.f32 %v522_v39, 6.0  ;;  %v529_v3 = vmax.f32 %v513_v36, 0.0  ;;  %3802 = vmatprep.subr.msk.bf16.mxu1 %vm834_vm1, %v804_v24 }
 0x196   :  { %v4322_v56 = vpop.f32.mrf.mxu0  ;;  %v4360_v7 = vmul.f32 0.25, %v366_v28  ;;  %v341_v11 = vmin.f32 %v325_v37, 6.0  ;;  %v542_v12 = vmin.f32 %v526_v45, 6.0  ;;  %v511_v18 = vadd.f32 3.0, %v487_v63 }
 0x197   :  { %3605 = vmatprep.mubr.msk.bf16.mxu0 %vm834_vm1, %v798_v49  ;;  %v4362_v41 = vmul.f32 0.25, %v369_v29  ;;  %v523_v23 = vmax.f32 %v507_v35, 0.0  ;;  %v560_v6 = vmul.f32 %v544_v34, %v4305_v53  ;;  %v545_v49 = vmin.f32 %v529_v3, 6.0 }
 0x198   :  { %v4332_v58 = vpop.f32.mrf.mxu0  ;;  %v4367_v13 = vmul.f32 0.25, %v367_v52  ;;  %v541_v25 = vmin.f32 %v525_v55, 6.0  ;;  %v4371_v39 = vadd.f32 %v4212_v38, %v4265_v33  ;;  %v527_v28 = vmax.f32 %v511_v18, 0.0 }
 0x199   :  { %v356_v37 = vmul.f32 %v340_v51, %v4298_v22  ;;  %v556_v42 = vmul.f32 %v540_v59, %v4302_v5  ;;  %v554_v29 = vmul.f32 %v538_v0, %v4309_v27  ;;  %v561_v35 = vmul.f32 %v545_v49, %v495_v62 }
 0x19a   :  { %v4341_v10 = vpop.f32.mrf.mxu0  ;;  %v357_v34 = vmul.f32 %v341_v11, %v4316_v40  ;;  %v4381_v53 = vadd.f32 %v4255_v1, %v4212_v38  ;;  %v558_v36 = vmul.f32 %v542_v12, %v4319_v50  ;;  %v543_v33 = vmin.f32 %v527_v28, 6.0 }
 0x19b   :  { %v539_v46 = vmin.f32 %v523_v23, 6.0  ;;  %v576_v52 = vmul.f32 0.16666667, %v560_v6  ;;  %v577_v55 = vmul.f32 0.16666667, %v561_v35  ;;  %v854_v22 = vsel %vm834_vm1, %v804_v24, 0 }
 0x19c   :  { %v4346_v57 = vpop.f32.mrf.mxu0  ;;  %v557_v27 = vmul.f32 %v541_v25, %v4328_v43  ;;  %v4389_v62 = vadd.f32 3.0, %v4371_v39  ;;  %v559_v40 = vmul.f32 %v543_v33, %v487_v63  ;;  %3568 = vmatpush3.bf16.xpose.msra.mxu1 %v854_v22  ;;  %v4395_v51 = vmul.f32 0.16666667, %v356_v37  ;;  %v4400_v24 = vld [vmem:[%s5251_s6] ss:$0 sm:$0xff] }
 0x19d   :  { %v572_v59 = vmul.f32 0.16666667, %v556_v42  ;;  %v809_v0 = vpack.c.bf16 %v577_v55, %v576_v52  ;;  %3803 = vmatprep.subr.msk.bf16.mxu1 %vm834_vm1, %v4275_v44  ;;  %v570_v43 = vmul.f32 0.16666667, %v554_v29  ;;  %v574_v63 = vmul.f32 0.16666667, %v558_v36 }
 0x19e   :  { %v4352_v48 = vpop.f32.mrf.mxu0  ;;  %v575_v3 = vmul.f32 0.16666667, %v559_v40  ;;  %v4406_v11 = vadd.f32 %v4311_v20, %v4400_v24  ;;  %v4408_v12 = vmul.f32 0.16666667, %v357_v34  ;;  %v555_v18 = vmul.f32 %v539_v46, %v4339_v9 }
 0x19f   :  { %v4412_v23 = vadd.f32 3.0, %v4381_v53  ;;  %v660_v6 = vadd.f32 %v4332_v58, %v4400_v24  ;;  %3805 = vmatprep.subr.msk.bf16.mxu0 %vm834_vm1, %v809_v0  ;;  %v573_v44 = vmul.f32 0.16666667, %v557_v27  ;;  %v326_v49 = vmax.f32 %v4389_v62, 0.0 }
 0x1a0   :  { %v4358_v8 = vpop.f32.mrf.mxu0  ;;  %v808_v25 = vpack.c.bf16 %v575_v3, %v574_v63  ;;  %v4420_v20 = vadd.f32 %v4284_v60, %v4400_v24  ;;  %v4424_v9 = vadd.f32 %v4212_v38, %v4281_v54  ;;  %v652_v42 = vadd.f32 %v4400_v24, %v4341_v10 }
 0x1a1   :  { %v704_v37 = vadd.f32 3.0, %v660_v6  ;;  %v663_v58 = vadd.f32 %v4346_v57, %v4400_v24  ;;  %v701_v29 = vadd.f32 3.0, %v4406_v11  ;;  %v4433_v35 = vadd.f32 %v4400_v24, %v4322_v56 }
 0x1a2   :  { %v4365_v61 = vpop.f32.mrf.mxu0  ;;  %v1116_v60 = vsel %vm834_vm1, %v809_v0, 0  ;;  %v655_v34 = vadd.f32 %v4400_v24, %v4352_v48  ;;  %v571_v54 = vmul.f32 0.16666667, %v555_v18  ;;  %v702_v33 = vadd.f32 3.0, %v652_v42 }
 0x1a3   :  { %v720_v36 = vmax.f32 %v704_v37, 0.0  ;;  %v705_v46 = vadd.f32 3.0, %v663_v58  ;;  %3598 = vmatpush3.bf16.xpose.msra.mxu0 %v1116_v60  ;;  %v4440_v10 = vadd.f32 %v4273_v32, %v4212_v38  ;;  %v700_v57 = vadd.f32 3.0, %v4420_v20 }
 0x1a4   :  { %v4376_v45 = vpop.f32.mrf.mxu0  ;;  %v4445_v56 = vadd.f32 %v4400_v24, %v4290_v14  ;;  %3570 = vmatpush3.bf16.xpose.msra.mxu1 %v4288_v4  ;;  %3806 = vmatprep.subr.msk.bf16.mxu0 %vm834_vm1, %v808_v25  ;;  %v703_v48 = vadd.f32 3.0, %v655_v34  ;;  %v311_v55 = vadd.f32 3.0, %v4424_v9  ;;  %v718_v27 = vmax.f32 %v702_v33, 0.0 }
 0x1a5   :  { %v736_v22 = vmin.f32 %v720_v36, 6.0  ;;  %v721_v62 = vmax.f32 %v705_v46, 0.0  ;;  %3804 = vmatprep.subr.msk.bf16.mxu1 %vm834_vm1, %v4278_v47  ;;  %v717_v32 = vmax.f32 %v701_v29, 0.0  ;;  %v699_v14 = vadd.f32 3.0, %v4433_v35 }
 0x1a6   :  { %v4391_v1 = vpop.f32.mrf.mxu0  ;;  %v719_v40 = vmax.f32 %v703_v48, 0.0  ;;  %v807_v0 = vpack.c.bf16 %v573_v44, %v572_v59  ;;  %v734_v63 = vmin.f32 %v718_v27, 6.0  ;;  %v4455_v18 = vadd.f32 3.0, %v4440_v10 }
 0x1a7   :  { %v752_v4 = vmul.f32 %v736_v22, %v660_v6  ;;  %v737_v3 = vmin.f32 %v721_v62, 6.0  ;;  %v716_v37 = vmax.f32 %v700_v57, 0.0  ;;  %v698_v60 = vadd.f32 3.0, %v4445_v56 }
 0x1a8   :  { %v3563_v28 = vpop.f32.mrf.mxu0  ;;  %v735_v36 = vmin.f32 %v719_v40, 6.0  ;;  %v4458_v46 = vpack.c.bf16 %v571_v54, %v570_v43  ;;  %v342_v47 = vmin.f32 %v326_v49, 6.0  ;;  %v327_v5 = vmax.f32 %v311_v55, 0.0 }
 0x1a9   :  { %v753_v29 = vmul.f32 %v737_v3, %v663_v58  ;;  %v733_v38 = vmin.f32 %v717_v32, 6.0  ;;  %v715_v50 = vmax.f32 %v699_v14, 0.0  ;;  %v1113_v59 = vsel %vm834_vm1, %v808_v25, 0 }
 0x1aa   :  { %v683_v52 = vpop.f32.mrf.mxu0  ;;  %v751_v48 = vmul.f32 %v735_v36, %v655_v34  ;;  %v768_v6 = vmul.f32 0.16666667, %v752_v4  ;;  %v750_v44 = vmul.f32 %v734_v63, %v652_v42  ;;  %v692_v57 = vadd.f32 %v3563_v28, %v4400_v24 }
 0x1ab   :  { %v769_v22 = vmul.f32 0.16666667, %v753_v29  ;;  %3600 = vmatpush3.bf16.xpose.msra.mxu0 %v1113_v59  ;;  %v329_v27 = vmax.f32 %v4455_v18, 0.0  ;;  %v732_v62 = vmin.f32 %v716_v37, 6.0  ;;  %v714_v40 = vmax.f32 %v698_v60, 0.0 }
 0x1ac   :  { %v3564_v33 = vpop.f32.mrf.mxu0  ;;  %v4465_v43 = vadd.f32 %v4376_v45, %v4400_v24  ;;  %3572 = vmatpush3.bf16.xpose.msra.mxu1 %v4294_v19  ;;  %3807 = vmatprep.subr.msk.bf16.mxu0 %vm834_vm1, %v807_v0  ;;  %v767_v25 = vmul.f32 0.16666667, %v751_v48  ;;  %v712_v58 = vadd.f32 3.0, %v692_v57  ;;  %v684_v42 = vadd.f32 %v4400_v24, %v683_v52 }
 0x1ad   :  { %v813_v34 = vpack.c.bf16 %v769_v22, %v768_v6  ;;  %v343_v54 = vmin.f32 %v327_v5, 6.0  ;;  %v749_v28 = vmul.f32 %v733_v38, %v4406_v11  ;;  %v731_v55 = vmin.f32 %v715_v50, 6.0 }
 0x1ae   :  { %v686_v49 = vpop.f32.mrf.mxu0  ;;  %v695_v32 = vadd.f32 %v3564_v33, %v4400_v24  ;;  %v766_v14 = vmul.f32 0.16666667, %v750_v44  ;;  %v728_v4 = vmax.f32 %v712_v58, 0.0  ;;  %v710_v45 = vadd.f32 3.0, %v684_v42 }
 0x1af   :  { %3581 = vmatprep.subr.bf16.mxu1 %v813_v34  ;;  %v687_v19 = vadd.f32 %v4400_v24, %v686_v49  ;;  %v748_v63 = vmul.f32 %v732_v62, %v4420_v20  ;;  %v730_v3 = vmin.f32 %v714_v40, 6.0  ;;  %v4476_v18 = vadd.f32 %v4358_v8, %v4400_v24 }
 0x1b0   :  { %v713_v52 = vadd.f32 3.0, %v695_v32  ;;  %v709_v5 = vadd.f32 3.0, %v4465_v43  ;;  %v744_v11 = vmin.f32 %v728_v4, 6.0  ;;  %v812_v50 = vpack.c.bf16 %v767_v25, %v766_v14 }
 0x1b1   :  { %v711_v38 = vadd.f32 3.0, %v687_v19  ;;  %v4481_v37 = vadd.f32 %v4400_v24, %v4391_v1  ;;  %v726_v60 = vmax.f32 %v710_v45, 0.0  ;;  %v1110_v33 = vsel %vm834_vm1, %v807_v0, 0 }
 0x1b2   :  { %v729_v36 = vmax.f32 %v713_v52, 0.0  ;;  %v765_v20 = vmul.f32 0.16666667, %v749_v28  ;;  %v747_v29 = vmul.f32 %v731_v55, %v4433_v35  ;;  %v4487_v8 = vadd.f32 %v4400_v24, %v4365_v61 }
 0x1b3   :  { %v5265_v48 = vpack.c.bf16 %v4230_v17, %v4228_v15  ;;  %3602 = vmatpush3.bf16.xpose.msra.mxu0 %v1110_v33  ;;  %v727_v59 = vmax.f32 %v711_v38, 0.0  ;;  %v359_v1 = vmul.f32 %v343_v54, %v4424_v9  ;;  %v708_v6 = vadd.f32 3.0, %v4476_v18 }
 0x1b4   :  { %v760_v44 = vmul.f32 %v744_v11, %v692_v57  ;;  %v745_v0 = vmin.f32 %v729_v36, 6.0  ;;  %v5266_v35 = vpack.c.bf16 %v4367_v13, %v4360_v7  ;;  %v764_v61 = vmul.f32 0.16666667, %v748_v63  ;;  %3808 = vmatprep.subr.msk.bf16.mxu0 %vm834_vm1, %v4458_v46 }
 0x1b5   :  { %3574 = vmatmul.mubr.msk.bf16.vlgmr.msra.gmra.mxu1 %vm834_vm1, %v5265_v48  ;;  %v746_v24 = vmul.f32 %v730_v3, %v4445_v56  ;;  %v725_v15 = vmax.f32 %v709_v5, 0.0  ;;  %v743_v17 = vmin.f32 %v727_v59, 6.0  ;;  %v358_v9 = vmul.f32 %v342_v47, %v4371_v39 }
 0x1b6   :  { %3577 = vmatprep.mubr.msk.bf16.mxu1 %vm834_vm1, %v5266_v35  ;;  %3582 = vmatpush3.bf16.msra.mxu1 %v813_v34  ;;  %v707_v22 = vadd.f32 3.0, %v4481_v37  ;;  %v742_v57 = vmin.f32 %v726_v60, 6.0  ;;  %v761_v62 = vmul.f32 %v745_v0, %v695_v32  ;;  %v345_v40 = vmin.f32 %v329_v27, 6.0 }
 0x1b7   :  { %3583 = vmatprep.subr.bf16.mxu1 %v812_v50  ;;  %v763_v7 = vmul.f32 0.16666667, %v747_v29  ;;  %v706_v13 = vadd.f32 3.0, %v4487_v8  ;;  %v811_v49 = vpack.c.bf16 %v765_v20, %v764_v61  ;;  %v724_v25 = vmax.f32 %v708_v6, 0.0  ;;  %v3324_v61 = vld [vmem:[#allocation2] sm:$0xff]  }
 0x1b8   :  { %v776_v58 = vmul.f32 0.16666667, %v760_v44  ;;  %v777_v56 = vmul.f32 0.16666667, %v761_v62  ;;  %v759_v34 = vmul.f32 %v743_v17, %v687_v19  ;;  %v5267_v54 = vmax.f32 %v4412_v23, 0.0 }
 0x1b9   :  { %v375_v55 = vmul.f32 0.16666667, %v359_v1  ;;  %v762_v14 = vmul.f32 0.16666667, %v746_v24  ;;  %v741_v39 = vmin.f32 %v725_v15, 6.0  ;;  %v723_v47 = vmax.f32 %v707_v22, 0.0 }
 0x1ba   :  { %3584 = vmatpush3.bf16.msra.mxu1 %v812_v50  ;;  %v344_v28 = vmin.f32 %v5267_v54, 6.0  ;;  %v758_v4 = vmul.f32 %v742_v57, %v684_v42  ;;  %v4507_v32 = vpack.c.bf16 %v777_v56, %v776_v58  ;;  %v1107_v27 = vsel %vm834_vm1, %v4458_v46, 0  ;;  %v3357_v56 = vld [vmem:[#allocation2 + $0x18] sm:$0xff]  }
 0x1bb   :  { %3585 = vmatprep.subr.bf16.mxu1 %v811_v49  ;;  %v789_v45 = vmul.f32 0.25, %v4408_v12  ;;  %v374_v63 = vmul.f32 0.16666667, %v358_v9  ;;  %v5268_v19 = vpack.c.bf16 %v4362_v41, %v4354_v2  ;;  %3604 = vmatpush3.bf16.xpose.msra.mxu0 %v1107_v27  ;;  %v810_v23 = vpack.c.bf16 %v763_v7, %v762_v14 }
 0x1bc   :  { %v361_v3 = vmul.f32 %v345_v40, %v4440_v10  ;;  %v740_v52 = vmin.f32 %v724_v25, 6.0  ;;  %v722_v5 = vmax.f32 %v706_v13, 0.0  ;;  %v775_v42 = vmul.f32 0.16666667, %v759_v34  ;;  %3613 = vmatprep.subr.bf16.mxu0 %v4507_v32  ;;  %v3356_v13 = vld [vmem:[#allocation2 + $0x10] sm:$0xff]  }
 0x1bd   :  { %3578 = vmatmul.mubr.msk.bf16.gmra.mxu1 %vm834_vm1, %v5268_v19  ;;  %v788_v46 = vmul.f32 0.25, %v4395_v51  ;;  %v791_v11 = vmul.f32 0.25, %v375_v55  ;;  %v360_v12 = vmul.f32 %v344_v28, %v4381_v53  ;;  %v757_v2 = vmul.f32 %v741_v39, %v4465_v43 }
 0x1be   :  { %3586 = vmatpush3.bf16.msra.mxu1 %v811_v49  ;;  %v739_v41 = vmin.f32 %v723_v47, 6.0  ;;  %v774_v50 = vmul.f32 0.16666667, %v758_v4  ;;  %v790_v60 = vmul.f32 0.25, %v374_v63  ;;  %v377_v36 = vmul.f32 0.16666667, %v361_v3 }
 0x1bf   :  { %3587 = vmatprep.subr.bf16.mxu1 %v810_v23  ;;  %v799_v38 = vpack.c.bf16 %v789_v45, %v788_v46  ;;  %v756_v10 = vmul.f32 %v740_v52, %v4476_v18  ;;  %v738_v33 = vmin.f32 %v722_v5, 6.0  ;;  %v376_v51 = vmul.f32 0.16666667, %v360_v12 }
 0x1c0   :  { %v4522_v20 = vpack.c.bf16 %v775_v42, %v774_v50  ;;  %v800_v29 = vpack.c.bf16 %v791_v11, %v790_v60  ;;  %v773_v48 = vmul.f32 0.16666667, %v757_v2  ;;  %v755_v53 = vmul.f32 %v739_v41, %v4481_v37 }
 0x1c1   :  { %v793_v43 = vmul.f32 0.25, %v377_v36  ;;  %v772_v59 = vmul.f32 0.16666667, %v756_v10  ;;  %v754_v18 = vmul.f32 %v738_v33, %v4487_v8  ;;  %v792_v1 = vmul.f32 0.25, %v376_v51  ;;  %v3355_v8 = vld [vmem:[#allocation2 + $0x8] sm:$0xff]  }
 0x1c2   :  { %3588 = vmatpush3.bf16.msra.mxu1 %v810_v23  ;;  %3606 = vmatmul.mubr.msk.bf16.vlgmr.msra.gmra.mxu0 %vm834_vm1, %v799_v38  ;;  %v771_v44 = vmul.f32 0.16666667, %v755_v53  ;;  %v3329_v24 = vunpack.c.l.bf16 %v3355_v8  ;;  %v3325_v15 = vunpack.c.l.bf16 %v3324_v61  ;;  %v3326_v40 = vunpack.c.h.bf16 %v3324_v61 }
 0x1c3   :  { %3793 = vmatprep.subr.bf16.mxu1 %v4507_v32  ;;  %3609 = vmatprep.mubr.msk.bf16.mxu0 %vm834_vm1, %v800_v29  ;;  %v4531_v6 = vpack.c.bf16 %v773_v48, %v772_v59  ;;  %v801_v0 = vpack.c.bf16 %v793_v43, %v792_v1  ;;  %v770_v37 = vmul.f32 0.16666667, %v754_v18  ;;  %v3330_v49 = vunpack.c.h.bf16 %v3355_v8 }
 0x1c4   :  { %3614 = vmatpush3.bf16.msra.mxu0 %v4507_v32  ;;  %v3333_v54 = vunpack.c.l.bf16 %v3356_v13  ;;  %v3337_v14 = vunpack.c.l.bf16 %v3357_v56  ;;  %v3334_v27 = vunpack.c.h.bf16 %v3356_v13  ;;  %v3338_v19 = vunpack.c.h.bf16 %v3357_v56 }
 0x1c5   :  { %3615 = vmatprep.subr.bf16.mxu0 %v4522_v20  ;;  %v4535_v35 = vpack.c.bf16 %v771_v44, %v770_v37 }
 0x1c8   :  { %3616 = vmatpush3.bf16.msra.mxu0 %v4522_v20 }
 0x1c9   :  { %3617 = vmatprep.subr.bf16.mxu0 %v4531_v6 }
 0x1ca   :  { %3610 = vmatmul.mubr.msk.bf16.gmra.mxu0 %vm834_vm1, %v801_v0 }
 0x1cc   :  { %3618 = vmatpush3.bf16.msra.mxu0 %v4531_v6 }
 0x1cd   :  { %3619 = vmatprep.subr.bf16.mxu0 %v4535_v35 }
 0x1d0   :  { %3620 = vmatpush3.bf16.msra.mxu0 %v4535_v35 }
 0x275   :  { %v3575_v17 = vpop.f32.mrf.mxu1 }
 0x276   :  { %v4541_v9 = vadd.f32 %v3575_v17, %v3329_v24 }
 0x277   :  { %v893_v22 = vpop.f32.mrf.mxu1 }
 0x278   :  { %v4543_v57 = vadd.f32 %v3325_v15, %v893_v22  ;;  %v931_v62 = vsel %vm924_vm2, %v4541_v9, -inf }
 0x279   :  { %932 = vmax.xlane.f32.xlu1 %v931_v62  ;;  %v3576_v7 = vpop.f32.mrf.mxu1 }
 0x27a   :  { %v925_v25 = vsel %vm924_vm2, %v4543_v57, -inf  ;;  %v4551_v55 = vadd.f32 %v3576_v7, %v3330_v49 }
 0x27b   :  { %v896_v58 = vpop.f32.mrf.mxu1  ;;  %926 = vmax.xlane.f32.xlu0 %v925_v25 }
 0x27c   :  { %v4549_v34 = vadd.f32 %v3326_v40, %v896_v58  ;;  %v934_v23 = vsel %vm924_vm2, %v4551_v55, -inf }
 0x27d   :  { %v3579_v28 = vpop.f32.mrf.mxu1 }
 0x27e   :  { %v928_v39 = vsel %vm924_vm2, %v4549_v34, -inf  ;;  %v4557_v63 = vadd.f32 %v3579_v28, %v3337_v14 }
 0x27f   :  { %929 = vmax.xlane.f32.xlu1 %v928_v39  ;;  %v909_v47 = vpop.f32.mrf.mxu1 }
 0x280   :  { %v4555_v4 = vadd.f32 %v3333_v54, %v909_v47  ;;  %v943_v2 = vsel %vm924_vm2, %v4557_v63, -inf }
 0x281   :  { %v3580_v45 = vpop.f32.mrf.mxu1 }
 0x282   :  { %v937_v3 = vsel %vm924_vm2, %v4555_v4, -inf  ;;  %v3607_v42 = vpop.f32.mrf.mxu0  ;;  %v4565_v46 = vadd.f32 %v3580_v45, %v3338_v19 }
 0x283   :  { %935 = vmax.xlane.f32.xlu1 %v934_v23  ;;  %v912_v52 = vpop.f32.mrf.mxu1  ;;  %938 = vmax.xlane.f32.xlu0 %v937_v3  ;;  %v4575_v60 = vadd.f32 %v3607_v42, %v3329_v24 }
 0x284   :  { %v4563_v5 = vadd.f32 %v3334_v27, %v912_v52  ;;  %v1152_v11 = vpop.f32.mrf.mxu0  ;;  %v946_v10 = vsel %vm924_vm2, %v4565_v46, -inf }
 0x285   :  { %v4571_v41 = vadd.f32 %v3325_v15, %v1152_v11  ;;  %v1189_v43 = vsel %vm924_vm2, %v4575_v60, -inf }
 0x286   :  { %v940_v12 = vsel %vm924_vm2, %v4563_v5, -inf  ;;  %v3608_v50 = vpop.f32.mrf.mxu0 }
 0x287   :  { %941 = vmax.xlane.f32.xlu1 %v940_v12  ;;  %944 = vmax.xlane.f32.xlu0 %v943_v2  ;;  %v1183_v38 = vsel %vm924_vm2, %v4571_v41, -inf  ;;  %v4583_v48 = vadd.f32 %v3608_v50, %v3330_v49 }
 0x288   :  { %v1155_v36 = vpop.f32.mrf.mxu0 }
 0x289   :  { %v4579_v33 = vadd.f32 %v3326_v40, %v1155_v36  ;;  %v1192_v37 = vsel %vm924_vm2, %v4583_v48, -inf }
 0x28a   :  { %v3611_v29 = vpop.f32.mrf.mxu0 }
 0x28b   :  { %947 = vmax.xlane.f32.xlu1 %v946_v10  ;;  %1184 = vmax.xlane.f32.xlu0 %v1183_v38  ;;  %v1186_v51 = vsel %vm924_vm2, %v4579_v33, -inf  ;;  %v4591_v44 = vadd.f32 %v3611_v29, %v3337_v14 }
 0x28c   :  { %v1168_v53 = vpop.f32.mrf.mxu0 }
 0x28d   :  { %v4587_v59 = vadd.f32 %v3333_v54, %v1168_v53  ;;  %v1201_v15 = vsel %vm924_vm2, %v4591_v44, -inf }
 0x28e   :  { %v3612_v18 = vpop.f32.mrf.mxu0 }
 0x28f   :  { %1187 = vmax.xlane.f32.xlu1 %v1186_v51  ;;  %1190 = vmax.xlane.f32.xlu0 %v1189_v43  ;;  %v1195_v1 = vsel %vm924_vm2, %v4587_v59, -inf  ;;  %v4599_v24 = vadd.f32 %v3612_v18, %v3338_v19 }
 0x290   :  { %v1171_v0 = vpop.f32.mrf.mxu0 }
 0x291   :  { %v4595_v8 = vadd.f32 %v3334_v27, %v1171_v0  ;;  %v1204_v17 = vsel %vm924_vm2, %v4599_v24, -inf }
 0x293   :  { %1193 = vmax.xlane.f32.xlu1 %v1192_v37  ;;  %1196 = vmax.xlane.f32.xlu0 %v1195_v1  ;;  %v1198_v61 = vsel %vm924_vm2, %v4595_v8, -inf }
 0x297   :  { %1199 = vmax.xlane.f32.xlu1 %v1198_v61  ;;  %1202 = vmax.xlane.f32.xlu0 %v1201_v15 }
 0x29b   :  { %1205 = vmax.xlane.f32.xlu1 %v1204_v17 }
 0x302   :  { %v933_v22 = vpop.xlane.xlu1 %932 }
 0x303   :  { %v951_v62 = vsub.f32 %v4541_v9, %v933_v22 }
 0x304   :  { %v927_v40 = vpop.xlane.xlu0 %926 }
 0x305   :  { %v949_v7 = vsub.f32 %v4543_v57, %v927_v40  ;;  %v961_v13 = vmul.f32 1.442695, %v951_v62 }
 0x307   :  { %v957_v49 = vmul.f32 1.442695, %v949_v7 }
 0x308   :  { %v930_v25 = vpop.xlane.xlu1 %929 }
 0x309   :  { %3841 = vpow2.f32 %v957_v49  ;;  %v950_v58 = vsub.f32 %v4549_v34, %v930_v25 }
 0x30a   :  { %3843 = vpow2.f32 %v961_v13 }
 0x30b   :  { %v959_v56 = vmul.f32 1.442695, %v950_v58 }
 0x30c   :  { %v936_v54 = vpop.xlane.xlu1 %935  ;;  %v939_v28 = vpop.xlane.xlu0 %938 }
 0x30d   :  { %3845 = vpow2.f32 %v959_v56  ;;  %v952_v14 = vsub.f32 %v4551_v55, %v936_v54  ;;  %v953_v39 = vsub.f32 %v4555_v4, %v939_v28 }
 0x30f   :  { %v963_v47 = vmul.f32 1.442695, %v952_v14  ;;  %v965_v9 = vmul.f32 1.442695, %v953_v39 }
 0x310   :  { %v942_v27 = vpop.xlane.xlu1 %941  ;;  %v945_v45 = vpop.xlane.xlu0 %944 }
 0x311   :  { %3847 = vpow2.f32 %v963_v47  ;;  %v954_v57 = vsub.f32 %v4563_v5, %v942_v27  ;;  %v955_v19 = vsub.f32 %v4557_v63, %v945_v45 }
 0x312   :  { %3849 = vpow2.f32 %v965_v9 }
 0x313   :  { %v967_v34 = vmul.f32 1.442695, %v954_v57  ;;  %v969_v23 = vmul.f32 1.442695, %v955_v19 }
 0x314   :  { %v948_v3 = vpop.xlane.xlu1 %947  ;;  %v1185_v52 = vpop.xlane.xlu0 %1184 }
 0x315   :  { %3851 = vpow2.f32 %v967_v34  ;;  %v956_v42 = vsub.f32 %v4565_v46, %v948_v3  ;;  %v1207_v55 = vsub.f32 %v4571_v41, %v1185_v52 }
 0x316   :  { %v4614_v4 = vpop.eup %3841  ;;  %3853 = vpow2.f32 %v969_v23 }
 0x317   :  { %v971_v11 = vmul.f32 1.442695, %v956_v42  ;;  %v1215_v12 = vmul.f32 1.442695, %v1207_v55  ;;  %v973_v5 = vsel %vm924_vm2, %v4614_v4, 0.0  ;;  %v4618_v2 = vpop.eup %3843 }
 0x318   :  { %v1188_v63 = vpop.xlane.xlu1 %1187  ;;  %974 = vadd.xlane.f32.xlu0 %v973_v5  ;;  %v1191_v50 = vpop.xlane.xlu0 %1190  ;;  %v979_v51 = vsel %vm924_vm2, %v4618_v2, 0.0 }
 0x319   :  { %3855 = vpow2.f32 %v971_v11  ;;  %v1208_v38 = vsub.f32 %v4579_v33, %v1188_v63  ;;  %v1209_v46 = vsub.f32 %v4575_v60, %v1191_v50 }
 0x31a   :  { %v4622_v36 = vpop.eup %3845  ;;  %3857 = vpow2.f32 %v1215_v12 }
 0x31b   :  { %v1217_v41 = vmul.f32 1.442695, %v1208_v38  ;;  %v1219_v10 = vmul.f32 1.442695, %v1209_v46  ;;  %v976_v29 = vsel %vm924_vm2, %v4622_v36, 0.0 }
 0x31c   :  { %977 = vadd.xlane.f32.xlu1 %v976_v29  ;;  %v1194_v53 = vpop.xlane.xlu1 %1193  ;;  %980 = vadd.xlane.f32.xlu0 %v979_v51  ;;  %v1197_v43 = vpop.xlane.xlu0 %1196 }
 0x31d   :  { %3859 = vpow2.f32 %v1217_v41  ;;  %v1210_v33 = vsub.f32 %v4583_v48, %v1194_v53  ;;  %v1211_v60 = vsub.f32 %v4587_v59, %v1197_v43 }
 0x31e   :  { %v4630_v18 = vpop.eup %3847  ;;  %3861 = vpow2.f32 %v1219_v10 }
 0x31f   :  { %v4632_v1 = vpop.eup %3849  ;;  %v1221_v0 = vmul.f32 1.442695, %v1210_v33  ;;  %v1223_v37 = vmul.f32 1.442695, %v1211_v60  ;;  %v982_v61 = vsel %vm924_vm2, %v4630_v18, 0.0 }
 0x320   :  { %983 = vadd.xlane.f32.xlu1 %v982_v61  ;;  %v1200_v15 = vpop.xlane.xlu1 %1199  ;;  %v985_v17 = vsel %vm924_vm2, %v4632_v1, 0.0  ;;  %v1203_v22 = vpop.xlane.xlu0 %1202 }
 0x321   :  { %3863 = vpow2.f32 %v1221_v0  ;;  %v1212_v48 = vsub.f32 %v4595_v8, %v1200_v15  ;;  %986 = vadd.xlane.f32.xlu0 %v985_v17  ;;  %v1213_v59 = vsub.f32 %v4591_v44, %v1203_v22 }
 0x322   :  { %v4640_v62 = vpop.eup %3851  ;;  %3865 = vpow2.f32 %v1223_v37 }
 0x323   :  { %v4642_v40 = vpop.eup %3853  ;;  %v1225_v7 = vmul.f32 1.442695, %v1212_v48  ;;  %v1227_v13 = vmul.f32 1.442695, %v1213_v59  ;;  %v988_v49 = vsel %vm924_vm2, %v4640_v62, 0.0 }
 0x324   :  { %989 = vadd.xlane.f32.xlu1 %v988_v49  ;;  %v1206_v25 = vpop.xlane.xlu1 %1205  ;;  %v991_v58 = vsel %vm924_vm2, %v4642_v40, 0.0 }
 0x325   :  { %3867 = vpow2.f32 %v1225_v7  ;;  %v1214_v8 = vsub.f32 %v4599_v24, %v1206_v25  ;;  %992 = vadd.xlane.f32.xlu0 %v991_v58 }
 0x326   :  { %v4649_v44 = vpop.eup %3855  ;;  %3869 = vpow2.f32 %v1227_v13 }
 0x327   :  { %v4651_v56 = vpop.eup %3857  ;;  %v1229_v54 = vmul.f32 1.442695, %v1214_v8  ;;  %v994_v28 = vsel %vm924_vm2, %v4649_v44, 0.0 }
 0x328   :  { %995 = vadd.xlane.f32.xlu1 %v994_v28  ;;  %v1231_v14 = vsel %vm924_vm2, %v4651_v56, 0.0 }
 0x329   :  { %3871 = vpow2.f32 %v1229_v54  ;;  %1232 = vadd.xlane.f32.xlu0 %v1231_v14 }
 0x32a   :  { %v4657_v39 = vpop.eup %3859 }
 0x32b   :  { %v4659_v47 = vpop.eup %3861  ;;  %v1234_v24 = vsel %vm924_vm2, %v4657_v39, 0.0 }
 0x32c   :  { %1235 = vadd.xlane.f32.xlu1 %v1234_v24  ;;  %v1237_v9 = vsel %vm924_vm2, %v4659_v47, 0.0 }
 0x32d   :  { %1238 = vadd.xlane.f32.xlu0 %v1237_v9 }
 0x32e   :  { %v4665_v27 = vpop.eup %3863 }
 0x32f   :  { %v4667_v45 = vpop.eup %3865  ;;  %v1240_v57 = vsel %vm924_vm2, %v4665_v27, 0.0 }
 0x330   :  { %1241 = vadd.xlane.f32.xlu1 %v1240_v57  ;;  %v1243_v19 = vsel %vm924_vm2, %v4667_v45, 0.0 }
 0x331   :  { %1244 = vadd.xlane.f32.xlu0 %v1243_v19 }
 0x332   :  { %v4673_v34 = vpop.eup %3867 }
 0x333   :  { %v4675_v23 = vpop.eup %3869  ;;  %v1246_v3 = vsel %vm924_vm2, %v4673_v34, 0.0 }
 0x334   :  { %1247 = vadd.xlane.f32.xlu1 %v1246_v3  ;;  %v1249_v52 = vsel %vm924_vm2, %v4675_v23, 0.0 }
 0x335   :  { %1250 = vadd.xlane.f32.xlu0 %v1249_v52 }
 0x336   :  { %v4681_v42 = vpop.eup %3871 }
 0x337   :  { %v1252_v55 = vsel %vm924_vm2, %v4681_v42, 0.0 }
 0x338   :  { %1253 = vadd.xlane.f32.xlu1 %v1252_v55 }
 0x3a1   :  { %v975_v11 = vpop.xlane.xlu0 %974 }
 0x3a2   :  { %3873 = vrcp.f32 %v975_v11 }
 0x3a5   :  { %v978_v12 = vpop.xlane.xlu1 %977  ;;  %v981_v5 = vpop.xlane.xlu0 %980 }
 0x3a6   :  { %3875 = vrcp.f32 %v978_v12 }
 0x3a7   :  { %3877 = vrcp.f32 %v981_v5 }
 0x3a9   :  { %v984_v63 = vpop.xlane.xlu1 %983 }
 0x3aa   :  { %3879 = vrcp.f32 %v984_v63  ;;  %v987_v50 = vpop.xlane.xlu0 %986  ;;  %v5271_v63 = vld [vmem:[#allocation13_spill] sm:$0xff] }
 0x3ab   :  { %3881 = vrcp.f32 %v987_v50  ;;  %v3835_v50 = vld [vmem:[#allocation5 + $0x8] sm:$0xff]  }
 0x3ac   :  { %3629 = vmatprep.subr.bf16.mxu0 %v3835_v50 }
 0x3ad   :  { %v990_v38 = vpop.xlane.xlu1 %989 }
 0x3ae   :  { %3883 = vrcp.f32 %v990_v38  ;;  %v993_v46 = vpop.xlane.xlu0 %992  ;;  %v3836_v38 = vld [vmem:[#allocation5] sm:$0xff]  }
 0x3af   :  { %3885 = vrcp.f32 %v993_v46  ;;  %v3874_v41 = vpop.eup %3873  ;;  %v3837_v46 = vld [vmem:[%s5247_s2 + $0x18] sm:$0xff]  }
 0x3b0   :  { %v1005_v53 = vmul.f32 %v3874_v41, %v4614_v4 }
 0x3b1   :  { %v996_v10 = vpop.xlane.xlu1 %995 }
 0x3b2   :  { %3887 = vrcp.f32 %v996_v10  ;;  %v1233_v29 = vpop.xlane.xlu0 %1232 }
 0x3b3   :  { %v3876_v51 = vpop.eup %3875  ;;  %3889 = vrcp.f32 %v1233_v29 }
 0x3b4   :  { %v1006_v43 = vmul.f32 %v3876_v51, %v4622_v36  ;;  %v3878_v33 = vpop.eup %3877 }
 0x3b5   :  { %v1236_v60 = vpop.xlane.xlu1 %1235  ;;  %v1007_v15 = vmul.f32 %v3878_v33, %v4618_v2 }
 0x3b6   :  { %3891 = vrcp.f32 %v1236_v60  ;;  %v1239_v0 = vpop.xlane.xlu0 %1238  ;;  %v1013_v37 = vpack.c.bf16 %v1006_v43, %v1005_v53 }
 0x3b7   :  { %v3880_v61 = vpop.eup %3879  ;;  %3893 = vrcp.f32 %v1239_v0 }
 0x3b8   :  { %v1008_v17 = vmul.f32 %v3880_v61, %v4630_v18  ;;  %3589 = vmatprep.mubr.msk.bf16.mxu1 %vm924_vm2, %v1013_v37  ;;  %v3882_v22 = vpop.eup %3881 }
 0x3b9   :  { %v1242_v48 = vpop.xlane.xlu1 %1241  ;;  %v1009_v36 = vmul.f32 %v3882_v22, %v4632_v1 }
 0x3ba   :  { %v1014_v59 = vpack.c.bf16 %v1008_v17, %v1007_v15  ;;  %3895 = vrcp.f32 %v1242_v48  ;;  %v1245_v4 = vpop.xlane.xlu0 %1244 }
 0x3bb   :  { %v3884_v7 = vpop.eup %3883  ;;  %3897 = vrcp.f32 %v1245_v4 }
 0x3bc   :  { %3590 = vmatmul.mubr.msk.bf16.vlgmr.msra.gmra.mxu1 %vm924_vm2, %v1014_v59  ;;  %v1010_v13 = vmul.f32 %v3884_v7, %v4640_v62  ;;  %v3886_v49 = vpop.eup %3885 }
 0x3bd   :  { %3797 = vmatpush3.bf16.msra.mxu1 %v4507_v32  ;;  %v1248_v2 = vpop.xlane.xlu1 %1247  ;;  %v1011_v8 = vmul.f32 %v3886_v49, %v4642_v40 }
 0x3be   :  { %3899 = vrcp.f32 %v1248_v2  ;;  %3794 = vmatprep.subr.bf16.mxu1 %v4522_v20  ;;  %v1251_v18 = vpop.xlane.xlu0 %1250  ;;  %v1015_v25 = vpack.c.bf16 %v1010_v13, %v1009_v36 }
 0x3bf   :  { %v3888_v58 = vpop.eup %3887  ;;  %3901 = vrcp.f32 %v1251_v18 }
 0x3c0   :  { %3593 = vmatprep.mubr.msk.bf16.mxu1 %vm924_vm2, %v1015_v25  ;;  %v1012_v54 = vmul.f32 %v3888_v58, %v4649_v44  ;;  %v3890_v1 = vpop.eup %3889 }
 0x3c1   :  { %3798 = vmatpush3.bf16.msra.mxu1 %v4522_v20  ;;  %v1254_v62 = vpop.xlane.xlu1 %1253  ;;  %v1263_v14 = vmul.f32 %v3890_v1, %v4651_v56  ;;  %v3831_v20 = vld [vmem:[%s5246_s1 + $0x18] sm:$0xff]  }
 0x3c2   :  { %3903 = vrcp.f32 %v1254_v62  ;;  %3795 = vmatprep.subr.bf16.mxu1 %v4531_v6  ;;  %v1016_v32 = vpack.c.bf16 %v1012_v54, %v1011_v8 }
 0x3c3   :  { %v3892_v28 = vpop.eup %3891 }
 0x3c4   :  { %3594 = vmatmul.mubr.msk.bf16.gmra.mxu1 %vm924_vm2, %v1016_v32  ;;  %v1264_v24 = vmul.f32 %v3892_v28, %v4657_v39  ;;  %v3894_v9 = vpop.eup %3893 }
 0x3c5   :  { %3799 = vmatpush3.bf16.msra.mxu1 %v4531_v6  ;;  %v1265_v57 = vmul.f32 %v3894_v9, %v4659_v47 }
 0x3c6   :  { %3796 = vmatprep.subr.bf16.mxu1 %v4535_v35  ;;  %v1271_v40 = vpack.c.bf16 %v1264_v24, %v1263_v14 }
 0x3c7   :  { %v3896_v44 = vpop.eup %3895 }
 0x3c8   :  { %v1266_v19 = vmul.f32 %v3896_v44, %v4665_v27  ;;  %3621 = vmatprep.mubr.msk.bf16.mxu0 %vm924_vm2, %v1271_v40  ;;  %v3898_v56 = vpop.eup %3897 }
 0x3c9   :  { %3800 = vmatpush3.bf16.msra.mxu1 %v4535_v35  ;;  %v1267_v3 = vmul.f32 %v3898_v56, %v4667_v45  ;;  %v3832_v35 = vld [vmem:[%s5246_s1 + $0x10] sm:$0xff]   ;;  %v3833_v45 = vld [vmem:[%s5248_s3 + $0x18] sm:$0xff]  }
 0x3ca   :  { %v1272_v39 = vpack.c.bf16 %v1266_v19, %v1265_v57  ;;  %3649 = vmatprep.subr.bf16.mxu1 %v3831_v20 }
 0x3cb   :  { %v3900_v6 = vpop.eup %3899 }
 0x3cc   :  { %3622 = vmatmul.mubr.msk.bf16.vlgmr.msra.gmra.mxu0 %vm924_vm2, %v1272_v39  ;;  %v1268_v52 = vmul.f32 %v3900_v6, %v4673_v34  ;;  %v3902_v55 = vpop.eup %3901  ;;  %v3834_v34 = vld [vmem:[%s5248_s3 + $0x10] sm:$0xff]  }
 0x3cd   :  { %v1269_v47 = vmul.f32 %v3902_v55, %v4675_v23  ;;  %v5269_v23 = vld [vmem:[#allocation11_spill] sm:$0xff]  ;;  %3630 = vmatpush3.bf16.msra.mxu0 %v3835_v50  ;;  %v3838_v55 = vld [vmem:[%s5247_s2 + $0x10] sm:$0xff]  }
 0x3ce   :  { %v1273_v11 = vpack.c.bf16 %v1268_v52, %v1267_v3  ;;  %3631 = vmatprep.subr.bf16.mxu0 %v3836_v38 }
 0x3cf   :  { %v3904_v12 = vpop.eup %3903 }
 0x3d0   :  { %v1270_v27 = vmul.f32 %v3904_v12, %v4681_v42  ;;  %3625 = vmatprep.mubr.msk.bf16.mxu1 %vm924_vm2, %v1273_v11  ;;  %v5270_v42 = vld [vmem:[#allocation12_spill] sm:$0xff] }
 0x3d1   :  { %3632 = vmatpush3.bf16.msra.mxu0 %v3836_v38 }
 0x3d2   :  { %v1274_v5 = vpack.c.bf16 %v1270_v27, %v1269_v47  ;;  %3669 = vmatprep.subr.bf16.mxu0 %v3837_v46 }
 0x3d4   :  { %3626 = vmatmul.mubr.msk.bf16.vlgmr.msra.gmra.mxu1 %vm924_vm2, %v1274_v5 }
 0x3d5   :  { %3650 = vmatpush3.bf16.msra.mxu1 %v3831_v20  ;;  %3653 = vmatprep.mubr.msk.bf16.mxu1 %vm176_vm0, %v4142_v16 }
 0x3d6   :  { %3651 = vmatprep.subr.bf16.mxu1 %v3832_v35 }
 0x3d9   :  { %3652 = vmatpush3.bf16.msra.mxu1 %v3832_v35 }
 0x3da   :  { %3689 = vmatprep.subr.bf16.mxu1 %v3833_v45 }
 0x3dc   :  { %3654 = vmatmul.mubr.msk.bf16.vlgmr.msra.gmra.mxu1 %vm176_vm0, %v4148_v21 }
 0x3dd   :  { %3657 = vmatprep.mubr.msk.bf16.mxu1 %vm176_vm0, %v4157_v26  ;;  %3690 = vmatpush3.bf16.msra.mxu1 %v3833_v45 }
 0x3de   :  { %3691 = vmatprep.subr.bf16.mxu1 %v3834_v34 }
 0x3e1   :  { %3692 = vmatpush3.bf16.msra.mxu1 %v3834_v34 }
 0x3e4   :  { %3658 = vmatmul.mubr.msk.bf16.gmra.mxu1 %vm176_vm0, %v4163_v30 }
 0x3e5   :  { %3661 = vmatprep.mubr.msk.bf16.mxu1 %vm176_vm0, %v4165_v31 }
 0x3ec   :  { %3662 = vmatmul.mubr.msk.bf16.gmra.mxu1 %vm176_vm0, %v5269_v23 }
 0x3ed   :  { %3665 = vmatprep.mubr.msk.bf16.mxu1 %vm176_vm0, %v5270_v42 }
 0x3f4   :  { %3666 = vmatmul.mubr.msk.bf16.gmra.mxu1 %vm176_vm0, %v5271_v63 }
 0x3f5   :  { %3693 = vmatprep.mubr.msk.bf16.mxu1 %vm176_vm0, %v4142_v16 }
 0x3fc   :  { %3694 = vmatmul.mubr.msk.bf16.vlgmr.msra.gmra.mxu1 %vm176_vm0, %v4148_v21 }
 0x3fd   :  { %3697 = vmatprep.mubr.msk.bf16.mxu1 %vm176_vm0, %v4157_v26 }
 0x404   :  { %3698 = vmatmul.mubr.msk.bf16.gmra.mxu1 %vm176_vm0, %v4163_v30 }
 0x405   :  { %3701 = vmatprep.mubr.msk.bf16.mxu1 %vm176_vm0, %v4165_v31 }
 0x40c   :  { %3702 = vmatmul.mubr.msk.bf16.gmra.mxu1 %vm176_vm0, %v5269_v23 }
 0x40d   :  { %3705 = vmatprep.mubr.msk.bf16.mxu1 %vm176_vm0, %v5270_v42 }
 0x414   :  { %3706 = vmatmul.mubr.msk.bf16.gmra.mxu1 %vm176_vm0, %v5271_v63 }
 0x47c   :  { %v3591_v41 = vpop.f32.mrf.mxu1 }
 0x47d   :  { %v1354_v10 = vadd.f32 3.0, %v3591_v41 }
 0x47e   :  { %v1063_v29 = vpop.f32.mrf.mxu1 }
 0x47f   :  { %v1352_v51 = vadd.f32 3.0, %v1063_v29  ;;  %v1370_v53 = vmax.f32 %v1354_v10, 0.0 }
 0x480   :  { %v3592_v43 = vpop.f32.mrf.mxu1 }
 0x481   :  { %v1368_v33 = vmax.f32 %v1352_v51, 0.0  ;;  %v1355_v60 = vadd.f32 3.0, %v3592_v43  ;;  %v1386_v17 = vmin.f32 %v1370_v53, 6.0 }
 0x482   :  { %v1066_v0 = vpop.f32.mrf.mxu1 }
 0x483   :  { %v1384_v37 = vmin.f32 %v1368_v33, 6.0  ;;  %v1371_v61 = vmax.f32 %v1355_v60, 0.0  ;;  %v1353_v15 = vadd.f32 3.0, %v1066_v0  ;;  %v1402_v18 = vmul.f32 %v3591_v41, %v1386_v17 }
 0x484   :  { %v3595_v22 = vpop.f32.mrf.mxu1 }
 0x485   :  { %v1387_v48 = vmin.f32 %v1371_v61, 6.0  ;;  %v1369_v59 = vmax.f32 %v1353_v15, 0.0  ;;  %v1358_v4 = vadd.f32 3.0, %v3595_v22  ;;  %v1400_v36 = vmul.f32 %v1384_v37, %v1063_v29 }
 0x486   :  { %v1079_v7 = vpop.f32.mrf.mxu1  ;;  %v1418_v9 = vmul.f32 0.16666667, %v1402_v18 }
 0x487   :  { %v1403_v13 = vmul.f32 %v3592_v43, %v1387_v48  ;;  %v1385_v49 = vmin.f32 %v1369_v59, 6.0  ;;  %v1356_v2 = vadd.f32 3.0, %v1079_v7  ;;  %v1374_v8 = vmax.f32 %v1358_v4, 0.0 }
 0x488   :  { %v3596_v25 = vpop.f32.mrf.mxu1  ;;  %v1416_v28 = vmul.f32 0.16666667, %v1400_v36 }
 0x489   :  { %v1401_v58 = vmul.f32 %v1385_v49, %v1066_v0  ;;  %v1372_v54 = vmax.f32 %v1356_v2, 0.0  ;;  %v1359_v1 = vadd.f32 3.0, %v3596_v25  ;;  %v1419_v62 = vmul.f32 0.16666667, %v1403_v13 }
 0x48a   :  { %v1082_v32 = vpop.f32.mrf.mxu1  ;;  %v1390_v19 = vmin.f32 %v1374_v8, 6.0 }
 0x48b   :  { %v1417_v14 = vmul.f32 0.16666667, %v1401_v58  ;;  %v1375_v24 = vmax.f32 %v1359_v1, 0.0  ;;  %v1388_v40 = vmin.f32 %v1372_v54, 6.0  ;;  %v1357_v20 = vadd.f32 3.0, %v1082_v32 }
 0x48c   :  { %v3623_v44 = vpop.f32.mrf.mxu0  ;;  %v1433_v6 = vpack.c.bf16 %v1419_v62, %v1418_v9  ;;  %v1406_v35 = vmul.f32 %v3595_v22, %v1390_v19  ;;  %v4773_v54 = vld [vmem:[%s5249_s4 + $0x1] ss:$0 sm:$0xff] }
 0x48d   :  { %v1432_v57 = vpack.c.bf16 %v1417_v14, %v1416_v28  ;;  %v1391_v56 = vmin.f32 %v1375_v24, 6.0  ;;  %v1362_v39 = vadd.f32 3.0, %v3623_v44  ;;  %v1373_v3 = vmax.f32 %v1357_v20, 0.0 }
 0x48e   :  { %v1321_v52 = vpop.f32.mrf.mxu0  ;;  %v1404_v47 = vmul.f32 %v1388_v40, %v1079_v7  ;;  %v1422_v0 = vmul.f32 0.16666667, %v1406_v35 }
 0x48f   :  { %v1407_v11 = vmul.f32 %v3596_v25, %v1391_v56  ;;  %v1360_v12 = vadd.f32 3.0, %v1321_v52  ;;  %3633 = vmatprep.mubr.msk.bf16.mxu0 %vm176_vm0, %v1432_v57  ;;  %v1389_v27 = vmin.f32 %v1373_v3, 6.0  ;;  %v1378_v45 = vmax.f32 %v1362_v39, 0.0 }
 0x490   :  { %v3624_v5 = vpop.f32.mrf.mxu0  ;;  %3634 = vmatmul.mubr.msk.bf16.vlgmr.msra.gmra.mxu0 %vm176_vm0, %v1433_v6  ;;  %v1420_v51 = vmul.f32 0.16666667, %v1404_v47 }
 0x491   :  { %v1376_v34 = vmax.f32 %v1360_v12, 0.0  ;;  %v1363_v50 = vadd.f32 3.0, %v3624_v5  ;;  %3670 = vmatpush3.bf16.msra.mxu0 %v3837_v46  ;;  %v1405_v38 = vmul.f32 %v1389_v27, %v1082_v32  ;;  %v1423_v10 = vmul.f32 0.16666667, %v1407_v11 }
 0x492   :  { %v1324_v41 = vpop.f32.mrf.mxu0  ;;  %3671 = vmatprep.subr.bf16.mxu0 %v3838_v55  ;;  %v1394_v37 = vmin.f32 %v1378_v45, 6.0 }
 0x493   :  { %v1379_v29 = vmax.f32 %v1363_v50, 0.0  ;;  %v1421_v53 = vmul.f32 0.16666667, %v1405_v38  ;;  %v1392_v43 = vmin.f32 %v1376_v34, 6.0  ;;  %v1361_v33 = vadd.f32 3.0, %v1324_v41 }
 0x494   :  { %v3627_v60 = vpop.f32.mrf.mxu1  ;;  %v1435_v59 = vpack.c.bf16 %v1423_v10, %v1422_v0  ;;  %v1410_v49 = vmul.f32 %v3623_v44, %v1394_v37 }
 0x495   :  { %v1395_v61 = vmin.f32 %v1379_v29, 6.0  ;;  %v1366_v15 = vadd.f32 3.0, %v3627_v60  ;;  %3672 = vmatpush3.bf16.msra.mxu0 %v3838_v55  ;;  %v1434_v17 = vpack.c.bf16 %v1421_v53, %v1420_v51  ;;  %v1377_v22 = vmax.f32 %v1361_v33, 0.0 }
 0x496   :  { %v1337_v48 = vpop.f32.mrf.mxu1  ;;  %v1408_v7 = vmul.f32 %v1392_v43, %v1321_v52  ;;  %v1426_v40 = vmul.f32 0.16666667, %v1410_v49 }
 0x497   :  { %v1411_v46 = vmul.f32 %v3624_v5, %v1395_v61  ;;  %v1364_v4 = vadd.f32 3.0, %v1337_v48  ;;  %v1393_v36 = vmin.f32 %v1377_v22, 6.0  ;;  %3637 = vmatprep.mubr.msk.bf16.mxu0 %vm176_vm0, %v1434_v17  ;;  %v1382_v2 = vmax.f32 %v1366_v15, 0.0 }
 0x498   :  { %v3628_v13 = vpop.f32.mrf.mxu1  ;;  %3638 = vmatmul.mubr.msk.bf16.gmra.mxu0 %vm176_vm0, %v1435_v59  ;;  %v1424_v32 = vmul.f32 0.16666667, %v1408_v7 }
 0x499   :  { %v1380_v18 = vmax.f32 %v1364_v4, 0.0  ;;  %v1367_v25 = vadd.f32 3.0, %v3628_v13  ;;  %v1409_v58 = vmul.f32 %v1393_v36, %v1324_v41  ;;  %v1427_v1 = vmul.f32 0.16666667, %v1411_v46 }
 0x49a   :  { %v1340_v8 = vpop.f32.mrf.mxu1  ;;  %v1398_v20 = vmin.f32 %v1382_v2, 6.0 }
 0x49b   :  { %v1383_v62 = vmax.f32 %v1367_v25, 0.0  ;;  %v1425_v28 = vmul.f32 0.16666667, %v1409_v58  ;;  %v1396_v14 = vmin.f32 %v1380_v18, 6.0  ;;  %v1365_v24 = vadd.f32 3.0, %v1340_v8 }
 0x49c   :  { %v3655_v9 = vpop.f32.mrf.mxu1  ;;  %v1437_v6 = vpack.c.bf16 %v1427_v1, %v1426_v40  ;;  %v1414_v47 = vmul.f32 %v3627_v60, %v1398_v20 }
 0x49d   :  { %v1399_v44 = vmin.f32 %v1383_v62, 6.0  ;;  %v1661_v57 = vadd.f32 %v3655_v9, %v4773_v54  ;;  %v1436_v19 = vpack.c.bf16 %v1425_v28, %v1424_v32  ;;  %v1381_v56 = vmax.f32 %v1365_v24, 0.0 }
 0x49e   :  { %v1652_v39 = vpop.f32.mrf.mxu1  ;;  %v1412_v55 = vmul.f32 %v1396_v14, %v1337_v48  ;;  %v1430_v51 = vmul.f32 0.16666667, %v1414_v47 }
 0x49f   :  { %v1415_v3 = vmul.f32 %v3628_v13, %v1399_v44  ;;  %v1717_v52 = vadd.f32 3.0, %v1661_v57  ;;  %v1397_v11 = vmin.f32 %v1381_v56, 6.0  ;;  %3641 = vmatprep.mubr.msk.bf16.mxu0 %vm176_vm0, %v1436_v19  ;;  %v4781_v61 = vadd.f32 %v4773_v54, %v1652_v39 }
 0x4a0   :  { %v3656_v12 = vpop.f32.mrf.mxu1  ;;  %3642 = vmatmul.mubr.msk.bf16.gmra.mxu0 %vm176_vm0, %v1437_v6  ;;  %v1428_v41 = vmul.f32 0.16666667, %v1412_v55 }
 0x4a1   :  { %v1733_v27 = vmax.f32 %v1717_v52, 0.0  ;;  %v1664_v5 = vadd.f32 %v3656_v12, %v4773_v54  ;;  %v1413_v35 = vmul.f32 %v1397_v11, %v1340_v8  ;;  %v1431_v34 = vmul.f32 0.16666667, %v1415_v3 }
 0x4a2   :  { %v1655_v45 = vpop.f32.mrf.mxu1  ;;  %v1715_v2 = vadd.f32 3.0, %v4781_v61 }
 0x4a3   :  { %v1749_v50 = vmin.f32 %v1733_v27, 6.0  ;;  %v1718_v38 = vadd.f32 3.0, %v1664_v5  ;;  %v1429_v10 = vmul.f32 0.16666667, %v1413_v35  ;;  %v1439_v37 = vpack.c.bf16 %v1431_v34, %v1430_v51 }
 0x4a4   :  { %v3659_v29 = vpop.f32.mrf.mxu1  ;;  %v4784_v22 = vadd.f32 %v4773_v54, %v1655_v45 }
 0x4a5   :  { %v1765_v53 = vmul.f32 %v1749_v50, %v1661_v57  ;;  %v1734_v43 = vmax.f32 %v1718_v38, 0.0  ;;  %v1677_v33 = vadd.f32 %v3659_v29, %v4773_v54  ;;  %v1438_v0 = vpack.c.bf16 %v1429_v10, %v1428_v41 }
 0x4a6   :  { %v1668_v60 = vpop.f32.mrf.mxu1  ;;  %v1716_v8 = vadd.f32 3.0, %v4784_v22  ;;  %v1731_v57 = vmax.f32 %v1715_v2, 0.0 }
 0x4a7   :  { %v1750_v15 = vmin.f32 %v1734_v43, 6.0  ;;  %v1721_v17 = vadd.f32 3.0, %v1677_v33  ;;  %v1669_v48 = vadd.f32 %v4773_v54, %v1668_v60  ;;  %3645 = vmatprep.mubr.msk.bf16.mxu0 %vm176_vm0, %v1438_v0  ;;  %v1781_v46 = vmul.f32 0.16666667, %v1765_v53 }
 0x4a8   :  { %v3660_v59 = vpop.f32.mrf.mxu1  ;;  %3646 = vmatmul.mubr.msk.bf16.gmra.mxu0 %vm176_vm0, %v1439_v37  ;;  %v1732_v6 = vmax.f32 %v1716_v8, 0.0  ;;  %v1747_v51 = vmin.f32 %v1731_v57, 6.0 }
 0x4a9   :  { %v1766_v4 = vmul.f32 %v1750_v15, %v1664_v5  ;;  %v1737_v7 = vmax.f32 %v1721_v17, 0.0  ;;  %v1719_v36 = vadd.f32 3.0, %v1669_v48  ;;  %v1680_v13 = vadd.f32 %v3660_v59, %v4773_v54  ;;  %3673 = vmatprep.mubr.msk.bf16.mxu0 %vm176_vm0, %v4142_v16 }
 0x4aa   :  { %v1671_v49 = vpop.f32.mrf.mxu1  ;;  %v4795_v28 = vmul.f32 0.25, %v1781_v46  ;;  %v1748_v53 = vmin.f32 %v1732_v6, 6.0  ;;  %v1763_v6 = vmul.f32 %v1747_v51, %v4781_v61 }
 0x4ab   :  { %v1782_v18 = vmul.f32 0.16666667, %v1766_v4  ;;  %v1753_v25 = vmin.f32 %v1737_v7, 6.0  ;;  %v1672_v58 = vadd.f32 %v4773_v54, %v1671_v49  ;;  %v1735_v1 = vmax.f32 %v1719_v36, 0.0 }
 0x4ac   :  { %v1722_v62 = vadd.f32 3.0, %v1680_v13  ;;  %v3663_v32 = vpop.f32.mrf.mxu1  ;;  %v1779_v51 = vmul.f32 0.16666667, %v1763_v6 }
 0x4ad   :  { %v4797_v14 = vmul.f32 0.25, %v1782_v18  ;;  %v1720_v24 = vadd.f32 3.0, %v1672_v58  ;;  %v1693_v9 = vadd.f32 %v3663_v32, %v4773_v54  ;;  %v1769_v16 = vmul.f32 %v1753_v25, %v1677_v33 }
 0x4ae   :  { %v1751_v40 = vmin.f32 %v1735_v1, 6.0  ;;  %v1738_v20 = vmax.f32 %v1722_v62, 0.0  ;;  %v1684_v44 = vpop.f32.mrf.mxu1 }
 0x4af   :  { %v1736_v56 = vmax.f32 %v1720_v24, 0.0  ;;  %v1725_v39 = vadd.f32 3.0, %v1693_v9  ;;  %v1685_v55 = vadd.f32 %v4773_v54, %v1684_v44  ;;  %v1785_v5 = vmul.f32 0.16666667, %v1769_v16 }
 0x4b0   :  { %v1767_v3 = vmul.f32 %v1751_v40, %v1669_v48  ;;  %v1754_v52 = vmin.f32 %v1738_v20, 6.0  ;;  %v3664_v11 = vpop.f32.mrf.mxu1  ;;  %3674 = vmatmul.mubr.msk.bf16.vlgmr.msra.gmra.mxu0 %vm176_vm0, %v4148_v21  ;;  %v1764_v24 = vmul.f32 %v1748_v53, %v4784_v22 }
 0x4b1   :  { %v1752_v12 = vmin.f32 %v1736_v56, 6.0  ;;  %v1741_v47 = vmax.f32 %v1725_v39, 0.0  ;;  %v1696_v27 = vadd.f32 %v3664_v11, %v4773_v54  ;;  %v1723_v34 = vadd.f32 3.0, %v1685_v55  ;;  %3677 = vmatprep.mubr.msk.bf16.mxu0 %vm176_vm0, %v4157_v26 }
 0x4b2   :  { %v1783_v35 = vmul.f32 0.16666667, %v1767_v3  ;;  %v1770_v45 = vmul.f32 %v1754_v52, %v1680_v13  ;;  %v1687_v50 = vpop.f32.mrf.mxu1  ;;  %v4809_v17 = vmul.f32 0.25, %v1785_v5 }
 0x4b3   :  { %v1768_v38 = vmul.f32 %v1752_v12, %v1672_v58  ;;  %v1757_v41 = vmin.f32 %v1741_v47, 6.0  ;;  %v1726_v10 = vadd.f32 3.0, %v1696_v27  ;;  %v1688_v29 = vadd.f32 %v4773_v54, %v1687_v50 }
 0x4b4   :  { %v1786_v43 = vmul.f32 0.16666667, %v1770_v45  ;;  %v1739_v33 = vmax.f32 %v1723_v34, 0.0  ;;  %v3667_v0 = vpop.f32.mrf.mxu1  ;;  %v4814_v4 = vmul.f32 0.25, %v1783_v35 }
 0x4b5   :  { %v1784_v60 = vmul.f32 0.16666667, %v1768_v38  ;;  %v1773_v21 = vmul.f32 %v1757_v41, %v1693_v9  ;;  %v1742_v37 = vmax.f32 %v1726_v10, 0.0  ;;  %v1724_v15 = vadd.f32 3.0, %v1688_v29 }
 0x4b6   :  { %v4811_v48 = vmul.f32 0.25, %v1786_v43  ;;  %v1755_v26 = vmin.f32 %v1739_v33, 6.0  ;;  %v1709_v59 = vadd.f32 %v3667_v0, %v4773_v54  ;;  %v1700_v46 = vpop.f32.mrf.mxu1 }
 0x4b7   :  { %v4816_v7 = vmul.f32 0.25, %v1784_v60  ;;  %v1758_v36 = vmin.f32 %v1742_v37, 6.0  ;;  %v1740_v13 = vmax.f32 %v1724_v15, 0.0  ;;  %v1701_v25 = vadd.f32 %v4773_v54, %v1700_v46 }
 0x4b8   :  { %v1771_v2 = vmul.f32 %v1755_v26, %v1685_v55  ;;  %v1729_v18 = vadd.f32 3.0, %v1709_v59  ;;  %v3668_v58 = vpop.f32.mrf.mxu1  ;;  %v1789_v1 = vmul.f32 0.16666667, %v1773_v21  ;;  %3678 = vmatmul.mubr.msk.bf16.gmra.mxu0 %vm176_vm0, %v4163_v30 }
 0x4b9   :  { %v1774_v62 = vmul.f32 %v1758_v36, %v1696_v27  ;;  %v1756_v32 = vmin.f32 %v1740_v13, 6.0  ;;  %v1727_v16 = vadd.f32 3.0, %v1701_v25  ;;  %v1712_v40 = vadd.f32 %v3668_v58, %v4773_v54  ;;  %3681 = vmatprep.mubr.msk.bf16.mxu0 %vm176_vm0, %v4165_v31 }
 0x4ba   :  { %v1745_v9 = vmax.f32 %v1729_v18, 0.0  ;;  %v1703_v20 = vpop.f32.mrf.mxu1  ;;  %v1787_v44 = vmul.f32 0.16666667, %v1771_v2  ;;  %v4831_v22 = vmul.f32 0.25, %v1789_v1  ;;  %v1780_v27 = vmul.f32 0.16666667, %v1764_v24 }
 0x4bb   :  { %v1790_v57 = vmul.f32 0.16666667, %v1774_v62  ;;  %v1772_v56 = vmul.f32 %v1756_v32, %v1688_v29  ;;  %v1704_v39 = vadd.f32 %v4773_v54, %v1703_v20  ;;  %v1743_v52 = vmax.f32 %v1727_v16, 0.0  ;;  %v4838_v54 = vld [vmem:[%s5251_s6 + $0x1] ss:$0 sm:$0xff] }
 0x4bc   :  { %v1761_v3 = vmin.f32 %v1745_v9, 6.0  ;;  %v1730_v30 = vadd.f32 3.0, %v1712_v40  ;;  %v3695_v55 = vpop.f32.mrf.mxu1  ;;  %v4840_v45 = vmul.f32 0.25, %v1787_v44  ;;  %v2200_v15 = vmul.f32 0.25, %v1780_v27 }
 0x4bd   :  { %v4833_v11 = vmul.f32 0.25, %v1790_v57  ;;  %v1788_v12 = vmul.f32 0.16666667, %v1772_v56  ;;  %v1728_v47 = vadd.f32 3.0, %v1704_v39  ;;  %v1759_v5 = vmin.f32 %v1743_v52, 6.0 }
 0x4be   :  { %v1777_v31 = vmul.f32 %v1761_v3, %v1709_v59  ;;  %v1746_v35 = vmax.f32 %v1730_v30, 0.0  ;;  %v2056_v61 = vpop.f32.mrf.mxu1  ;;  %v4849_v33 = vadd.f32 %v3695_v55, %v4838_v54  ;;  %v2199_v2 = vmul.f32 0.25, %v1779_v51 }
 0x4bf   :  { %v4844_v50 = vmul.f32 0.25, %v1788_v12  ;;  %v1744_v38 = vmax.f32 %v1728_v47, 0.0  ;;  %v1775_v41 = vmul.f32 %v1759_v5, %v1701_v25  ;;  %v4863_v25 = vadd.f32 %v4838_v54, %v2056_v61 }
 0x4c0   :  { %v1762_v10 = vmin.f32 %v1746_v35, 6.0  ;;  %v3696_v29 = vpop.f32.mrf.mxu1  ;;  %3682 = vmatmul.mubr.msk.bf16.gmra.mxu0 %vm176_vm0, %v5269_v23  ;;  %v1793_v0 = vmul.f32 0.16666667, %v1777_v31  ;;  %v2121_v23 = vadd.f32 3.0, %v4849_v33  ;;  %v2215_v24 = vpack.c.bf16 %v2200_v15, %v2199_v2 }
 0x4c1   :  { %v1760_v43 = vmin.f32 %v1744_v38, 6.0  ;;  %v4854_v21 = vadd.f32 %v3696_v29, %v4838_v54  ;;  %3685 = vmatprep.mubr.msk.bf16.mxu0 %vm176_vm0, %v5270_v42  ;;  %v1791_v26 = vmul.f32 0.16666667, %v1775_v41  ;;  %v2119_v52 = vadd.f32 3.0, %v4863_v25 }
 0x4c2   :  { %v1778_v60 = vmul.f32 %v1762_v10, %v1712_v40  ;;  %v2059_v37 = vpop.f32.mrf.mxu1  ;;  %v4865_v58 = vmul.f32 0.25, %v1793_v0  ;;  %v2137_v6 = vmax.f32 %v2121_v23, 0.0 }
 0x4c3   :  { %v1776_v59 = vmul.f32 %v1760_v43, %v1704_v39  ;;  %v4859_v36 = vadd.f32 %v4838_v54, %v2059_v37  ;;  %v2122_v42 = vadd.f32 3.0, %v4854_v21  ;;  %v4871_v9 = vmul.f32 0.25, %v1791_v26 }
 0x4c4   :  { %v1794_v46 = vmul.f32 0.16666667, %v1778_v60  ;;  %v3699_v13 = vpop.f32.mrf.mxu1  ;;  %v2153_v29 = vmin.f32 %v2137_v6, 6.0  ;;  %v2135_v51 = vmax.f32 %v2119_v52, 0.0 }
 0x4c5   :  { %v1792_v18 = vmul.f32 0.16666667, %v1776_v59  ;;  %v2081_v62 = vadd.f32 %v3699_v13, %v4838_v54  ;;  %v2120_v20 = vadd.f32 3.0, %v4859_v36  ;;  %v2138_v30 = vmax.f32 %v2122_v42, 0.0 }
 0x4c6   :  { %v4867_v1 = vmul.f32 0.25, %v1794_v46  ;;  %v2072_v32 = vpop.f32.mrf.mxu1 }
 0x4c7   :  { %v4873_v16 = vmul.f32 0.25, %v1792_v18  ;;  %v2125_v44 = vadd.f32 3.0, %v2081_v62  ;;  %v2073_v57 = vadd.f32 %v4838_v54, %v2072_v32  ;;  %v2136_v5 = vmax.f32 %v2120_v20, 0.0 }
 0x4c8   :  { %v3700_v56 = vpop.f32.mrf.mxu1  ;;  %3686 = vmatmul.mubr.msk.bf16.gmra.mxu0 %vm176_vm0, %v5271_v63  ;;  %v2154_v43 = vmin.f32 %v2138_v30, 6.0  ;;  %v2169_v20 = vmul.f32 %v2153_v29, %v4849_v33 }
 0x4c9   :  { %v2084_v3 = vadd.f32 %v3700_v56, %v4838_v54  ;;  %v2141_v55 = vmax.f32 %v2125_v44, 0.0  ;;  %v2123_v12 = vadd.f32 3.0, %v2073_v57  ;;  %3717 = vmatprep.mubr.msk.bf16.mxu0 %vm834_vm1, %v2215_v24  ;;  %v2152_v46 = vmin.f32 %v2136_v5, 6.0 }
 0x4ca   :  { %v2075_v47 = vpop.f32.mrf.mxu1  ;;  %v2151_v44 = vmin.f32 %v2135_v51, 6.0  ;;  %v2170_v52 = vmul.f32 %v2154_v43, %v4854_v21  ;;  %v2185_v51 = vmul.f32 0.16666667, %v2169_v20 }
 0x4cb   :  { %v2126_v27 = vadd.f32 3.0, %v2084_v3  ;;  %v2076_v31 = vadd.f32 %v4838_v54, %v2075_v47  ;;  %v2157_v35 = vmin.f32 %v2141_v55, 6.0  ;;  %v2139_v61 = vmax.f32 %v2123_v12, 0.0 }
 0x4cc   :  { %v3703_v38 = vpop.f32.mrf.mxu1  ;;  %v2168_v5 = vmul.f32 %v2152_v46, %v4859_v36  ;;  %v2167_v46 = vmul.f32 %v2151_v44, %v4863_v25 }
 0x4cd   :  { %v2142_v41 = vmax.f32 %v2126_v27, 0.0  ;;  %v2124_v10 = vadd.f32 3.0, %v2076_v31  ;;  %v2097_v63 = vadd.f32 %v3703_v38, %v4838_v54  ;;  %v2155_v0 = vmin.f32 %v2139_v61, 6.0 }
 0x4ce   :  { %v2088_v60 = vpop.f32.mrf.mxu1  ;;  %v2173_v13 = vmul.f32 %v2157_v35, %v2081_v62 }
 0x4cf   :  { %v2158_v37 = vmin.f32 %v2142_v41, 6.0  ;;  %v2140_v15 = vmax.f32 %v2124_v10, 0.0  ;;  %v2129_v26 = vadd.f32 3.0, %v2097_v63  ;;  %v2089_v59 = vadd.f32 %v4838_v54, %v2088_v60 }
 0x4d0   :  { %v2171_v2 = vmul.f32 %v2155_v0, %v2073_v57  ;;  %v3704_v18 = vpop.f32.mrf.mxu1  ;;  %v2189_v47 = vmul.f32 0.16666667, %v2173_v13 }
 0x4d1   :  { %v2174_v23 = vmul.f32 %v2158_v37, %v2084_v3  ;;  %v2156_v42 = vmin.f32 %v2140_v15, 6.0  ;;  %v2145_v32 = vmax.f32 %v2129_v26, 0.0  ;;  %v2127_v24 = vadd.f32 3.0, %v2089_v59 }
 0x4d2   :  { %v2100_v56 = vadd.f32 %v3704_v18, %v4838_v54  ;;  %v2091_v6 = vpop.f32.mrf.mxu1  ;;  %v2187_v35 = vmul.f32 0.16666667, %v2171_v2 }
 0x4d3   :  { %v2190_v30 = vmul.f32 0.16666667, %v2174_v23  ;;  %v2172_v55 = vmul.f32 %v2156_v42, %v2076_v31  ;;  %v2143_v12 = vmax.f32 %v2127_v24, 0.0  ;;  %v2161_v27 = vmin.f32 %v2145_v32, 6.0 }
 0x4d4   :  { %v2130_v62 = vadd.f32 3.0, %v2100_v56  ;;  %v2092_v57 = vadd.f32 %v4838_v54, %v2091_v6  ;;  %v3707_v3 = vpop.f32.mrf.mxu1  ;;  %v2186_v31 = vmul.f32 0.16666667, %v2170_v52  ;;  %v2184_v23 = vmul.f32 0.16666667, %v2168_v5 }
 0x4d5   :  { %v2188_v61 = vmul.f32 0.16666667, %v2172_v55  ;;  %v2113_v33 = vadd.f32 %v3707_v3, %v4838_v54  ;;  %v2159_v38 = vmin.f32 %v2143_v12, 6.0  ;;  %v2234_v21 = vpack.c.bf16 %v2190_v30, %v2189_v47 }
 0x4d6   :  { %v2146_v41 = vmax.f32 %v2130_v62, 0.0  ;;  %v2128_v10 = vadd.f32 3.0, %v2092_v57  ;;  %v2104_v29 = vpop.f32.mrf.mxu1  ;;  %v2177_v60 = vmul.f32 %v2161_v27, %v2097_v63  ;;  %v2232_v25 = vpack.c.bf16 %v2186_v31, %v2185_v51 }
 0x4d7   :  { %v2133_v43 = vadd.f32 3.0, %v2113_v33  ;;  %v2105_v0 = vadd.f32 %v4838_v54, %v2104_v29  ;;  %3725 = vmatprep.subr.bf16.mxu1 %v2234_v21  ;;  %v2233_v36 = vpack.c.bf16 %v2188_v61, %v2187_v35  ;;  %v2175_v42 = vmul.f32 %v2159_v38, %v2089_v59 }
 0x4d8   :  { %v2162_v37 = vmin.f32 %v2146_v41, 6.0  ;;  %v2144_v15 = vmax.f32 %v2128_v10, 0.0  ;;  %v3708_v26 = vpop.f32.mrf.mxu1  ;;  %3726 = vmatpush3.bf16.msra.mxu1 %v2234_v21  ;;  %v2193_v55 = vmul.f32 0.16666667, %v2177_v60  ;;  %v2183_v3 = vmul.f32 0.16666667, %v2167_v46 }
 0x4d9   :  { %v2149_v13 = vmax.f32 %v2133_v43, 0.0  ;;  %v2131_v2 = vadd.f32 3.0, %v2105_v0  ;;  %v2116_v18 = vadd.f32 %v3708_v26, %v4838_v54  ;;  %3727 = vmatprep.subr.bf16.mxu1 %v2233_v36  ;;  %v2191_v5 = vmul.f32 0.16666667, %v2175_v42 }
 0x4da   :  { %v2178_v32 = vmul.f32 %v2162_v37, %v2100_v56  ;;  %v2160_v24 = vmin.f32 %v2144_v15, 6.0  ;;  %v2107_v20 = vpop.f32.mrf.mxu1  ;;  %v2231_v41 = vpack.c.bf16 %v2184_v23, %v2183_v3 }
 0x4db   :  { %v2165_v6 = vmin.f32 %v2149_v13, 6.0  ;;  %v2147_v63 = vmax.f32 %v2131_v2, 0.0  ;;  %v2134_v52 = vadd.f32 3.0, %v2116_v18  ;;  %v2108_v30 = vadd.f32 %v4838_v54, %v2107_v20 }
 0x4dc   :  { %v2194_v12 = vmul.f32 0.16666667, %v2178_v32  ;;  %v2176_v47 = vmul.f32 %v2160_v24, %v2092_v57  ;;  %3728 = vmatpush3.bf16.msra.mxu1 %v2233_v36 }
 0x4dd   :  { %v2163_v44 = vmin.f32 %v2147_v63, 6.0  ;;  %v2150_v27 = vmax.f32 %v2134_v52, 0.0  ;;  %v2132_v62 = vadd.f32 3.0, %v2108_v30  ;;  %3729 = vmatprep.subr.bf16.mxu1 %v2232_v25  ;;  %v2181_v35 = vmul.f32 %v2165_v6, %v2113_v33 }
 0x4de   :  { %v2192_v59 = vmul.f32 0.16666667, %v2176_v47  ;;  %v4899_v56 = vpack.c.bf16 %v2194_v12, %v2193_v55 }
 0x4df   :  { %v2166_v61 = vmin.f32 %v2150_v27, 6.0  ;;  %v2148_v38 = vmax.f32 %v2132_v62, 0.0  ;;  %v2179_v54 = vmul.f32 %v2163_v44, %v2105_v0  ;;  %v2197_v21 = vmul.f32 0.16666667, %v2181_v35  ;;  %v4943_v44 = vld [vmem:[%s5250_s5 + $0x1] ss:$0 sm:$0xff] }
 0x4e0   :  { %v4901_v10 = vpack.c.bf16 %v2192_v59, %v2191_v5  ;;  %3730 = vmatpush3.bf16.msra.mxu1 %v2232_v25 }
 0x4e1   :  { %v2182_v29 = vmul.f32 %v2166_v61, %v2116_v18  ;;  %v2164_v57 = vmin.f32 %v2148_v38, 6.0  ;;  %3731 = vmatprep.subr.bf16.mxu1 %v2231_v41  ;;  %v2195_v43 = vmul.f32 0.16666667, %v2179_v54 }
 0x4e3   :  { %v2198_v51 = vmul.f32 0.16666667, %v2182_v29  ;;  %v2180_v31 = vmul.f32 %v2164_v57, %v2108_v30 }
 0x4e4   :  { %3732 = vmatpush3.bf16.msra.mxu1 %v2231_v41 }
 0x4e5   :  { %v2196_v60 = vmul.f32 0.16666667, %v2180_v31  ;;  %v4903_v37 = vpack.c.bf16 %v2198_v51, %v2197_v21 }
 0x4e7   :  { %3757 = vmatprep.subr.bf16.mxu1 %v4903_v37  ;;  %v4906_v33 = vpack.c.bf16 %v2196_v60, %v2195_v43 }
 0x550   :  { %v4908_v15 = vpop.f32.mrf.mxu0 }
 0x552   :  { %v4910_v26 = vpop.f32.mrf.mxu0 }
 0x554   :  { %v4912_v0 = vpop.f32.mrf.mxu0 }
 0x556   :  { %v4914_v36 = vpop.f32.mrf.mxu0 }
 0x558   :  { %v4916_v46 = vpop.f32.mrf.mxu0 }
 0x55a   :  { %v4918_v13 = vpop.f32.mrf.mxu0 }
 0x55c   :  { %v4920_v2 = vpop.f32.mrf.mxu0 }
 0x55e   :  { %v4922_v18 = vpop.f32.mrf.mxu0 }
 0x560   :  { %v4924_v23 = vpop.f32.mrf.mxu0 }
 0x562   :  { %v4926_v42 = vpop.f32.mrf.mxu0 }
 0x564   :  { %v4928_v32 = vpop.f32.mrf.mxu0 }
 0x565   :  { %5272 = vst [vmem:[#allocation11_spill] sm:$0xff] %v4928_v32 }
 0x566   :  { %v4930_v24 = vpop.f32.mrf.mxu0 }
 0x567   :  { %5273 = vst [vmem:[#allocation12_spill] sm:$0xff] %v4930_v24 }
 0x568   :  { %v4932_v20 = vpop.f32.mrf.mxu0 }
 0x569   :  { %5274 = vst [vmem:[#allocation13_spill] sm:$0xff] %v4932_v20 }
 0x56a   :  { %v4934_v6 = vpop.f32.mrf.mxu0 }
 0x56b   :  { %5275 = vst [vmem:[#allocation14_spill] sm:$0xff] %v4934_v6 }
 0x56c   :  { %v4936_v63 = vpop.f32.mrf.mxu0 }
 0x56d   :  { %5276 = vst [vmem:[#allocation15_spill] sm:$0xff] %v4936_v63 }
 0x56e   :  { %v4938_v52 = vpop.f32.mrf.mxu0 }
 0x56f   :  { %5277 = vst [vmem:[#allocation16_spill] sm:$0xff] %v4938_v52 }
 0x570   :  { %v3675_v30 = vpop.f32.mrf.mxu0 }
 0x571   :  { %v1863_v38 = vadd.f32 %v3675_v30, %v4943_v44 }
 0x572   :  { %v1854_v55 = vpop.f32.mrf.mxu0 }
 0x573   :  { %v1919_v40 = vadd.f32 3.0, %v1863_v38 }
 0x574   :  { %v3676_v12 = vpop.f32.mrf.mxu0 }
 0x575   :  { %v1866_v3 = vadd.f32 %v3676_v12, %v4943_v44  ;;  %v1935_v19 = vmax.f32 %v1919_v40, 0.0 }
 0x576   :  { %v1857_v47 = vpop.f32.mrf.mxu0 }
 0x577   :  { %v1920_v51 = vadd.f32 3.0, %v1866_v3 }
 0x578   :  { %v3679_v25 = vpop.f32.mrf.mxu0 }
 0x579   :  { %v1879_v27 = vadd.f32 %v3679_v25, %v4943_v44  ;;  %v1936_v53 = vmax.f32 %v1920_v51, 0.0  ;;  %v1951_v51 = vmin.f32 %v1935_v19, 6.0 }
 0x57a   :  { %v1870_v62 = vpop.f32.mrf.mxu0 }
 0x57b   :  { %v1923_v5 = vadd.f32 3.0, %v1879_v27  ;;  %v1871_v59 = vadd.f32 %v4943_v44, %v1870_v62  ;;  %v1952_v6 = vmin.f32 %v1936_v53, 6.0  ;;  %v1967_v53 = vmul.f32 %v1951_v51, %v1863_v38 }
 0x57c   :  { %v3680_v35 = vpop.f32.mrf.mxu0 }
 0x57d   :  { %v1882_v61 = vadd.f32 %v3680_v35, %v4943_v44  ;;  %v1939_v41 = vmax.f32 %v1923_v5, 0.0  ;;  %v1921_v54 = vadd.f32 3.0, %v1871_v59  ;;  %v1858_v35 = vadd.f32 %v4943_v44, %v1857_v47 }
 0x57e   :  { %v1873_v29 = vpop.f32.mrf.mxu0 }
 0x57f   :  { %v1924_v57 = vadd.f32 3.0, %v1882_v61  ;;  %v1874_v21 = vadd.f32 %v4943_v44, %v1873_v29  ;;  %v1955_v31 = vmin.f32 %v1939_v41, 6.0  ;;  %v1937_v43 = vmax.f32 %v1921_v54, 0.0 }
 0x580   :  { %v4951_v60 = vpop.f32.mrf.mxu0  ;;  %v1855_v29 = vadd.f32 %v4943_v44, %v1854_v55 }
 0x581   :  { %v1940_v12 = vmax.f32 %v1924_v57, 0.0  ;;  %v1922_v25 = vadd.f32 3.0, %v1874_v21  ;;  %v1953_v62 = vmin.f32 %v1937_v43, 6.0  ;;  %v1971_v30 = vmul.f32 %v1955_v31, %v1879_v27 }
 0x582   :  { %v4953_v39 = vpop.f32.mrf.mxu0  ;;  %v1918_v57 = vadd.f32 3.0, %v1858_v35  ;;  %v1917_v47 = vadd.f32 3.0, %v1855_v29 }
 0x583   :  { %v1956_v5 = vmin.f32 %v1940_v12, 6.0  ;;  %v1938_v34 = vmax.f32 %v1922_v25, 0.0  ;;  %v1969_v8 = vmul.f32 %v1953_v62, %v1871_v59  ;;  %v1987_v52 = vmul.f32 0.16666667, %v1971_v30 }
 0x584   :  { %v3684_v49 = vpop.f32.mrf.mxu0  ;;  %v1934_v32 = vmax.f32 %v1918_v57, 0.0 }
 0x585   :  { %v1972_v41 = vmul.f32 %v1956_v5, %v1882_v61  ;;  %v1954_v54 = vmin.f32 %v1938_v34, 6.0  ;;  %v1985_v27 = vmul.f32 0.16666667, %v1969_v8  ;;  %v1968_v34 = vmul.f32 %v1952_v6, %v1866_v3 }
 0x586   :  { %v4957_v63 = vpop.f32.mrf.mxu0  ;;  %v1933_v61 = vmax.f32 %v1917_v47, 0.0  ;;  %v1950_v8 = vmin.f32 %v1934_v32, 6.0  ;;  %v1983_v5 = vmul.f32 0.16666667, %v1967_v53 }
 0x587   :  { %v1988_v43 = vmul.f32 0.16666667, %v1972_v41  ;;  %v1970_v20 = vmul.f32 %v1954_v54, %v1874_v21  ;;  %v1984_v19 = vmul.f32 0.16666667, %v1968_v34 }
 0x588   :  { %v3687_v24 = vpop.f32.mrf.mxu0  ;;  %v1966_v6 = vmul.f32 %v1950_v8, %v1858_v35 }
 0x589   :  { %v2226_v31 = vpack.c.bf16 %v1988_v43, %v1987_v52  ;;  %v1986_v12 = vmul.f32 0.16666667, %v1970_v20  ;;  %v1911_v21 = vadd.f32 %v3687_v24, %v4943_v44  ;;  %v1949_v52 = vmin.f32 %v1933_v61, 6.0 }
 0x58a   :  { %v1902_v25 = vpop.f32.mrf.mxu0  ;;  %v2224_v3 = vpack.c.bf16 %v1984_v19, %v1983_v5  ;;  %v1982_v32 = vmul.f32 0.16666667, %v1966_v6 }
 0x58b   :  { %v2225_v55 = vpack.c.bf16 %v1986_v12, %v1985_v27  ;;  %3809 = vmatprep.subr.msk.bf16.mxu0 %vm834_vm1, %v2226_v31  ;;  %v2278_v59 = vsel %vm834_vm1, %v2226_v31, 0  ;;  %v1931_v41 = vadd.f32 3.0, %v1911_v21  ;;  %v1965_v47 = vmul.f32 %v1949_v52, %v1855_v29 }
 0x58c   :  { %v3688_v40 = vpop.f32.mrf.mxu0  ;;  %3710 = vmatpush3.bf16.xpose.msra.mxu0 %v2278_v59  ;;  %v1903_v24 = vadd.f32 %v4943_v44, %v1902_v25  ;;  %v1895_v29 = vadd.f32 %v4951_v60, %v4943_v44 }
 0x58d   :  { %v1914_v62 = vadd.f32 %v3688_v40, %v4943_v44  ;;  %3810 = vmatprep.subr.msk.bf16.mxu0 %vm834_vm1, %v2225_v55  ;;  %v2275_v43 = vsel %vm834_vm1, %v2225_v55, 0  ;;  %v1947_v38 = vmax.f32 %v1931_v41, 0.0  ;;  %v1981_v12 = vmul.f32 0.16666667, %v1965_v47 }
 0x58e   :  { %v1905_v30 = vpop.f32.mrf.mxu0  ;;  %v1929_v34 = vadd.f32 3.0, %v1903_v24  ;;  %v1898_v40 = vadd.f32 %v3684_v49, %v4943_v44  ;;  %v2272_v55 = vsel %vm834_vm1, %v2224_v3, 0  ;;  %v1927_v52 = vadd.f32 3.0, %v1895_v29 }
 0x58f   :  { %v1932_v20 = vadd.f32 3.0, %v1914_v62  ;;  %v1906_v57 = vadd.f32 %v4943_v44, %v1905_v30  ;;  %v1963_v51 = vmin.f32 %v1947_v38, 6.0  ;;  %v2223_v35 = vpack.c.bf16 %v1982_v32, %v1981_v12 }
 0x590   :  { %v1945_v53 = vmax.f32 %v1929_v34, 0.0  ;;  %v1928_v8 = vadd.f32 3.0, %v1898_v40  ;;  %v1890_v41 = vadd.f32 %v4943_v44, %v4957_v63  ;;  %v1943_v60 = vmax.f32 %v1927_v52, 0.0  ;;  %v3358_v52 = vld [vmem:[#allocation2 + $0x28] sm:$0xff]  }
 0x591   :  { %v1948_v54 = vmax.f32 %v1932_v20, 0.0  ;;  %v1930_v31 = vadd.f32 3.0, %v1906_v57  ;;  %v1979_v25 = vmul.f32 %v1963_v51, %v1911_v21  ;;  %v2269_v49 = vsel %vm834_vm1, %v2223_v35, 0 }
 0x592   :  { %v1961_v5 = vmin.f32 %v1945_v53, 6.0  ;;  %v1887_v21 = vadd.f32 %v4943_v44, %v4953_v39  ;;  %v1926_v47 = vadd.f32 3.0, %v1890_v41  ;;  %v1959_v32 = vmin.f32 %v1943_v60, 6.0 }
 0x593   :  { %v1964_v27 = vmin.f32 %v1948_v54, 6.0  ;;  %v1946_v61 = vmax.f32 %v1930_v31, 0.0  ;;  %v1995_v30 = vmul.f32 0.16666667, %v1979_v25  ;;  %v5278_v63 = vpack.c.bf16 %v4797_v14, %v4795_v28 }
 0x594   :  { %3712 = vmatpush3.bf16.xpose.msra.mxu0 %v2275_v43  ;;  %v1977_v54 = vmul.f32 %v1961_v5, %v1903_v24  ;;  %v1942_v51 = vmax.f32 %v1926_v47, 0.0  ;;  %v5279_v39 = vpack.c.bf16 %v4816_v7, %v4814_v4  ;;  %v1975_v44 = vmul.f32 %v1959_v32, %v1895_v29 }
 0x595   :  { %3811 = vmatprep.subr.msk.bf16.mxu0 %vm834_vm1, %v2224_v3  ;;  %v1980_v59 = vmul.f32 %v1964_v27, %v1914_v62  ;;  %v1962_v20 = vmin.f32 %v1946_v61, 6.0  ;;  %v1944_v62 = vmax.f32 %v1928_v8, 0.0  ;;  %v1925_v27 = vadd.f32 3.0, %v1887_v21 }
 0x596   :  { %v1993_v31 = vmul.f32 0.16666667, %v1977_v54  ;;  %v5280_v14 = vpack.c.bf16 %v4811_v48, %v4809_v17  ;;  %v5281_v7 = vpack.c.bf16 %v4844_v50, %v4840_v45  ;;  %v5282_v48 = vpack.c.bf16 %v4833_v11, %v4831_v22 }
 0x597   :  { %v1996_v19 = vmul.f32 0.16666667, %v1980_v59  ;;  %v1978_v3 = vmul.f32 %v1962_v20, %v1906_v57  ;;  %v1960_v43 = vmin.f32 %v1944_v62, 6.0  ;;  %v1941_v24 = vmax.f32 %v1925_v27, 0.0  ;;  %v3340_v20 = vld [vmem:[#allocation2 + $0x20] sm:$0xff]  }
 0x598   :  { %v1991_v59 = vmul.f32 0.16666667, %v1975_v44  ;;  %v5283_v45 = vpack.c.bf16 %v4873_v16, %v4871_v9  ;;  %v5284_v50 = vpack.c.bf16 %v4867_v1, %v4865_v58  ;;  %v3342_v22 = vunpack.c.h.bf16 %v3340_v20  ;;  %v3360_v1 = vld [vmem:[#allocation2 + $0x38] sm:$0xff]  }
 0x599   :  { %v2230_v6 = vpack.c.bf16 %v1996_v19, %v1995_v30  ;;  %v1994_v38 = vmul.f32 0.16666667, %v1978_v3  ;;  %v1976_v12 = vmul.f32 %v1960_v43, %v1898_v40  ;;  %v1958_v40 = vmin.f32 %v1942_v51, 6.0 }
 0x59a   :  { %v1957_v61 = vmin.f32 %v1941_v24, 6.0  ;;  %v3341_v30 = vunpack.c.l.bf16 %v3340_v20  ;;  %v3346_v9 = vunpack.c.h.bf16 %v3358_v52  ;;  %v3353_v47 = vunpack.c.l.bf16 %v3360_v1 }
 0x59b   :  { %v2229_v34 = vpack.c.bf16 %v1994_v38, %v1993_v31  ;;  %v2536_v57 = vsel %vm834_vm1, %v2230_v6, 0  ;;  %v1974_v28 = vmul.f32 %v1958_v40, %v1890_v41 }
 0x59c   :  { %3714 = vmatpush3.bf16.xpose.msra.mxu0 %v2272_v55  ;;  %v1973_v29 = vmul.f32 %v1957_v61, %v1887_v21 }
 0x59d   :  { %3812 = vmatprep.subr.msk.bf16.mxu0 %vm834_vm1, %v2223_v35  ;;  %v1992_v35 = vmul.f32 0.16666667, %v1976_v12  ;;  %v2533_v4 = vsel %vm834_vm1, %v2229_v34, 0  ;;  %v1990_v25 = vmul.f32 0.16666667, %v1974_v28 }
 0x59e   :  { %v1989_v53 = vmul.f32 0.16666667, %v1973_v29 }
 0x59f   :  { %v2228_v55 = vpack.c.bf16 %v1992_v35, %v1991_v59 }
 0x5a0   :  { %v2227_v8 = vpack.c.bf16 %v1990_v25, %v1989_v53 }
 0x5a1   :  { %v2530_v19 = vsel %vm834_vm1, %v2228_v55, 0 }
 0x5a2   :  { %v2527_v17 = vsel %vm834_vm1, %v2227_v8, 0 }
 0x5a4   :  { %3716 = vmatpush3.bf16.xpose.msra.mxu0 %v2269_v49  ;;  %v3345_v49 = vunpack.c.l.bf16 %v3358_v52 }
 0x5a5   :  { %3813 = vmatprep.subr.msk.bf16.mxu0 %vm834_vm1, %v2230_v6  ;;  %v3359_v6 = vld [vmem:[#allocation2 + $0x30] sm:$0xff]  }
 0x5a6   :  { %v3349_v21 = vunpack.c.l.bf16 %v3359_v6  ;;  %v3350_v12 = vunpack.c.h.bf16 %v3359_v6 }
 0x5ab   :  { %3718 = vmatmul.mubr.msk.bf16.vlgmr.msra.gmra.mxu0 %vm834_vm1, %v5278_v63  ;;  %v3354_v63 = vunpack.c.h.bf16 %v3360_v1 }
 0x5ac   :  { %3721 = vmatprep.mubr.msk.bf16.mxu0 %vm834_vm1, %v5279_v39  ;;  %3742 = vmatpush3.bf16.xpose.msra.mxu0 %v2536_v57 }
 0x5ad   :  { %3814 = vmatprep.subr.msk.bf16.mxu0 %vm834_vm1, %v2229_v34 }
 0x5b3   :  { %3722 = vmatmul.mubr.msk.bf16.gmra.mxu0 %vm834_vm1, %v5280_v14 }
 0x5b4   :  { %3744 = vmatpush3.bf16.xpose.msra.mxu0 %v2533_v4  ;;  %3749 = vmatprep.mubr.msk.bf16.mxu0 %vm834_vm1, %v5281_v7 }
 0x5b5   :  { %3815 = vmatprep.subr.msk.bf16.mxu0 %vm834_vm1, %v2228_v55 }
 0x5bc   :  { %3746 = vmatpush3.bf16.xpose.msra.mxu0 %v2530_v19 }
 0x5bd   :  { %3816 = vmatprep.subr.msk.bf16.mxu0 %vm834_vm1, %v2227_v8 }
 0x5c4   :  { %3748 = vmatpush3.bf16.xpose.msra.mxu0 %v2527_v17 }
 0x5cb   :  { %3750 = vmatmul.mubr.msk.bf16.vlgmr.msra.gmra.mxu0 %vm834_vm1, %v5282_v48 }
 0x5cc   :  { %3753 = vmatprep.mubr.msk.bf16.mxu0 %vm834_vm1, %v5283_v45 }
 0x5d3   :  { %3754 = vmatmul.mubr.msk.bf16.gmra.mxu0 %vm834_vm1, %v5284_v50 }
 0x66b   :  { %v3719_v5 = vpop.f32.mrf.mxu0 }
 0x66c   :  { %v5016_v3 = vadd.f32 %v3719_v5, %v3345_v49 }
 0x66d   :  { %v2314_v62 = vpop.f32.mrf.mxu0 }
 0x66e   :  { %v5014_v41 = vadd.f32 %v3341_v30, %v2314_v62  ;;  %v2351_v32 = vsel %vm924_vm2, %v5016_v3, -inf }
 0x66f   :  { %v3720_v11 = vpop.f32.mrf.mxu0 }
 0x670   :  { %v2345_v16 = vsel %vm924_vm2, %v5014_v41, -inf  ;;  %v5022_v43 = vadd.f32 %v3720_v11, %v3346_v9 }
 0x671   :  { %v2317_v58 = vpop.f32.mrf.mxu0  ;;  %2346 = vmax.xlane.f32.xlu0 %v2345_v16 }
 0x672   :  { %v5020_v60 = vadd.f32 %v3342_v22, %v2317_v58  ;;  %v2354_v57 = vsel %vm924_vm2, %v5022_v43, -inf }
 0x673   :  { %v3723_v54 = vpop.f32.mrf.mxu0 }
 0x674   :  { %v2348_v38 = vsel %vm924_vm2, %v5020_v60, -inf  ;;  %v5030_v34 = vadd.f32 %v3723_v54, %v3353_v47 }
 0x675   :  { %v2330_v27 = vpop.f32.mrf.mxu0  ;;  %2349 = vmax.xlane.f32.xlu1 %v2348_v38  ;;  %2352 = vmax.xlane.f32.xlu0 %v2351_v32 }
 0x676   :  { %v5028_v31 = vadd.f32 %v3349_v21, %v2330_v27  ;;  %v2363_v59 = vsel %vm924_vm2, %v5030_v34, -inf }
 0x677   :  { %v3724_v51 = vpop.f32.mrf.mxu0 }
 0x678   :  { %v2357_v39 = vsel %vm924_vm2, %v5028_v31, -inf  ;;  %v5038_v35 = vadd.f32 %v3724_v51, %v3354_v63 }
 0x679   :  { %v2333_v44 = vpop.f32.mrf.mxu0  ;;  %2355 = vmax.xlane.f32.xlu1 %v2354_v57  ;;  %2358 = vmax.xlane.f32.xlu0 %v2357_v39 }
 0x67a   :  { %v5036_v24 = vadd.f32 %v3350_v12, %v2333_v44  ;;  %v2366_v61 = vsel %vm924_vm2, %v5038_v35, -inf }
 0x67c   :  { %v2360_v40 = vsel %vm924_vm2, %v5036_v24, -inf }
 0x67d   :  { %2361 = vmax.xlane.f32.xlu1 %v2360_v40  ;;  %2364 = vmax.xlane.f32.xlu0 %v2363_v59 }
 0x681   :  { %2367 = vmax.xlane.f32.xlu1 %v2366_v61 }
 0x68b   :  { %v3751_v55 = vpop.f32.mrf.mxu0 }
 0x68c   :  { %v5048_v7 = vadd.f32 %v3751_v55, %v3345_v49 }
 0x68d   :  { %v2572_v28 = vpop.f32.mrf.mxu0 }
 0x68e   :  { %v5046_v14 = vadd.f32 %v3341_v30, %v2572_v28  ;;  %v2609_v48 = vsel %vm924_vm2, %v5048_v7, -inf }
 0x68f   :  { %v3752_v4 = vpop.f32.mrf.mxu0 }
 0x690   :  { %v2603_v29 = vsel %vm924_vm2, %v5046_v14, -inf  ;;  %v5054_v19 = vadd.f32 %v3752_v4, %v3346_v9 }
 0x691   :  { %v2575_v25 = vpop.f32.mrf.mxu0  ;;  %2604 = vmax.xlane.f32.xlu0 %v2603_v29 }
 0x692   :  { %v5052_v53 = vadd.f32 %v3342_v22, %v2575_v25  ;;  %v2612_v30 = vsel %vm924_vm2, %v5054_v19, -inf }
 0x693   :  { %v3755_v8 = vpop.f32.mrf.mxu0 }
 0x694   :  { %v2606_v17 = vsel %vm924_vm2, %v5052_v53, -inf  ;;  %v5062_v52 = vadd.f32 %v3755_v8, %v3353_v47 }
 0x695   :  { %v2588_v45 = vpop.f32.mrf.mxu0  ;;  %2607 = vmax.xlane.f32.xlu1 %v2606_v17  ;;  %2610 = vmax.xlane.f32.xlu0 %v2609_v48 }
 0x696   :  { %v5060_v50 = vadd.f32 %v3349_v21, %v2588_v45  ;;  %v2621_v6 = vsel %vm924_vm2, %v5062_v52, -inf }
 0x697   :  { %v3756_v20 = vpop.f32.mrf.mxu0 }
 0x698   :  { %v2615_v5 = vsel %vm924_vm2, %v5060_v50, -inf  ;;  %v5070_v22 = vadd.f32 %v3756_v20, %v3354_v63 }
 0x699   :  { %v2591_v49 = vpop.f32.mrf.mxu0  ;;  %2613 = vmax.xlane.f32.xlu1 %v2612_v30  ;;  %2616 = vmax.xlane.f32.xlu0 %v2615_v5 }
 0x69a   :  { %v5068_v62 = vadd.f32 %v3350_v12, %v2591_v49  ;;  %v2624_v9 = vsel %vm924_vm2, %v5070_v22, -inf }
 0x69c   :  { %v2618_v11 = vsel %vm924_vm2, %v5068_v62, -inf }
 0x69d   :  { %2619 = vmax.xlane.f32.xlu1 %v2618_v11  ;;  %2622 = vmax.xlane.f32.xlu0 %v2621_v6 }
 0x6a1   :  { %2625 = vmax.xlane.f32.xlu1 %v2624_v9 }
 0x6fa   :  { %v2347_v16 = vpop.xlane.xlu0 %2346 }
 0x6fb   :  { %v2369_v58 = vsub.f32 %v5014_v41, %v2347_v16 }
 0x6fd   :  { %v2377_v1 = vmul.f32 1.442695, %v2369_v58 }
 0x6fe   :  { %v2350_v21 = vpop.xlane.xlu1 %2349  ;;  %v2353_v54 = vpop.xlane.xlu0 %2352 }
 0x6ff   :  { %3905 = vpow2.f32 %v2377_v1  ;;  %v2370_v47 = vsub.f32 %v5020_v60, %v2350_v21  ;;  %v2371_v38 = vsub.f32 %v5016_v3, %v2353_v54 }
 0x701   :  { %v2379_v32 = vmul.f32 1.442695, %v2370_v47  ;;  %v2381_v27 = vmul.f32 1.442695, %v2371_v38 }
 0x702   :  { %v2356_v12 = vpop.xlane.xlu1 %2355  ;;  %v2359_v51 = vpop.xlane.xlu0 %2358 }
 0x703   :  { %3907 = vpow2.f32 %v2379_v32  ;;  %v2372_v63 = vsub.f32 %v5022_v43, %v2356_v12  ;;  %v2373_v57 = vsub.f32 %v5028_v31, %v2359_v51 }
 0x704   :  { %3909 = vpow2.f32 %v2381_v27 }
 0x705   :  { %v2383_v39 = vmul.f32 1.442695, %v2372_v63  ;;  %v2385_v41 = vmul.f32 1.442695, %v2373_v57 }
 0x706   :  { %v2362_v44 = vpop.xlane.xlu1 %2361  ;;  %v2365_v40 = vpop.xlane.xlu0 %2364 }
 0x707   :  { %3911 = vpow2.f32 %v2383_v39  ;;  %v2374_v59 = vsub.f32 %v5036_v24, %v2362_v44  ;;  %v2375_v60 = vsub.f32 %v5030_v34, %v2365_v40 }
 0x708   :  { %3913 = vpow2.f32 %v2385_v41 }
 0x709   :  { %v2387_v3 = vmul.f32 1.442695, %v2374_v59  ;;  %v2389_v61 = vmul.f32 1.442695, %v2375_v60 }
 0x70a   :  { %v2368_v55 = vpop.xlane.xlu1 %2367 }
 0x70b   :  { %3915 = vpow2.f32 %v2387_v3  ;;  %v2376_v28 = vsub.f32 %v5038_v35, %v2368_v55 }
 0x70c   :  { %v5086_v43 = vpop.eup %3905  ;;  %3917 = vpow2.f32 %v2389_v61 }
 0x70d   :  { %v2391_v31 = vmul.f32 1.442695, %v2376_v28  ;;  %v2393_v4 = vsel %vm924_vm2, %v5086_v43, 0.0 }
 0x70e   :  { %2394 = vadd.xlane.f32.xlu0 %v2393_v4 }
 0x70f   :  { %3919 = vpow2.f32 %v2391_v31 }
 0x710   :  { %v5090_v29 = vpop.eup %3907 }
 0x711   :  { %v5092_v24 = vpop.eup %3909  ;;  %v2396_v34 = vsel %vm924_vm2, %v5090_v29, 0.0 }
 0x712   :  { %2397 = vadd.xlane.f32.xlu1 %v2396_v34  ;;  %v2399_v35 = vsel %vm924_vm2, %v5092_v24, 0.0 }
 0x713   :  { %2400 = vadd.xlane.f32.xlu0 %v2399_v35 }
 0x714   :  { %v5098_v25 = vpop.eup %3911 }
 0x715   :  { %v5100_v8 = vpop.eup %3913  ;;  %v2402_v17 = vsel %vm924_vm2, %v5098_v25, 0.0 }
 0x716   :  { %2403 = vadd.xlane.f32.xlu1 %v2402_v17  ;;  %v2405_v48 = vsel %vm924_vm2, %v5100_v8, 0.0 }
 0x717   :  { %2406 = vadd.xlane.f32.xlu0 %v2405_v48 }
 0x718   :  { %v5106_v45 = vpop.eup %3915 }
 0x719   :  { %v5108_v20 = vpop.eup %3917  ;;  %v2408_v30 = vsel %vm924_vm2, %v5106_v45, 0.0 }
 0x71a   :  { %2409 = vadd.xlane.f32.xlu1 %v2408_v30  ;;  %v2411_v5 = vsel %vm924_vm2, %v5108_v20, 0.0  ;;  %v2605_v49 = vpop.xlane.xlu0 %2604 }
 0x71b   :  { %2412 = vadd.xlane.f32.xlu0 %v2411_v5  ;;  %v2627_v11 = vsub.f32 %v5046_v14, %v2605_v49 }
 0x71c   :  { %v5115_v6 = vpop.eup %3919 }
 0x71d   :  { %v2635_v9 = vmul.f32 1.442695, %v2627_v11  ;;  %v2414_v16 = vsel %vm924_vm2, %v5115_v6, 0.0 }
 0x71e   :  { %2415 = vadd.xlane.f32.xlu1 %v2414_v16  ;;  %v2608_v58 = vpop.xlane.xlu1 %2607  ;;  %v2611_v1 = vpop.xlane.xlu0 %2610 }
 0x71f   :  { %3921 = vpow2.f32 %v2635_v9  ;;  %v2628_v21 = vsub.f32 %v5052_v53, %v2608_v58  ;;  %v2629_v54 = vsub.f32 %v5048_v7, %v2611_v1 }
 0x721   :  { %v2637_v47 = vmul.f32 1.442695, %v2628_v21  ;;  %v2639_v38 = vmul.f32 1.442695, %v2629_v54 }
 0x722   :  { %v2614_v32 = vpop.xlane.xlu1 %2613  ;;  %v2617_v27 = vpop.xlane.xlu0 %2616 }
 0x723   :  { %3923 = vpow2.f32 %v2637_v47  ;;  %v2630_v14 = vsub.f32 %v5054_v19, %v2614_v32  ;;  %v2631_v12 = vsub.f32 %v5060_v50, %v2617_v27 }
 0x724   :  { %3925 = vpow2.f32 %v2639_v38 }
 0x725   :  { %v2641_v51 = vmul.f32 1.442695, %v2630_v14  ;;  %v2643_v63 = vmul.f32 1.442695, %v2631_v12 }
 0x726   :  { %v2620_v57 = vpop.xlane.xlu1 %2619  ;;  %v2623_v39 = vpop.xlane.xlu0 %2622 }
 0x727   :  { %3927 = vpow2.f32 %v2641_v51  ;;  %v2632_v41 = vsub.f32 %v5068_v62, %v2620_v57  ;;  %v2633_v53 = vsub.f32 %v5062_v52, %v2623_v39 }
 0x728   :  { %3929 = vpow2.f32 %v2643_v63 }
 0x729   :  { %v2645_v7 = vmul.f32 1.442695, %v2632_v41  ;;  %v2647_v44 = vmul.f32 1.442695, %v2633_v53 }
 0x72a   :  { %v2626_v40 = vpop.xlane.xlu1 %2625 }
 0x72b   :  { %3931 = vpow2.f32 %v2645_v7  ;;  %v2634_v59 = vsub.f32 %v5070_v22, %v2626_v40 }
 0x72c   :  { %v5126_v19 = vpop.eup %3921  ;;  %3933 = vpow2.f32 %v2647_v44 }
 0x72d   :  { %v2649_v50 = vmul.f32 1.442695, %v2634_v59  ;;  %v2651_v60 = vsel %vm924_vm2, %v5126_v19, 0.0 }
 0x72e   :  { %2652 = vadd.xlane.f32.xlu0 %v2651_v60 }
 0x72f   :  { %3935 = vpow2.f32 %v2649_v50 }
 0x730   :  { %v5130_v3 = vpop.eup %3923 }
 0x731   :  { %v5132_v62 = vpop.eup %3925  ;;  %v2654_v52 = vsel %vm924_vm2, %v5130_v3, 0.0 }
 0x732   :  { %2655 = vadd.xlane.f32.xlu1 %v2654_v52  ;;  %v2657_v22 = vsel %vm924_vm2, %v5132_v62, 0.0 }
 0x733   :  { %2658 = vadd.xlane.f32.xlu0 %v2657_v22 }
 0x734   :  { %v5138_v61 = vpop.eup %3927 }
 0x735   :  { %v5140_v55 = vpop.eup %3929  ;;  %v2660_v28 = vsel %vm924_vm2, %v5138_v61, 0.0 }
 0x736   :  { %2661 = vadd.xlane.f32.xlu1 %v2660_v28  ;;  %v2663_v31 = vsel %vm924_vm2, %v5140_v55, 0.0 }
 0x737   :  { %2664 = vadd.xlane.f32.xlu0 %v2663_v31 }
 0x738   :  { %v5146_v4 = vpop.eup %3931 }
 0x739   :  { %v5148_v34 = vpop.eup %3933  ;;  %v2666_v35 = vsel %vm924_vm2, %v5146_v4, 0.0 }
 0x73a   :  { %2667 = vadd.xlane.f32.xlu1 %v2666_v35  ;;  %v2669_v17 = vsel %vm924_vm2, %v5148_v34, 0.0 }
 0x73b   :  { %2670 = vadd.xlane.f32.xlu0 %v2669_v17 }
 0x73c   :  { %v5154_v48 = vpop.eup %3935 }
 0x73d   :  { %v2672_v30 = vsel %vm924_vm2, %v5154_v48, 0.0 }
 0x73e   :  { %2673 = vadd.xlane.f32.xlu1 %v2672_v30 }
 0x797   :  { %v2395_v5 = vpop.xlane.xlu0 %2394 }
 0x798   :  { %3937 = vrcp.f32 %v2395_v5 }
 0x79b   :  { %v2398_v49 = vpop.xlane.xlu1 %2397 }
 0x79c   :  { %3939 = vrcp.f32 %v2398_v49  ;;  %v2401_v11 = vpop.xlane.xlu0 %2400 }
 0x79d   :  { %3941 = vrcp.f32 %v2401_v11 }
 0x79f   :  { %v2404_v9 = vpop.xlane.xlu1 %2403 }
 0x7a0   :  { %3943 = vrcp.f32 %v2404_v9  ;;  %v2407_v16 = vpop.xlane.xlu0 %2406 }
 0x7a1   :  { %3945 = vrcp.f32 %v2407_v16 }
 0x7a3   :  { %v2410_v58 = vpop.xlane.xlu1 %2409 }
 0x7a4   :  { %3947 = vrcp.f32 %v2410_v58  ;;  %v2413_v1 = vpop.xlane.xlu0 %2412 }
 0x7a5   :  { %3949 = vrcp.f32 %v2413_v1  ;;  %v3938_v21 = vpop.eup %3937  ;;  %v3839_v1 = vld [vmem:[#allocation5 + $0x18] sm:$0xff]  }
 0x7a6   :  { %v2425_v38 = vmul.f32 %v3938_v21, %v5086_v43  ;;  %v3840_v21 = vld [vmem:[#allocation5 + $0x10] sm:$0xff]  }
 0x7a7   :  { %v2416_v54 = vpop.xlane.xlu1 %2415 }
 0x7a8   :  { %3951 = vrcp.f32 %v2416_v54 }
 0x7a9   :  { %v3940_v47 = vpop.eup %3939 }
 0x7aa   :  { %v2426_v32 = vmul.f32 %v3940_v47, %v5090_v29  ;;  %v3942_v27 = vpop.eup %3941 }
 0x7ab   :  { %v2427_v51 = vmul.f32 %v3942_v27, %v5092_v24 }
 0x7ac   :  { %v2433_v14 = vpack.c.bf16 %v2426_v32, %v2425_v38 }
 0x7ad   :  { %v3944_v12 = vpop.eup %3943 }
 0x7ae   :  { %v2428_v63 = vmul.f32 %v3944_v12, %v5098_v25  ;;  %3733 = vmatprep.mubr.msk.bf16.mxu1 %vm924_vm2, %v2433_v14  ;;  %v3946_v57 = vpop.eup %3945 }
 0x7af   :  { %v2429_v53 = vmul.f32 %v3946_v57, %v5100_v8 }
 0x7b0   :  { %v2434_v39 = vpack.c.bf16 %v2428_v63, %v2427_v51 }
 0x7b1   :  { %v3948_v41 = vpop.eup %3947 }
 0x7b2   :  { %3734 = vmatmul.mubr.msk.bf16.vlgmr.msra.gmra.mxu1 %vm924_vm2, %v2434_v39  ;;  %v2430_v43 = vmul.f32 %v3948_v41, %v5106_v45  ;;  %v3950_v7 = vpop.eup %3949 }
 0x7b3   :  { %3758 = vmatpush3.bf16.msra.mxu1 %v4903_v37  ;;  %v2431_v25 = vmul.f32 %v3950_v7, %v5108_v20 }
 0x7b4   :  { %3759 = vmatprep.subr.bf16.mxu1 %v4906_v33  ;;  %v2435_v29 = vpack.c.bf16 %v2430_v43, %v2429_v53 }
 0x7b5   :  { %v3952_v24 = vpop.eup %3951 }
 0x7b6   :  { %3737 = vmatprep.mubr.msk.bf16.mxu1 %vm924_vm2, %v2435_v29  ;;  %v2432_v44 = vmul.f32 %v3952_v24, %v5115_v6 }
 0x7b7   :  { %3760 = vmatpush3.bf16.msra.mxu1 %v4906_v33  ;;  %v2653_v40 = vpop.xlane.xlu0 %2652 }
 0x7b8   :  { %3761 = vmatprep.subr.bf16.mxu1 %v4899_v56  ;;  %v2436_v8 = vpack.c.bf16 %v2432_v44, %v2431_v25  ;;  %3953 = vrcp.f32 %v2653_v40 }
 0x7ba   :  { %3738 = vmatmul.mubr.msk.bf16.gmra.mxu1 %vm924_vm2, %v2436_v8 }
 0x7bb   :  { %3762 = vmatpush3.bf16.msra.mxu1 %v4899_v56  ;;  %v2656_v37 = vpop.xlane.xlu1 %2655 }
 0x7bc   :  { %3955 = vrcp.f32 %v2656_v37  ;;  %3763 = vmatprep.subr.bf16.mxu1 %v4901_v10  ;;  %v2659_v45 = vpop.xlane.xlu0 %2658 }
 0x7bd   :  { %3957 = vrcp.f32 %v2659_v45 }
 0x7bf   :  { %3764 = vmatpush3.bf16.msra.mxu1 %v4901_v10  ;;  %v2662_v20 = vpop.xlane.xlu1 %2661 }
 0x7c0   :  { %3959 = vrcp.f32 %v2662_v20  ;;  %v2665_v33 = vpop.xlane.xlu0 %2664  ;;  %3773 = vmatprep.subr.bf16.mxu1 %v3839_v1 }
 0x7c1   :  { %3961 = vrcp.f32 %v2665_v33 }
 0x7c3   :  { %v2668_v6 = vpop.xlane.xlu1 %2667 }
 0x7c4   :  { %3963 = vrcp.f32 %v2668_v6  ;;  %v2671_v59 = vpop.xlane.xlu0 %2670 }
 0x7c5   :  { %3965 = vrcp.f32 %v2671_v59  ;;  %v3954_v50 = vpop.eup %3953 }
 0x7c6   :  { %v2683_v52 = vmul.f32 %v3954_v50, %v5126_v19 }
 0x7c7   :  { %v2674_v60 = vpop.xlane.xlu1 %2673 }
 0x7c8   :  { %3967 = vrcp.f32 %v2674_v60 }
 0x7c9   :  { %v3956_v56 = vpop.eup %3955 }
 0x7ca   :  { %v2684_v22 = vmul.f32 %v3956_v56, %v5130_v3  ;;  %v3958_v28 = vpop.eup %3957 }
 0x7cb   :  { %v2685_v10 = vmul.f32 %v3958_v28, %v5132_v62 }
 0x7cc   :  { %v2691_v31 = vpack.c.bf16 %v2684_v22, %v2683_v52 }
 0x7cd   :  { %v3960_v35 = vpop.eup %3959 }
 0x7ce   :  { %v2686_v17 = vmul.f32 %v3960_v35, %v5138_v61  ;;  %3765 = vmatprep.mubr.msk.bf16.mxu1 %vm924_vm2, %v2691_v31  ;;  %v3962_v30 = vpop.eup %3961 }
 0x7cf   :  { %v2687_v11 = vmul.f32 %v3962_v30, %v5140_v55 }
 0x7d0   :  { %v2692_v5 = vpack.c.bf16 %v2686_v17, %v2685_v10 }
 0x7d1   :  { %v3964_v49 = vpop.eup %3963 }
 0x7d2   :  { %3766 = vmatmul.mubr.msk.bf16.vlgmr.msra.gmra.mxu1 %vm924_vm2, %v2692_v5  ;;  %v2688_v19 = vmul.f32 %v3964_v49, %v5146_v4  ;;  %v3966_v9 = vpop.eup %3965 }
 0x7d3   :  { %v2689_v62 = vmul.f32 %v3966_v9, %v5148_v34  ;;  %3774 = vmatpush3.bf16.msra.mxu1 %v3839_v1 }
 0x7d4   :  { %v2693_v3 = vpack.c.bf16 %v2688_v19, %v2687_v11  ;;  %3775 = vmatprep.subr.bf16.mxu1 %v3840_v21 }
 0x7d5   :  { %v3968_v16 = vpop.eup %3967 }
 0x7d6   :  { %3769 = vmatprep.mubr.msk.bf16.mxu1 %vm924_vm2, %v2693_v3  ;;  %v2690_v61 = vmul.f32 %v3968_v16, %v5154_v48 }
 0x7d7   :  { %3776 = vmatpush3.bf16.msra.mxu1 %v3840_v21 }
 0x7d8   :  { %v2694_v58 = vpack.c.bf16 %v2690_v61, %v2689_v62 }
 0x7da   :  { %3770 = vmatmul.mubr.msk.bf16.gmra.mxu1 %vm924_vm2, %v2694_v58 }
 0x872   :  { %v3735_v55 = vpop.f32.mrf.mxu1 }
 0x873   :  { %v2774_v4 = vadd.f32 3.0, %v3735_v55 }
 0x874   :  { %v2483_v54 = vpop.f32.mrf.mxu1 }
 0x875   :  { %v2772_v47 = vadd.f32 3.0, %v2483_v54  ;;  %v2790_v38 = vmax.f32 %v2774_v4, 0.0 }
 0x876   :  { %v3736_v32 = vpop.f32.mrf.mxu1 }
 0x877   :  { %v2788_v27 = vmax.f32 %v2772_v47, 0.0  ;;  %v2775_v14 = vadd.f32 3.0, %v3736_v32  ;;  %v2806_v63 = vmin.f32 %v2790_v38, 6.0 }
 0x878   :  { %v2486_v34 = vpop.f32.mrf.mxu1 }
 0x879   :  { %v2804_v12 = vmin.f32 %v2788_v27, 6.0  ;;  %v2791_v48 = vmax.f32 %v2775_v14, 0.0  ;;  %v2773_v51 = vadd.f32 3.0, %v2486_v34  ;;  %v2822_v44 = vmul.f32 %v3735_v55, %v2806_v63 }
 0x87a   :  { %v3739_v57 = vpop.f32.mrf.mxu1 }
 0x87b   :  { %v2807_v39 = vmin.f32 %v2791_v48, 6.0  ;;  %v2789_v41 = vmax.f32 %v2773_v51, 0.0  ;;  %v2778_v53 = vadd.f32 3.0, %v3739_v57  ;;  %v2820_v7 = vmul.f32 %v2804_v12, %v2483_v54 }
 0x87c   :  { %v2499_v43 = vpop.f32.mrf.mxu1  ;;  %v2838_v56 = vmul.f32 0.16666667, %v2822_v44 }
 0x87d   :  { %v2823_v29 = vmul.f32 %v3736_v32, %v2807_v39  ;;  %v2805_v24 = vmin.f32 %v2789_v41, 6.0  ;;  %v2776_v25 = vadd.f32 3.0, %v2499_v43  ;;  %v2794_v37 = vmax.f32 %v2778_v53, 0.0 }
 0x87e   :  { %v3740_v40 = vpop.f32.mrf.mxu1  ;;  %v2836_v59 = vmul.f32 0.16666667, %v2820_v7 }
 0x87f   :  { %v2821_v8 = vmul.f32 %v2805_v24, %v2486_v34  ;;  %v2792_v45 = vmax.f32 %v2776_v25, 0.0  ;;  %v2779_v20 = vadd.f32 3.0, %v3740_v40  ;;  %v2839_v33 = vmul.f32 0.16666667, %v2823_v29 }
 0x880   :  { %v2502_v6 = vpop.f32.mrf.mxu1  ;;  %v2810_v31 = vmin.f32 %v2794_v37, 6.0 }
 0x881   :  { %v2837_v50 = vmul.f32 0.16666667, %v2821_v8  ;;  %v2795_v60 = vmax.f32 %v2779_v20, 0.0  ;;  %v2808_v52 = vmin.f32 %v2792_v45, 6.0  ;;  %v2777_v22 = vadd.f32 3.0, %v2502_v6 }
 0x882   :  { %v2853_v10 = vpack.c.bf16 %v2839_v33, %v2838_v56  ;;  %v2826_v11 = vmul.f32 %v3739_v57, %v2810_v31 }
 0x883   :  { %v2852_v28 = vpack.c.bf16 %v2837_v50, %v2836_v59  ;;  %v2811_v35 = vmin.f32 %v2795_v60, 6.0  ;;  %v2793_v17 = vmax.f32 %v2777_v22, 0.0  ;;  %v2824_v5 = vmul.f32 %v2808_v52, %v2499_v43 }
 0x884   :  { %v2842_v62 = vmul.f32 0.16666667, %v2826_v11 }
 0x885   :  { %v2827_v30 = vmul.f32 %v3740_v40, %v2811_v35  ;;  %3777 = vmatprep.mubr.msk.bf16.mxu1 %vm176_vm0, %v2852_v28  ;;  %v2809_v49 = vmin.f32 %v2793_v17, 6.0  ;;  %v2840_v3 = vmul.f32 0.16666667, %v2824_v5 }
 0x886   :  { %3778 = vmatmul.mubr.msk.bf16.vlgmr.msra.gmra.mxu1 %vm176_vm0, %v2853_v10 }
 0x887   :  { %v2825_v19 = vmul.f32 %v2809_v49, %v2502_v6  ;;  %v2843_v9 = vmul.f32 0.16666667, %v2827_v30 }
 0x889   :  { %v2841_v16 = vmul.f32 0.16666667, %v2825_v19  ;;  %v2855_v58 = vpack.c.bf16 %v2843_v9, %v2842_v62 }
 0x88b   :  { %v2854_v61 = vpack.c.bf16 %v2841_v16, %v2840_v3 }
 0x88d   :  { %3781 = vmatprep.mubr.msk.bf16.mxu1 %vm176_vm0, %v2854_v61  ;;  %v5200_v61 = vld [vmem:[%s5254_s9] ss:$0 sm:$0xff]  ;;  %s4039_s9 = smov [#allocation7]  }
 0x88e   :  { %3782 = vmatmul.mubr.msk.bf16.gmra.mxu1 %vm176_vm0, %v2855_v58  ;;  %v1579_v58 = vadd.f32 %v4908_v15, %v5200_v61  ;;  %s3172_s27 = sshll.u32 %s4039_s9, 4  ;;  %s3173_s27 = int_to_ptr.vmem [resolvable:$true] %s3172_s27 }
 0x88f   :  { %s4009_s0 = scalar_lea.vmem %s3173_s27, 1024  ;;  %p4014_p11 = scmp.lt.s32.totalorder %s3173_s27, %s3173_s27 }
 0x890   :  { %p4010_p10 = scmp.ne.s32.totalorder %s3173_s27, %s4009_s0  ;;  %p4015_p12 = scmp.lt.s32.totalorder %s4009_s0, %s4009_s0 }
 0x892   :  { %v3767_v1 = vpop.f32.mrf.mxu1  ;;  %p4016_p13 = por %p4015_p12, %p4014_p11 }
 0x893   :  { %v2782_v21 = vadd.f32 3.0, %v3767_v1 }
 0x894   :  { %v2741_v55 = vpop.f32.mrf.mxu1  ;;  %p4017_p0 = pnand %p4016_p13, %p4010_p10 }
 0x895   :  { %v2780_v4 = vadd.f32 3.0, %v2741_v55  ;;  %v2798_v54 = vmax.f32 %v2782_v21, 0.0  ;;  %v1577_v21 = vadd.f32 %v5200_v61, %v4910_v26 }
 0x896   :  { %v3768_v47 = vpop.f32.mrf.mxu1 }
 0x897   :  { %v2796_v38 = vmax.f32 %v2780_v4, 0.0  ;;  %v2783_v32 = vadd.f32 3.0, %v3768_v47  ;;  %v2814_v48 = vmin.f32 %v2798_v54, 6.0  ;;  %v1580_v54 = vadd.f32 %v4912_v0, %v5200_v61 }
 0x898   :  { %v2744_v27 = vpop.f32.mrf.mxu1 }
 0x899   :  { %v2812_v14 = vmin.f32 %v2796_v38, 6.0  ;;  %v2799_v34 = vmax.f32 %v2783_v32, 0.0  ;;  %v2781_v12 = vadd.f32 3.0, %v2744_v27  ;;  %v2830_v24 = vmul.f32 %v3767_v1, %v2814_v48 }
 0x89a   :  { %v3771_v51 = vpop.f32.mrf.mxu1 }
 0x89b   :  { %v2815_v63 = vmin.f32 %v2799_v34, 6.0  ;;  %v2797_v57 = vmax.f32 %v2781_v12, 0.0  ;;  %v2786_v39 = vadd.f32 3.0, %v3771_v51  ;;  %v2828_v53 = vmul.f32 %v2812_v14, %v2741_v55 }
 0x89c   :  { %v2757_v41 = vpop.f32.mrf.mxu1  ;;  %v2846_v50 = vmul.f32 0.16666667, %v2830_v24 }
 0x89d   :  { %v2831_v43 = vmul.f32 %v3768_v47, %v2815_v63  ;;  %v2813_v7 = vmin.f32 %v2797_v57, 6.0  ;;  %v2784_v29 = vadd.f32 3.0, %v2757_v41  ;;  %v2802_v40 = vmax.f32 %v2786_v39, 0.0 }
 0x89e   :  { %v3772_v25 = vpop.f32.mrf.mxu1  ;;  %v2844_v33 = vmul.f32 0.16666667, %v2828_v53 }
 0x89f   :  { %v2829_v44 = vmul.f32 %v2813_v7, %v2744_v27  ;;  %v2800_v8 = vmax.f32 %v2784_v29, 0.0  ;;  %v2787_v37 = vadd.f32 3.0, %v3772_v25  ;;  %v2847_v45 = vmul.f32 0.16666667, %v2831_v43 }
 0x8a0   :  { %v2760_v20 = vpop.f32.mrf.mxu1  ;;  %v2818_v22 = vmin.f32 %v2802_v40, 6.0  ;;  %v1578_v27 = vadd.f32 %v5200_v61, %v4914_v36  ;;  %v1583_v40 = vadd.f32 %v4916_v46, %v5200_v61 }
 0x8a1   :  { %v2845_v6 = vmul.f32 0.16666667, %v2829_v44  ;;  %v2803_v59 = vmax.f32 %v2787_v37, 0.0  ;;  %v2816_v60 = vmin.f32 %v2800_v8, 6.0  ;;  %v2785_v56 = vadd.f32 3.0, %v2760_v20 }
 0x8a2   :  { %v2857_v31 = vpack.c.bf16 %v2847_v45, %v2846_v50  ;;  %v2834_v5 = vmul.f32 %v3771_v51, %v2818_v22  ;;  %v1582_v8 = vadd.f32 %v5200_v61, %v4922_v18 }
 0x8a3   :  { %v2856_v52 = vpack.c.bf16 %v2845_v6, %v2844_v33  ;;  %v2819_v28 = vmin.f32 %v2803_v59, 6.0  ;;  %v2801_v35 = vmax.f32 %v2785_v56, 0.0  ;;  %v2832_v17 = vmul.f32 %v2816_v60, %v2757_v41 }
 0x8a4   :  { %v2850_v3 = vmul.f32 0.16666667, %v2834_v5  ;;  %v1581_v41 = vadd.f32 %v5200_v61, %v4918_v13 }
 0x8a5   :  { %v2835_v10 = vmul.f32 %v3772_v25, %v2819_v28  ;;  %3785 = vmatprep.mubr.msk.bf16.mxu1 %vm176_vm0, %v2856_v52  ;;  %v2817_v30 = vmin.f32 %v2801_v35, 6.0  ;;  %v2848_v19 = vmul.f32 0.16666667, %v2832_v17  ;;  %v1584_v52 = vadd.f32 %v4920_v2, %v5200_v61 }
 0x8a6   :  { %3786 = vmatmul.mubr.msk.bf16.gmra.mxu1 %vm176_vm0, %v2857_v31  ;;  %v1587_v2 = vadd.f32 %v4924_v23, %v5200_v61 }
 0x8a7   :  { %v2833_v49 = vmul.f32 %v2817_v30, %v2760_v20  ;;  %v2851_v11 = vmul.f32 0.16666667, %v2835_v10 }
 0x8a9   :  { %v2849_v9 = vmul.f32 0.16666667, %v2833_v49  ;;  %v2859_v62 = vpack.c.bf16 %v2851_v11, %v2850_v3 }
 0x8ab   :  { %v2858_v16 = vpack.c.bf16 %v2849_v9, %v2848_v19 }
 0x8ad   :  { %3789 = vmatprep.mubr.msk.bf16.mxu1 %vm176_vm0, %v2858_v16  ;;  %v1585_v16 = vadd.f32 %v5200_v61, %v4926_v42 }
 0x8ae   :  { %3790 = vmatmul.mubr.msk.bf16.gmra.mxu1 %vm176_vm0, %v2859_v62 }
 0x946   :  { %v3779_v1 = vpop.f32.mrf.mxu1 }
 0x947   :  { %v3000_v55 = vadd.f32 %v3779_v1, %v1579_v58 }
 0x948   :  { %v2935_v4 = vpop.f32.mrf.mxu1 }
 0x949   :  { %v2998_v47 = vadd.f32 %v2935_v4, %v1577_v21  ;;  %v3016_v38 = vadd.f32 3.0, %v3000_v55 }
 0x94a   :  { %v3780_v32 = vpop.f32.mrf.mxu1 }
 0x94b   :  { %v3014_v14 = vadd.f32 3.0, %v2998_v47  ;;  %v3001_v34 = vadd.f32 %v3780_v32, %v1580_v54  ;;  %v3032_v51 = vmax.f32 %v3016_v38, 0.0  ;;  %v5285_v54 = vld [vmem:[#allocation11_spill] sm:$0xff]  ;;  %v5286_v32 = vld [vmem:[#allocation12_spill] sm:$0xff] }
 0x94c   :  { %v2938_v12 = vpop.f32.mrf.mxu1 }
 0x94d   :  { %v3030_v48 = vmax.f32 %v3014_v14, 0.0  ;;  %v2999_v15 = vadd.f32 %v2938_v12, %v1578_v27  ;;  %v3017_v57 = vadd.f32 3.0, %v3001_v34  ;;  %v3048_v7 = vmin.f32 %v3032_v51, 6.0 }
 0x94e   :  { %v3783_v39 = vpop.f32.mrf.mxu1  ;;  %v1586_v27 = vadd.f32 %v5200_v61, %v5286_v32 }
 0x94f   :  { %v3046_v63 = vmin.f32 %v3030_v48, 6.0  ;;  %v3015_v26 = vadd.f32 3.0, %v2999_v15  ;;  %v3033_v36 = vmax.f32 %v3017_v57, 0.0  ;;  %v3064_v13 = vmul.f32 %v3048_v7, %v3000_v55 }
 0x950   :  { %v2951_v43 = vpop.f32.mrf.mxu1  ;;  %v3004_v33 = vadd.f32 %v3783_v39, %v1583_v40 }
 0x951   :  { %v3062_v0 = vmul.f32 %v3046_v63, %v2998_v47  ;;  %v3031_v53 = vmax.f32 %v3015_v26, 0.0  ;;  %v3002_v29 = vadd.f32 %v2951_v43, %v1581_v41  ;;  %v3049_v59 = vmin.f32 %v3033_v36, 6.0  ;;  %v5287_v43 = vld [vmem:[#allocation14_spill] sm:$0xff] }
 0x952   :  { %v3784_v44 = vpop.f32.mrf.mxu1  ;;  %v3080_v22 = vmul.f32 0.16666667, %v3064_v13  ;;  %v3020_v46 = vadd.f32 3.0, %v3004_v33  ;;  %v1588_v47 = vadd.f32 %v5285_v54, %v5200_v61  ;;  %v1589_v7 = vadd.f32 %v5200_v61, %v5287_v43 }
 0x953   :  { %v3078_v24 = vmul.f32 0.16666667, %v3062_v0  ;;  %v3047_v25 = vmin.f32 %v3031_v53, 6.0  ;;  %v3018_v37 = vadd.f32 3.0, %v3002_v29  ;;  %v3065_v28 = vmul.f32 %v3049_v59, %v3001_v34 }
 0x954   :  { %v2954_v20 = vpop.f32.mrf.mxu1  ;;  %v3005_v18 = vadd.f32 %v3784_v44, %v1584_v52  ;;  %v3036_v10 = vmax.f32 %v3020_v46, 0.0 }
 0x955   :  { %v3063_v45 = vmul.f32 %v3047_v25, %v2999_v15  ;;  %3094 = vxpose.xlu0.b32.start [1/8] (short) (narrow) %v3078_v24, 32  ;;  %v3003_v6 = vadd.f32 %v2954_v20, %v1582_v8  ;;  %v3034_v60 = vmax.f32 %v3018_v37, 0.0  ;;  %v3081_v17 = vmul.f32 0.16666667, %v3065_v28  ;;  %v5288_v20 = vld [vmem:[#allocation13_spill] sm:$0xff] }
 0x956   :  { %v3021_v5 = vadd.f32 3.0, %v3005_v18  ;;  %v3052_v11 = vmin.f32 %v3036_v10, 6.0  ;;  %v1591_v13 = vadd.f32 %v5288_v20, %v5200_v61 }
 0x957   :  { %v3079_v50 = vmul.f32 0.16666667, %v3063_v45  ;;  %v3019_v56 = vadd.f32 3.0, %v3003_v6  ;;  %v3050_v31 = vmin.f32 %v3034_v60, 6.0 }
 0x958   :  { %v3037_v9 = vmax.f32 %v3021_v5, 0.0  ;;  %v3068_v58 = vmul.f32 %v3052_v11, %v3004_v33  ;;  %v5289_v33 = vld [vmem:[#allocation16_spill] sm:$0xff] }
 0x959   :  { %3095 = vxpose.xlu0.b32.cont [2/8] (short) (narrow) %v3079_v50, 32  ;;  %v3035_v35 = vmax.f32 %v3019_v56, 0.0  ;;  %v3066_v30 = vmul.f32 %v3050_v31, %v3002_v29 }
 0x95a   :  { %v3053_v1 = vmin.f32 %v3037_v9, 6.0  ;;  %v3084_v34 = vmul.f32 0.16666667, %v3068_v58 }
 0x95b   :  { %v3051_v49 = vmin.f32 %v3035_v35, 6.0  ;;  %v3082_v19 = vmul.f32 0.16666667, %v3066_v30  ;;  %v5290_v35 = vld [vmem:[#allocation15_spill] sm:$0xff] }
 0x95c   :  { %v3069_v12 = vmul.f32 %v3053_v1, %v3005_v18  ;;  %v1592_v10 = vadd.f32 %v5290_v35, %v5200_v61 }
 0x95d   :  { %3096 = vxpose.xlu0.b32.cont [3/8] (short) (narrow) %v3080_v22, 32  ;;  %v3067_v3 = vmul.f32 %v3051_v49, %v3003_v6  ;;  %v1590_v6 = vadd.f32 %v5200_v61, %v5289_v33 }
 0x95e   :  { %v3085_v26 = vmul.f32 0.16666667, %v3069_v12 }
 0x95f   :  { %v3083_v21 = vmul.f32 0.16666667, %v3067_v3 }
 0x961   :  { %3097 = vxpose.xlu0.b32.cont [4/8] (short) (narrow) %v3081_v17, 32 }
 0x965   :  { %3098 = vxpose.xlu0.b32.cont [5/8] (short) (narrow) %v3082_v19, 32 }
 0x966   :  { %v3787_v62 = vpop.f32.mrf.mxu1 }
 0x967   :  { %v3008_v55 = vadd.f32 %v3787_v62, %v1587_v2 }
 0x968   :  { %v2967_v4 = vpop.f32.mrf.mxu1 }
 0x969   :  { %v3006_v38 = vadd.f32 %v2967_v4, %v1585_v16  ;;  %3099 = vxpose.xlu0.b32.cont [6/8] (short) (narrow) %v3083_v21, 32  ;;  %v3024_v14 = vadd.f32 3.0, %v3008_v55 }
 0x96a   :  { %v3788_v23 = vpop.f32.mrf.mxu1 }
 0x96b   :  { %v3022_v48 = vadd.f32 3.0, %v3006_v38  ;;  %v3009_v42 = vadd.f32 %v3788_v23, %v1588_v47  ;;  %v3040_v57 = vmax.f32 %v3024_v14, 0.0 }
 0x96c   :  { %v2970_v15 = vpop.f32.mrf.mxu1 }
 0x96d   :  { %v3038_v51 = vmax.f32 %v3022_v48, 0.0  ;;  %v3007_v63 = vadd.f32 %v2970_v15, %v1586_v27  ;;  %3100 = vxpose.xlu0.b32.cont [7/8] (short) (narrow) %v3084_v34, 32  ;;  %v3025_v41 = vadd.f32 3.0, %v3009_v42  ;;  %v3056_v25 = vmin.f32 %v3040_v57, 6.0 }
 0x96e   :  { %v3791_v53 = vpop.f32.mrf.mxu1 }
 0x96f   :  { %v3054_v39 = vmin.f32 %v3038_v51, 6.0  ;;  %v3023_v0 = vadd.f32 3.0, %v3007_v63  ;;  %v3041_v8 = vmax.f32 %v3025_v41, 0.0  ;;  %v3072_v56 = vmul.f32 %v3056_v25, %v3008_v55 }
 0x970   :  { %v2983_v36 = vpop.f32.mrf.mxu1  ;;  %v3012_v52 = vadd.f32 %v3791_v53, %v1591_v13 }
 0x971   :  { %v3070_v29 = vmul.f32 %v3054_v39, %v3006_v38  ;;  %v3039_v24 = vmax.f32 %v3023_v0, 0.0  ;;  %3101 = vxpose.xlu0.b32.end [8/8] (short) (narrow) %v3085_v26, 32  ;;  %v3010_v44 = vadd.f32 %v2983_v36, %v1589_v7  ;;  %v3057_v46 = vmin.f32 %v3041_v8, 6.0 }
 0x972   :  { %v3792_v45 = vpop.f32.mrf.mxu1  ;;  %v3088_v17 = vmul.f32 0.16666667, %v3072_v56  ;;  %v3028_v30 = vadd.f32 3.0, %v3012_v52 }
 0x973   :  { %v3086_v40 = vmul.f32 0.16666667, %v3070_v29  ;;  %v3055_v37 = vmin.f32 %v3039_v24, 6.0  ;;  %v3026_v59 = vadd.f32 3.0, %v3010_v44  ;;  %v3073_v5 = vmul.f32 %v3057_v46, %v3009_v42 }
 0x974   :  { %v2986_v60 = vpop.f32.mrf.mxu1  ;;  %v3013_v11 = vadd.f32 %v3792_v45, %v1592_v10  ;;  %v3044_v9 = vmax.f32 %v3028_v30, 0.0 }
 0x975   :  { %v3071_v50 = vmul.f32 %v3055_v37, %v3007_v63  ;;  %3130 = vxpose.xlu1.b32.start [1/8] (short) (narrow) %v3086_v40, 32  ;;  %v3011_v22 = vadd.f32 %v2986_v60, %v1590_v6  ;;  %v3042_v31 = vmax.f32 %v3026_v59, 0.0  ;;  %v3089_v3 = vmul.f32 0.16666667, %v3073_v5 }
 0x976   :  { %v3029_v16 = vadd.f32 3.0, %v3013_v11  ;;  %v3060_v58 = vmin.f32 %v3044_v9, 6.0 }
 0x977   :  { %v3087_v28 = vmul.f32 0.16666667, %v3071_v50  ;;  %v3027_v18 = vadd.f32 3.0, %v3011_v22  ;;  %v3058_v49 = vmin.f32 %v3042_v31, 6.0 }
 0x978   :  { %v3045_v21 = vmax.f32 %v3029_v16, 0.0  ;;  %v3076_v61 = vmul.f32 %v3060_v58, %v3012_v52 }
 0x979   :  { %3131 = vxpose.xlu1.b32.cont [2/8] (short) (narrow) %v3087_v28, 32  ;;  %v3043_v19 = vmax.f32 %v3027_v18, 0.0  ;;  %v3074_v2 = vmul.f32 %v3058_v49, %v3010_v44 }
 0x97a   :  { %v3061_v4 = vmin.f32 %v3045_v21, 6.0  ;;  %v3092_v47 = vmul.f32 0.16666667, %v3076_v61 }
 0x97b   :  { %v3059_v62 = vmin.f32 %v3043_v19, 6.0  ;;  %v3090_v1 = vmul.f32 0.16666667, %v3074_v2 }
 0x97c   :  { %v3077_v38 = vmul.f32 %v3061_v4, %v3013_v11 }
 0x97d   :  { %3132 = vxpose.xlu1.b32.cont [3/8] (short) (narrow) %v3088_v17, 32  ;;  %v3075_v55 = vmul.f32 %v3059_v62, %v3011_v22 }
 0x97e   :  { %v3093_v32 = vmul.f32 0.16666667, %v3077_v38 }
 0x97f   :  { %v3091_v54 = vmul.f32 0.16666667, %v3075_v55 }
 0x981   :  { %3133 = vxpose.xlu1.b32.cont [4/8] (short) (narrow) %v3089_v3, 32 }
 0x985   :  { %3134 = vxpose.xlu1.b32.cont [5/8] (short) (narrow) %v3090_v1, 32 }
 0x989   :  { %3135 = vxpose.xlu1.b32.cont [6/8] (short) (narrow) %v3091_v54, 32 }
 0x98d   :  { %3136 = vxpose.xlu1.b32.cont [7/8] (short) (narrow) %v3092_v47, 32 }
 0x991   :  { %3137 = vxpose.xlu1.b32.end [8/8] (short) (narrow) %v3093_v32, 32 }
 0x9d1   :  { %v3110_v27 = vpop.trf.xlu0 }
 0x9d2   :  { %3126 = vst.msk [vmem:[#allocation7] sm:$0xff] %vm924_vm2, %v3110_v27 }
 0x9d5   :  { %v3111_v14 = vpop.trf.xlu0 }
 0x9d6   :  { %3127 = vst.msk [vmem:[#allocation7 + $0x8] sm:$0xff] %vm924_vm2, %v3111_v14 }
 0x9d9   :  { %v3112_v23 = vpop.trf.xlu0 }
 0x9da   :  { %3128 = vst.msk [vmem:[#allocation7 + $0x10] sm:$0xff] %vm924_vm2, %v3112_v23 }
 0x9dd   :  { %v3113_v34 = vpop.trf.xlu0 }
 0x9de   :  { %3129 = vst.msk [vmem:[#allocation7 + $0x18] sm:$0xff] %vm924_vm2, %v3113_v34 }
 0x9f1   :  { %v3146_v12 = vpop.trf.xlu1 }
 0x9f2   :  { %3163 = vst.msk [vmem:[#allocation7 + $0x20] sm:$0xff] %vm924_vm2, %v3146_v12 }
 0x9f5   :  { %v3147_v48 = vpop.trf.xlu1 }
 0x9f6   :  { %3164 = vst.msk [vmem:[#allocation7 + $0x28] sm:$0xff] %vm924_vm2, %v3147_v48 }
 0x9f9   :  { %v3148_v42 = vpop.trf.xlu1 }
 0x9fa   :  { %3165 = vst.msk [vmem:[#allocation7 + $0x30] sm:$0xff] %vm924_vm2, %v3148_v42 }
 0x9fd   :  { %v3149_v15 = vpop.trf.xlu1 }
 0x9fe   :  { %3166 = vst.msk [vmem:[#allocation7 + $0x38] sm:$0xff] %vm924_vm2, %v3149_v15 }
 0x9ff   :  { %4020 = shalt.err (!%p4017_p0)
}
 0xa00   :  { %s4040_s28 = smov 128   ;;  %s4041_s29 = smov 8  }
 0xa01   :  { %3178 = dma.vmem_to_hbm [thread:$0]  %s3173_s27, 1024, %s5255_s10, [#allocation4], %s4040_s28, %s4040_s28, %s4041_s29  }
 0xa02   :  { %4033 = dma.done.wait [#allocation4], 1024  }
 0xa03   :  { %4034 = vsyncadd [#allocation4], 4294966272 }
 0xa04   :  { %3182 = vsyncpa [#allocation3], 1 }
 0xa05   :  { %3183 = vsyncpa [#allocation6], 1 }
 0xa06   :  { %3184 = vsyncpa [#allocation4], 1 }

</bundles_post_ra>
